<compile_context>
chip_gen: v7x
topology: tpu7x:2x2x1
jax: 0.10.0
libtpu: 0.0.40
codegen_flags: <defaults>
</compile_context>

<pallas_src>
import functools

import jax
import jax.numpy as jnp
from jax.experimental import pallas as pl
from jax.experimental.pallas import tpu as pltpu


# ----------------------------- kernel -------------------------------------


def _layer_norm(x, gamma, beta, eps=1e-5):
    # x: (T, H) f32; gamma/beta: (1, H) f32
    mean = jnp.mean(x, axis=-1, keepdims=True)
    var = jnp.mean((x - mean) ** 2, axis=-1, keepdims=True)
    return (x - mean) * jax.lax.rsqrt(var + eps) * gamma + beta


def encoder_layer_kernel(
    bias_ref, xq_ref, xkv_ref,
    wq_ref, bq_ref, wk_ref, bk_ref, wv_ref, bv_ref, wo_ref, bo_ref,
    g1_ref, be1_ref,
    w1_ref, b1_ref, w2_ref, b2_ref,
    g2_ref, be2_ref,
    out_ref,
    k_sc, v_sc,
    *, n_heads, k_tile,
):
    _, S, H = xkv_ref.shape                       # full sequence block (bf16)
    tq = xq_ref.shape[1]                          # query tile rows (f32)
    hd = H // n_heads
    n_kt = S // k_tile

    # ---- K/V projections: once per batch element (query-tile index 0) ----
    @pl.when(pl.program_id(1) == 0)
    def _():
        xkv = xkv_ref[0]                                           # (S, H) bf16
        k = jnp.dot(xkv, wk_ref[...], preferred_element_type=jnp.float32) + bk_ref[...]
        v = jnp.dot(xkv, wv_ref[...], preferred_element_type=jnp.float32) + bv_ref[...]
        # Head layout (h, S, hd) in bf16: this relayout happens once per
        # batch element, not once per query tile.
        k_sc[...] = k.reshape(S, n_heads, hd).transpose(1, 0, 2).astype(jnp.bfloat16)
        v_sc[...] = v.reshape(S, n_heads, hd).transpose(1, 0, 2).astype(jnp.bfloat16)

    # ---- Q projection for this query tile (1/sqrt(hd) folded into wq/bq) --
    xq = xq_ref[0]                                                 # (tq, H) f32
    q = jnp.dot(xq.astype(jnp.bfloat16), wq_ref[...],
                preferred_element_type=jnp.float32) + bq_ref[...]
    qh = q.reshape(tq, n_heads, hd).transpose(1, 0, 2).astype(jnp.bfloat16)

    # ---- flash-style attention over key tiles of the resident K/V --------
    def kv_step(kt, carry):
        m_i, l_i, acc = carry
        off = kt * k_tile
        if not isinstance(off, int):
            off = pl.multiple_of(off, k_tile)
        kb = k_sc[:, pl.ds(off, k_tile), :]                        # (h, tk, hd) bf16
        vb = v_sc[:, pl.ds(off, k_tile), :]                        # (h, tk, hd) bf16
        bb = bias_ref[0, pl.ds(kt, 1), :]                          # (1, tk)  f32
        e = jnp.einsum("hqd,hkd->hqk", qh, kb,
                       preferred_element_type=jnp.float32) + bb    # (h, tq, tk)
        m_new = jnp.maximum(m_i, jnp.max(e, axis=-1, keepdims=True))
        alpha = jnp.exp(m_i - m_new)
        p = jnp.exp(e - m_new)
        l_new = alpha * l_i + jnp.sum(p, axis=-1, keepdims=True)
        acc_new = alpha * acc + jnp.einsum(
            "hqk,hkd->hqd", p.astype(jnp.bfloat16), vb,
            preferred_element_type=jnp.float32)
        return m_new, l_new, acc_new

    carry0 = (jnp.full((n_heads, tq, 1), -jnp.inf, jnp.float32),
              jnp.zeros((n_heads, tq, 1), jnp.float32),
              jnp.zeros((n_heads, tq, hd), jnp.float32))
    if n_kt == 1:
        # Single key tile: everything is a static slice (no inner loop).
        _, l_f, acc_f = kv_step(0, carry0)
    else:
        _, l_f, acc_f = jax.lax.fori_loop(0, n_kt, kv_step, carry0)

    # TODO(synk): attention-weight dropout is identity in inference mode.
    ctx = acc_f * pl.reciprocal(l_f, approx=True)          # softmax denom on EUP
    ctx = ctx.transpose(1, 0, 2).reshape(tq, H)
    attn_out = jnp.dot(ctx.astype(jnp.bfloat16), wo_ref[...],
                       preferred_element_type=jnp.float32) + bo_ref[...]

    # residual + layer norm 1 (f32)
    x1 = _layer_norm(xq + attn_out, g1_ref[...], be1_ref[...])

    # ---- position-wise feed-forward (bf16 MXU inputs, f32 accumulation) ---
    h1 = jnp.dot(x1.astype(jnp.bfloat16), w1_ref[...],
                 preferred_element_type=jnp.float32) + b1_ref[...]
    h1 = jnp.maximum(h1, 0.0).astype(jnp.bfloat16)   # cast right after ReLU
    ff = jnp.dot(h1, w2_ref[...],
                 preferred_element_type=jnp.float32) + b2_ref[...]

    # residual + layer norm 2 (f32)
    x2 = _layer_norm(x1 + ff, g2_ref[...], be2_ref[...])
    out_ref[0] = x2.astype(out_ref.dtype)


# ----------------------------- wrapper -------------------------------------


PARAM_ORDER = ["wq", "bq", "wk", "bk", "wv", "bv", "wo", "bo",
               "g1", "be1", "w1", "b1", "w2", "b2", "g2", "be2"]
_MATMUL_WEIGHTS = frozenset({"wq", "wk", "wv", "wo", "w1", "w2"})


def _vmem_limit_bytes():
    """~3/4 of physical VMEM: ~96 MiB on v5e/v6e (128 MiB), ~48 MiB on v7x (64 MiB)."""
    try:
        cap = int(pltpu.get_tpu_info().vmem_capacity_bytes)
        return max(32 * 1024 * 1024, cap * 3 // 4)
    except Exception:
        return 64 * 1024 * 1024


def encoder_layer(src, src_mask, params, n_heads, q_tile=256, k_tile=512):
    """src: (B, S, H) f32, src_mask: (B, 1, S) int32 (0 = masked key)."""
    B, S, H = src.shape
    assert H % n_heads == 0, "hid_dim must be divisible by n_heads"
    tq = min(q_tile, S)
    assert S % tq == 0, "seq len must be divisible by the query tile"
    tk = min(k_tile, S)
    assert S % tk == 0, "seq len must be divisible by the key tile"
    n_kt = S // tk
    hd = H // n_heads
    inv_scale = 1.0 / float(hd) ** 0.5

    # Parameter prep (once per call, tiny XLA ops):
    #   * 1/sqrt(head_dim) folded into the query projection,
    #   * matmul weights stored bf16 (half the HBM traffic / VMEM residency),
    #   * biases / LayerNorm params stay f32 (added to f32 accumulators).
    prepped = dict(params)
    prepped["wq"] = params["wq"] * inv_scale
    prepped["bq"] = params["bq"] * inv_scale
    weights = []
    for name in PARAM_ORDER:
        w = prepped[name]
        if name in _MATMUL_WEIGHTS:
            w = w.astype(jnp.bfloat16)
        weights.append(w)

    # Additive attention-mask bias, reshaped so each key tile is one row
    # (indexed with pl.ds on the sublane axis; no lane-axis dynamic slices).
    mask_bias = jnp.where(src_mask == 0, -1e10, 0.0).astype(jnp.float32)
    mask_bias = mask_bias.reshape(B, n_kt, tk)

    # Full-sequence stream feeding K/V is bf16 (MXU inputs are bf16 anyway);
    # the small per-tile query stream stays f32 for exact residuals.
    src_bf = src.astype(jnp.bfloat16)

    kernel = functools.partial(encoder_layer_kernel, n_heads=n_heads, k_tile=tk)

    def build_and_run(single_buffer_weights):
        def w_spec(a):
            nd = a.ndim
            kwargs = {}
            if single_buffer_weights:
                # Constant block index across the whole grid: double-buffering
                # buys nothing, single-buffer to free VMEM (key on v7x 64 MiB).
                kwargs["pipeline_mode"] = pl.Buffered(1)
            return pl.BlockSpec(a.shape, lambda b, qi, _nd=nd: (0,) * _nd, **kwargs)

        grid_spec = pltpu.PrefetchScalarGridSpec(
            num_scalar_prefetch=0,
            grid=(B, S // tq),                      # query-tile axis innermost
            in_specs=[
                pl.BlockSpec((1, n_kt, tk), lambda b, qi: (b, 0, 0)),  # mask bias
                pl.BlockSpec((1, tq, H), lambda b, qi: (b, qi, 0)),    # f32 query rows
                pl.BlockSpec((1, S, H), lambda b, qi: (b, 0, 0)),      # bf16 seq (K/V)
            ] + [w_spec(a) for a in weights],
            out_specs=pl.BlockSpec((1, tq, H), lambda b, qi: (b, qi, 0)),
            scratch_shapes=[
                pltpu.VMEM((n_heads, S, hd), jnp.bfloat16),   # K, head layout
                pltpu.VMEM((n_heads, S, hd), jnp.bfloat16),   # V, head layout
            ],
        )
        return pl.pallas_call(
            kernel,
            out_shape=jax.ShapeDtypeStruct((B, S, H), src.dtype),
            grid_spec=grid_spec,
            compiler_params=pltpu.CompilerParams(
                # batch tiles are independent (megacore-shardable); the query
                # tile axis must be sequential so the K/V scratch written at
                # qi == 0 is reused by the rest of that batch element's sweep.
                dimension_semantics=("parallel", "arbitrary"),
                vmem_limit_bytes=_vmem_limit_bytes(),
            ),
        )(mask_bias, src, src_bf, *weights)

    try:
        return build_and_run(single_buffer_weights=True)
    except Exception:
        # Fallback for builds where Buffered(1) single-buffering is rejected.
        return build_and_run(single_buffer_weights=False)


# ----------------------- pure-JAX reference check --------------------------


def encoder_layer_ref(src, src_mask, params, n_heads):
    B, S, H = src.shape
    hd = H // n_heads

    def ln(x, g, b):
        m = jnp.mean(x, -1, keepdims=True)
        v = jnp.mean((x - m) ** 2, -1, keepdims=True)
        return (x - m) / jnp.sqrt(v + 1e-5) * g + b

    q = src @ params["wq"] + params["bq"]
    k = src @ params["wk"] + params["bk"]
    v = src @ params["wv"] + params["bv"]
    q = q.reshape(B, S, n_heads, hd).transpose(0, 2, 1, 3)
    k = k.reshape(B, S, n_heads, hd).transpose(0, 2, 1, 3)
    v = v.reshape(B, S, n_heads, hd).transpose(0, 2, 1, 3)
    energy = jnp.einsum("bhqd,bhkd->bhqk", q, k) / (hd ** 0.5)
    mask4 = src_mask[:, None, :, :]              # (B,1,1,S)
    energy = jnp.where(mask4 == 0, -1e10, energy)
    attn = jax.nn.softmax(energy, -1)
    ctx = jnp.einsum("bhqk,bhkd->bhqd", attn, v).transpose(0, 2, 1, 3).reshape(B, S, H)
    attn_out = ctx @ params["wo"] + params["bo"]
    x1 = ln(src + attn_out, params["g1"], params["be1"])
    ff = jax.nn.relu(x1 @ params["w1"] + params["b1"]) @ params["w2"] + params["b2"]
    return ln(x1 + ff, params["g2"], params["be2"])


# ----------------------------- main -----------------------------------------


def init_params(key, hid_dim, pf_dim):
    keys = jax.random.split(key, 12)

    def lin(kw, kb, din, dout):
        w = jax.random.normal(kw, (din, dout), jnp.float32) * 0.05
        b = jax.random.normal(kb, (1, dout), jnp.float32) * 0.05
        return w, b

    p = {}
    p["wq"], p["bq"] = lin(keys[0], keys[1], hid_dim, hid_dim)
    p["wk"], p["bk"] = lin(keys[2], keys[3], hid_dim, hid_dim)
    p["wv"], p["bv"] = lin(keys[4], keys[5], hid_dim, hid_dim)
    p["wo"], p["bo"] = lin(keys[6], keys[7], hid_dim, hid_dim)
    p["w1"], p["b1"] = lin(keys[8], keys[9], hid_dim, pf_dim)
    p["w2"], p["b2"] = lin(keys[10], keys[11], pf_dim, hid_dim)
    # LayerNorm params: PyTorch default init (ones / zeros)
    p["g1"] = jnp.ones((1, hid_dim), jnp.float32)
    p["be1"] = jnp.zeros((1, hid_dim), jnp.float32)
    p["g2"] = jnp.ones((1, hid_dim), jnp.float32)
    p["be2"] = jnp.zeros((1, hid_dim), jnp.float32)
    return p


if __name__ == "__main__":
    B, S, H, NH, PF = 2, 8, 32, 4, 64

    key = jax.random.PRNGKey(0)
    k_src, k_par = jax.random.split(key)
    src = jax.random.normal(k_src, (B, S, H), jnp.float32)
    # integer 0/1 mask: batch 0 fully valid, batch 1 has last 2 keys masked
    src_mask = jnp.ones((B, 1, S), jnp.int32).at[1, 0, 6:].set(0)

    params = init_params(k_par, H, PF)

    out = encoder_layer(src, src_mask, params, NH)
    out = jax.block_until_ready(out)

    ref = encoder_layer_ref(src, src_mask, params, NH)
    assert out.shape == (B, S, H)
    # Tolerance accounts for bf16 MXU inputs (f32 accumulation) in the kernel
    # vs. the pure-f32 reference.
    assert jnp.allclose(out, ref, atol=2e-2, rtol=2e-2), "mismatch vs reference"

    print("KERNEL_OK")
</pallas_src>

<mosaic_0001>
module attributes {stable_mosaic.version = 11 : i64} {
  func.func @encoder_layer_kernel(%arg0: i32, %arg1: i32, %arg2: memref<1x1x8xf32, #tpu.memory_space<vmem>>, %arg3: memref<1x8x32xf32, #tpu.memory_space<vmem>>, %arg4: memref<1x8x32xbf16, #tpu.memory_space<vmem>>, %arg5: memref<32x32xbf16, #tpu.memory_space<vmem>>, %arg6: memref<1x32xf32, #tpu.memory_space<vmem>>, %arg7: memref<32x32xbf16, #tpu.memory_space<vmem>>, %arg8: memref<1x32xf32, #tpu.memory_space<vmem>>, %arg9: memref<32x32xbf16, #tpu.memory_space<vmem>>, %arg10: memref<1x32xf32, #tpu.memory_space<vmem>>, %arg11: memref<32x32xbf16, #tpu.memory_space<vmem>>, %arg12: memref<1x32xf32, #tpu.memory_space<vmem>>, %arg13: memref<1x32xf32, #tpu.memory_space<vmem>>, %arg14: memref<1x32xf32, #tpu.memory_space<vmem>>, %arg15: memref<32x64xbf16, #tpu.memory_space<vmem>>, %arg16: memref<1x64xf32, #tpu.memory_space<vmem>>, %arg17: memref<64x32xbf16, #tpu.memory_space<vmem>>, %arg18: memref<1x32xf32, #tpu.memory_space<vmem>>, %arg19: memref<1x32xf32, #tpu.memory_space<vmem>>, %arg20: memref<1x32xf32, #tpu.memory_space<vmem>>, %arg21: memref<1x8x32xf32, #tpu.memory_space<vmem>>, %arg22: memref<4x8x8xbf16, #tpu.memory_space<vmem>>, %arg23: memref<4x8x8xbf16, #tpu.memory_space<vmem>>) attributes {dimension_semantics = [#tpu.dimension_semantics<parallel>, #tpu.dimension_semantics<arbitrary>], iteration_bounds = array<i64: 2, 1>, scalar_prefetch = 0 : i64, scratch_operands = 2 : i64, tpu.core_type = #tpu.core_type<tc>, window_params = [{transform_indices = @transform_0, window_bounds = array<i64: 1, 1, 8>}, {transform_indices = @transform_1, window_bounds = array<i64: 1, 8, 32>}, {transform_indices = @transform_2, window_bounds = array<i64: 1, 8, 32>}, {pipeline_mode = #tpu.pipeline_mode<synchronous>, transform_indices = @transform_3, window_bounds = array<i64: 32, 32>}, {pipeline_mode = #tpu.pipeline_mode<synchronous>, transform_indices = @transform_4, window_bounds = array<i64: 1, 32>}, {pipeline_mode = #tpu.pipeline_mode<synchronous>, transform_indices = @transform_5, window_bounds = array<i64: 32, 32>}, {pipeline_mode = #tpu.pipeline_mode<synchronous>, transform_indices = @transform_6, window_bounds = array<i64: 1, 32>}, {pipeline_mode = #tpu.pipeline_mode<synchronous>, transform_indices = @transform_7, window_bounds = array<i64: 32, 32>}, {pipeline_mode = #tpu.pipeline_mode<synchronous>, transform_indices = @transform_8, window_bounds = array<i64: 1, 32>}, {pipeline_mode = #tpu.pipeline_mode<synchronous>, transform_indices = @transform_9, window_bounds = array<i64: 32, 32>}, {pipeline_mode = #tpu.pipeline_mode<synchronous>, transform_indices = @transform_10, window_bounds = array<i64: 1, 32>}, {pipeline_mode = #tpu.pipeline_mode<synchronous>, transform_indices = @transform_11, window_bounds = array<i64: 1, 32>}, {pipeline_mode = #tpu.pipeline_mode<synchronous>, transform_indices = @transform_12, window_bounds = array<i64: 1, 32>}, {pipeline_mode = #tpu.pipeline_mode<synchronous>, transform_indices = @transform_13, window_bounds = array<i64: 32, 64>}, {pipeline_mode = #tpu.pipeline_mode<synchronous>, transform_indices = @transform_14, window_bounds = array<i64: 1, 64>}, {pipeline_mode = #tpu.pipeline_mode<synchronous>, transform_indices = @transform_15, window_bounds = array<i64: 64, 32>}, {pipeline_mode = #tpu.pipeline_mode<synchronous>, transform_indices = @transform_16, window_bounds = array<i64: 1, 32>}, {pipeline_mode = #tpu.pipeline_mode<synchronous>, transform_indices = @transform_17, window_bounds = array<i64: 1, 32>}, {pipeline_mode = #tpu.pipeline_mode<synchronous>, transform_indices = @transform_18, window_bounds = array<i64: 1, 32>}, {transform_indices = @transform_19, window_bounds = array<i64: 1, 8, 32>}]} {
    %c0_i32 = arith.constant 0 : i32
    %0 = arith.cmpi eq, %arg1, %c0_i32 : i32
    %1 = arith.extui %0 : i1 to i32
    %c0_i32_0 = arith.constant 0 : i32
    %2 = arith.cmpi ne, %1, %c0_i32_0 : i32
    scf.if %2 {
      %c0_60 = arith.constant 0 : index
      %c0_61 = arith.constant 0 : index
      %c0_62 = arith.constant 0 : index
      %120 = vector.load %arg4[%c0_60, %c0_61, %c0_62] : memref<1x8x32xbf16, #tpu.memory_space<vmem>>, vector<1x8x32xbf16>
      %121 = vector.shape_cast %120 : vector<1x8x32xbf16> to vector<8x32xbf16>
      %c0_63 = arith.constant 0 : index
      %c0_64 = arith.constant 0 : index
      %122 = vector.load %arg7[%c0_63, %c0_64] : memref<32x32xbf16, #tpu.memory_space<vmem>>, vector<32x32xbf16>
      %cst_65 = arith.constant dense<0.000000e+00> : vector<8x32xf32>
      %123 = tpu.matmul %121, %122, %cst_65 {dimension_numbers = #tpu.dot_dimension_numbers<[1], [0], [0], [1], [0, 0, 1, 1], [], []>} : vector<8x32xbf16>, vector<32x32xbf16>, vector<8x32xf32> -> vector<8x32xf32>
      %c0_66 = arith.constant 0 : index
      %c0_67 = arith.constant 0 : index
      %124 = vector.load %arg8[%c0_66, %c0_67] : memref<1x32xf32, #tpu.memory_space<vmem>>, vector<1x32xf32>
      %125 = vector.broadcast %124 : vector<1x32xf32> to vector<8x32xf32>
      %126 = arith.addf %123, %125 : vector<8x32xf32>
      %c0_68 = arith.constant 0 : index
      %c0_69 = arith.constant 0 : index
      %127 = vector.load %arg9[%c0_68, %c0_69] : memref<32x32xbf16, #tpu.memory_space<vmem>>, vector<32x32xbf16>
      %cst_70 = arith.constant dense<0.000000e+00> : vector<8x32xf32>
      %128 = tpu.matmul %121, %127, %cst_70 {dimension_numbers = #tpu.dot_dimension_numbers<[1], [0], [0], [1], [0, 0, 1, 1], [], []>} : vector<8x32xbf16>, vector<32x32xbf16>, vector<8x32xf32> -> vector<8x32xf32>
      %c0_71 = arith.constant 0 : index
      %c0_72 = arith.constant 0 : index
      %129 = vector.load %arg10[%c0_71, %c0_72] : memref<1x32xf32, #tpu.memory_space<vmem>>, vector<1x32xf32>
      %130 = vector.broadcast %129 : vector<1x32xf32> to vector<8x32xf32>
      %131 = arith.addf %128, %130 : vector<8x32xf32>
      %132 = vector.shape_cast %126 : vector<8x32xf32> to vector<8x4x8xf32>
      %133 = tpu.transpose %132, [1, 0, 2] : vector<8x4x8xf32> -> vector<4x8x8xf32>
      %134 = arith.truncf %133 : vector<4x8x8xf32> to vector<4x8x8xbf16>
      %c0_73 = arith.constant 0 : index
      %c0_74 = arith.constant 0 : index
      %c0_75 = arith.constant 0 : index
      %135 = vector.load %arg22[%c0_73, %c0_74, %c0_75] : memref<4x8x8xbf16, #tpu.memory_space<vmem>>, vector<4x8x8xbf16>
      tpu.vector_store %arg22[%c0_73, %c0_74, %c0_75], %134 {strides = array<i32>} : memref<4x8x8xbf16, #tpu.memory_space<vmem>>, vector<4x8x8xbf16>,
      %136 = vector.shape_cast %131 : vector<8x32xf32> to vector<8x4x8xf32>
      %137 = tpu.transpose %136, [1, 0, 2] : vector<8x4x8xf32> -> vector<4x8x8xf32>
      %138 = arith.truncf %137 : vector<4x8x8xf32> to vector<4x8x8xbf16>
      %c0_76 = arith.constant 0 : index
      %c0_77 = arith.constant 0 : index
      %c0_78 = arith.constant 0 : index
      %139 = vector.load %arg23[%c0_76, %c0_77, %c0_78] : memref<4x8x8xbf16, #tpu.memory_space<vmem>>, vector<4x8x8xbf16>
      tpu.vector_store %arg23[%c0_76, %c0_77, %c0_78], %138 {strides = array<i32>} : memref<4x8x8xbf16, #tpu.memory_space<vmem>>, vector<4x8x8xbf16>,
    } else {
    }
    %c0 = arith.constant 0 : index
    %c0_1 = arith.constant 0 : index
    %c0_2 = arith.constant 0 : index
    %3 = vector.load %arg3[%c0, %c0_1, %c0_2] : memref<1x8x32xf32, #tpu.memory_space<vmem>>, vector<1x8x32xf32>
    %4 = vector.shape_cast %3 : vector<1x8x32xf32> to vector<8x32xf32>
    %5 = arith.truncf %4 : vector<8x32xf32> to vector<8x32xbf16>
    %c0_3 = arith.constant 0 : index
    %c0_4 = arith.constant 0 : index
    %6 = vector.load %arg5[%c0_3, %c0_4] : memref<32x32xbf16, #tpu.memory_space<vmem>>, vector<32x32xbf16>
    %cst = arith.constant dense<0.000000e+00> : vector<8x32xf32>
    %7 = tpu.matmul %5, %6, %cst {dimension_numbers = #tpu.dot_dimension_numbers<[1], [0], [0], [1], [0, 0, 1, 1], [], []>} : vector<8x32xbf16>, vector<32x32xbf16>, vector<8x32xf32> -> vector<8x32xf32>
    %c0_5 = arith.constant 0 : index
    %c0_6 = arith.constant 0 : index
    %8 = vector.load %arg6[%c0_5, %c0_6] : memref<1x32xf32, #tpu.memory_space<vmem>>, vector<1x32xf32>
    %9 = vector.broadcast %8 : vector<1x32xf32> to vector<8x32xf32>
    %10 = arith.addf %7, %9 : vector<8x32xf32>
    %11 = vector.shape_cast %10 : vector<8x32xf32> to vector<8x4x8xf32>
    %12 = tpu.transpose %11, [1, 0, 2] : vector<8x4x8xf32> -> vector<4x8x8xf32>
    %13 = arith.truncf %12 : vector<4x8x8xf32> to vector<4x8x8xbf16>
    %cst_7 = arith.constant 0xFF800000 : f32
    %14 = vector.broadcast %cst_7 : f32 to vector<4x8x1xf32>
    %cst_8 = arith.constant 0.000000e+00 : f32
    %15 = vector.broadcast %cst_8 : f32 to vector<4x8x1xf32>
    %cst_9 = arith.constant 0.000000e+00 : f32
    %16 = vector.broadcast %cst_9 : f32 to vector<4x8x8xf32>
    %c0_10 = arith.constant 0 : index
    %c0_11 = arith.constant 0 : index
    %c0_12 = arith.constant 0 : index
    %17 = vector.load %arg22[%c0_10, %c0_11, %c0_12] : memref<4x8x8xbf16, #tpu.memory_space<vmem>>, vector<4x8x8xbf16>
    %c0_13 = arith.constant 0 : index
    %c0_14 = arith.constant 0 : index
    %c0_15 = arith.constant 0 : index
    %18 = vector.load %arg23[%c0_13, %c0_14, %c0_15] : memref<4x8x8xbf16, #tpu.memory_space<vmem>>, vector<4x8x8xbf16>
    %c0_16 = arith.constant 0 : index
    %c0_17 = arith.constant 0 : index
    %c0_18 = arith.constant 0 : index
    %19 = vector.load %arg2[%c0_16, %c0_17, %c0_18] : memref<1x1x8xf32, #tpu.memory_space<vmem>>, vector<1x1x8xf32>
    %20 = vector.shape_cast %19 : vector<1x1x8xf32> to vector<1x8xf32>
    "tpu.trace_start"() <{level = 10 : i32, message = "hqd,hkd->hqk"}> : () -> ()
    %cst_19 = arith.constant dense<0.000000e+00> : vector<4x8x8xf32>
    %21 = tpu.matmul %13, %17, %cst_19 {dimension_numbers = #tpu.dot_dimension_numbers<[2], [2], [1], [1], [0, 0, 0, 1, 1, 1], [0], [0]>} : vector<4x8x8xbf16>, vector<4x8x8xbf16>, vector<4x8x8xf32> -> vector<4x8x8xf32>
    "tpu.trace_stop"() : () -> ()
    %22 = vector.shape_cast %20 : vector<1x8xf32> to vector<1x1x8xf32>
    %23 = vector.broadcast %22 : vector<1x1x8xf32> to vector<4x8x8xf32>
    %24 = arith.addf %21, %23 : vector<4x8x8xf32>
    %cst_20 = arith.constant dense<0xFF800000> : vector<4x8xf32>
    %25 = vector.multi_reduction <maximumf>, %24, %cst_20 [2] : vector<4x8x8xf32> to vector<4x8xf32>
    %26 = vector.shape_cast %25 : vector<4x8xf32> to vector<4x8x1xf32>
    %27 = arith.maximumf %14, %26 : vector<4x8x1xf32>
    %28 = arith.subf %14, %27 : vector<4x8x1xf32>
    %29 = math.exp %28 : vector<4x8x1xf32>
    %30 = vector.broadcast %27 : vector<4x8x1xf32> to vector<4x8x8xf32>
    %31 = arith.subf %24, %30 : vector<4x8x8xf32>
    %32 = math.exp %31 : vector<4x8x8xf32>
    %33 = arith.mulf %29, %15 : vector<4x8x1xf32>
    %cst_21 = arith.constant dense<0.000000e+00> : vector<4x8xf32>
    %34 = vector.multi_reduction <add>, %32, %cst_21 [2] : vector<4x8x8xf32> to vector<4x8xf32>
    %35 = vector.shape_cast %34 : vector<4x8xf32> to vector<4x8x1xf32>
    %36 = arith.addf %33, %35 : vector<4x8x1xf32>
    %37 = vector.broadcast %29 : vector<4x8x1xf32> to vector<4x8x8xf32>
    %38 = arith.mulf %37, %16 : vector<4x8x8xf32>
    %39 = arith.truncf %32 : vector<4x8x8xf32> to vector<4x8x8xbf16>
    "tpu.trace_start"() <{level = 10 : i32, message = "hqk,hkd->hqd"}> : () -> ()
    %cst_22 = arith.constant dense<0.000000e+00> : vector<4x8x8xf32>
    %40 = tpu.matmul %39, %18, %cst_22 {dimension_numbers = #tpu.dot_dimension_numbers<[2], [1], [1], [2], [0, 0, 0, 1, 1, 2], [0], [0]>} : vector<4x8x8xbf16>, vector<4x8x8xbf16>, vector<4x8x8xf32> -> vector<4x8x8xf32>
    "tpu.trace_stop"() : () -> ()
    %41 = arith.addf %38, %40 : vector<4x8x8xf32>
    %42 = tpu.reciprocal %36 {approx = true} : vector<4x8x1xf32> -> vector<4x8x1xf32>
    %43 = vector.broadcast %42 : vector<4x8x1xf32> to vector<4x8x8xf32>
    %44 = arith.mulf %41, %43 : vector<4x8x8xf32>
    %45 = tpu.transpose %44, [1, 0, 2] : vector<4x8x8xf32> -> vector<8x4x8xf32>
    %46 = vector.shape_cast %45 : vector<8x4x8xf32> to vector<8x32xf32>
    %47 = arith.truncf %46 : vector<8x32xf32> to vector<8x32xbf16>
    %c0_23 = arith.constant 0 : index
    %c0_24 = arith.constant 0 : index
    %48 = vector.load %arg11[%c0_23, %c0_24] : memref<32x32xbf16, #tpu.memory_space<vmem>>, vector<32x32xbf16>
    %cst_25 = arith.constant dense<0.000000e+00> : vector<8x32xf32>
    %49 = tpu.matmul %47, %48, %cst_25 {dimension_numbers = #tpu.dot_dimension_numbers<[1], [0], [0], [1], [0, 0, 1, 1], [], []>} : vector<8x32xbf16>, vector<32x32xbf16>, vector<8x32xf32> -> vector<8x32xf32>
    %c0_26 = arith.constant 0 : index
    %c0_27 = arith.constant 0 : index
    %50 = vector.load %arg12[%c0_26, %c0_27] : memref<1x32xf32, #tpu.memory_space<vmem>>, vector<1x32xf32>
    %51 = vector.broadcast %50 : vector<1x32xf32> to vector<8x32xf32>
    %52 = arith.addf %49, %51 : vector<8x32xf32>
    %53 = arith.addf %4, %52 : vector<8x32xf32>
    %c0_28 = arith.constant 0 : index
    %c0_29 = arith.constant 0 : index
    %54 = vector.load %arg13[%c0_28, %c0_29] : memref<1x32xf32, #tpu.memory_space<vmem>>, vector<1x32xf32>
    %c0_30 = arith.constant 0 : index
    %c0_31 = arith.constant 0 : index
    %55 = vector.load %arg14[%c0_30, %c0_31] : memref<1x32xf32, #tpu.memory_space<vmem>>, vector<1x32xf32>
    %cst_32 = arith.constant dense<0.000000e+00> : vector<8xf32>
    %56 = vector.multi_reduction <add>, %53, %cst_32 [1] : vector<8x32xf32> to vector<8xf32>
    %57 = vector.shape_cast %56 : vector<8xf32> to vector<8x1xf32>
    %cst_33 = arith.constant 3.200000e+01 : f32
    %58 = vector.broadcast %cst_33 : f32 to vector<8x1xf32>
    %59 = arith.divf %57, %58 : vector<8x1xf32>
    %60 = vector.broadcast %59 : vector<8x1xf32> to vector<8x32xf32>
    %61 = arith.subf %53, %60 : vector<8x32xf32>
    %62 = arith.mulf %61, %61 : vector<8x32xf32>
    %cst_34 = arith.constant dense<0.000000e+00> : vector<8xf32>
    %63 = vector.multi_reduction <add>, %62, %cst_34 [1] : vector<8x32xf32> to vector<8xf32>
    %64 = vector.shape_cast %63 : vector<8xf32> to vector<8x1xf32>
    %cst_35 = arith.constant 3.200000e+01 : f32
    %65 = vector.broadcast %cst_35 : f32 to vector<8x1xf32>
    %66 = arith.divf %64, %65 : vector<8x1xf32>
    %67 = vector.broadcast %59 : vector<8x1xf32> to vector<8x32xf32>
    %68 = arith.subf %53, %67 : vector<8x32xf32>
    %cst_36 = arith.constant 9.99999974E-6 : f32
    %69 = vector.broadcast %cst_36 : f32 to vector<8x1xf32>
    %70 = arith.addf %66, %69 : vector<8x1xf32>
    %71 = math.rsqrt %70 : vector<8x1xf32>
    %72 = vector.broadcast %71 : vector<8x1xf32> to vector<8x32xf32>
    %73 = arith.mulf %68, %72 : vector<8x32xf32>
    %74 = vector.broadcast %54 : vector<1x32xf32> to vector<8x32xf32>
    %75 = arith.mulf %73, %74 : vector<8x32xf32>
    %76 = vector.broadcast %55 : vector<1x32xf32> to vector<8x32xf32>
    %77 = arith.addf %75, %76 : vector<8x32xf32>
    %78 = arith.truncf %77 : vector<8x32xf32> to vector<8x32xbf16>
    %c0_37 = arith.constant 0 : index
    %c0_38 = arith.constant 0 : index
    %79 = vector.load %arg15[%c0_37, %c0_38] : memref<32x64xbf16, #tpu.memory_space<vmem>>, vector<32x64xbf16>
    %cst_39 = arith.constant dense<0.000000e+00> : vector<8x64xf32>
    %80 = tpu.matmul %78, %79, %cst_39 {dimension_numbers = #tpu.dot_dimension_numbers<[1], [0], [0], [1], [0, 0, 1, 1], [], []>} : vector<8x32xbf16>, vector<32x64xbf16>, vector<8x64xf32> -> vector<8x64xf32>
    %c0_40 = arith.constant 0 : index
    %c0_41 = arith.constant 0 : index
    %81 = vector.load %arg16[%c0_40, %c0_41] : memref<1x64xf32, #tpu.memory_space<vmem>>, vector<1x64xf32>
    %82 = vector.broadcast %81 : vector<1x64xf32> to vector<8x64xf32>
    %83 = arith.addf %80, %82 : vector<8x64xf32>
    %cst_42 = arith.constant 0.000000e+00 : f32
    %84 = vector.broadcast %cst_42 : f32 to vector<8x64xf32>
    %85 = arith.maximumf %83, %84 : vector<8x64xf32>
    %86 = arith.truncf %85 : vector<8x64xf32> to vector<8x64xbf16>
    %c0_43 = arith.constant 0 : index
    %c0_44 = arith.constant 0 : index
    %87 = vector.load %arg17[%c0_43, %c0_44] : memref<64x32xbf16, #tpu.memory_space<vmem>>, vector<64x32xbf16>
    %cst_45 = arith.constant dense<0.000000e+00> : vector<8x32xf32>
    %88 = tpu.matmul %86, %87, %cst_45 {dimension_numbers = #tpu.dot_dimension_numbers<[1], [0], [0], [1], [0, 0, 1, 1], [], []>} : vector<8x64xbf16>, vector<64x32xbf16>, vector<8x32xf32> -> vector<8x32xf32>
    %c0_46 = arith.constant 0 : index
    %c0_47 = arith.constant 0 : index
    %89 = vector.load %arg18[%c0_46, %c0_47] : memref<1x32xf32, #tpu.memory_space<vmem>>, vector<1x32xf32>
    %90 = vector.broadcast %89 : vector<1x32xf32> to vector<8x32xf32>
    %91 = arith.addf %88, %90 : vector<8x32xf32>
    %92 = arith.addf %77, %91 : vector<8x32xf32>
    %c0_48 = arith.constant 0 : index
    %c0_49 = arith.constant 0 : index
    %93 = vector.load %arg19[%c0_48, %c0_49] : memref<1x32xf32, #tpu.memory_space<vmem>>, vector<1x32xf32>
    %c0_50 = arith.constant 0 : index
    %c0_51 = arith.constant 0 : index
    %94 = vector.load %arg20[%c0_50, %c0_51] : memref<1x32xf32, #tpu.memory_space<vmem>>, vector<1x32xf32>
    %cst_52 = arith.constant dense<0.000000e+00> : vector<8xf32>
    %95 = vector.multi_reduction <add>, %92, %cst_52 [1] : vector<8x32xf32> to vector<8xf32>
    %96 = vector.shape_cast %95 : vector<8xf32> to vector<8x1xf32>
    %cst_53 = arith.constant 3.200000e+01 : f32
    %97 = vector.broadcast %cst_53 : f32 to vector<8x1xf32>
    %98 = arith.divf %96, %97 : vector<8x1xf32>
    %99 = vector.broadcast %98 : vector<8x1xf32> to vector<8x32xf32>
    %100 = arith.subf %92, %99 : vector<8x32xf32>
    %101 = arith.mulf %100, %100 : vector<8x32xf32>
    %cst_54 = arith.constant dense<0.000000e+00> : vector<8xf32>
    %102 = vector.multi_reduction <add>, %101, %cst_54 [1] : vector<8x32xf32> to vector<8xf32>
    %103 = vector.shape_cast %102 : vector<8xf32> to vector<8x1xf32>
    %cst_55 = arith.constant 3.200000e+01 : f32
    %104 = vector.broadcast %cst_55 : f32 to vector<8x1xf32>
    %105 = arith.divf %103, %104 : vector<8x1xf32>
    %106 = vector.broadcast %98 : vector<8x1xf32> to vector<8x32xf32>
    %107 = arith.subf %92, %106 : vector<8x32xf32>
    %cst_56 = arith.constant 9.99999974E-6 : f32
    %108 = vector.broadcast %cst_56 : f32 to vector<8x1xf32>
    %109 = arith.addf %105, %108 : vector<8x1xf32>
    %110 = math.rsqrt %109 : vector<8x1xf32>
    %111 = vector.broadcast %110 : vector<8x1xf32> to vector<8x32xf32>
    %112 = arith.mulf %107, %111 : vector<8x32xf32>
    %113 = vector.broadcast %93 : vector<1x32xf32> to vector<8x32xf32>
    %114 = arith.mulf %112, %113 : vector<8x32xf32>
    %115 = vector.broadcast %94 : vector<1x32xf32> to vector<8x32xf32>
    %116 = arith.addf %114, %115 : vector<8x32xf32>
    %c0_57 = arith.constant 0 : index
    %c0_58 = arith.constant 0 : index
    %c0_59 = arith.constant 0 : index
    %117 = vector.load %arg21[%c0_57, %c0_58, %c0_59] : memref<1x8x32xf32, #tpu.memory_space<vmem>>, vector<1x8x32xf32>
    %118 = vector.shape_cast %117 : vector<1x8x32xf32> to vector<8x32xf32>
    %119 = vector.shape_cast %116 : vector<8x32xf32> to vector<1x8x32xf32>
    tpu.vector_store %arg21[%c0_57, %c0_58, %c0_59], %119 {strides = array<i32>} : memref<1x8x32xf32, #tpu.memory_space<vmem>>, vector<1x8x32xf32>,
    return
  }
  func.func @transform_0(%arg0: i32, %arg1: i32) -> (i32, i32, i32) {
    %c0_i32 = arith.constant 0 : i32
    %c0_i32_0 = arith.constant 0 : i32
    %c0_i32_1 = arith.constant 0 : i32
    return %arg0, %c0_i32, %c0_i32_0 : i32, i32, i32
  }
  func.func @transform_1(%arg0: i32, %arg1: i32) -> (i32, i32, i32) {
    %c0_i32 = arith.constant 0 : i32
    %c0_i32_0 = arith.constant 0 : i32
    return %arg0, %arg1, %c0_i32 : i32, i32, i32
  }
  func.func @transform_2(%arg0: i32, %arg1: i32) -> (i32, i32, i32) {
    %c0_i32 = arith.constant 0 : i32
    %c0_i32_0 = arith.constant 0 : i32
    %c0_i32_1 = arith.constant 0 : i32
    return %arg0, %c0_i32, %c0_i32_0 : i32, i32, i32
  }
  func.func @transform_3(%arg0: i32, %arg1: i32) -> (i32, i32) {
    %c0_i32 = arith.constant 0 : i32
    %c0_i32_0 = arith.constant 0 : i32
    %c0_i32_1 = arith.constant 0 : i32
    return %c0_i32, %c0_i32_0 : i32, i32
  }
  func.func @transform_4(%arg0: i32, %arg1: i32) -> (i32, i32) {
    %c0_i32 = arith.constant 0 : i32
    %c0_i32_0 = arith.constant 0 : i32
    %c0_i32_1 = arith.constant 0 : i32
    return %c0_i32, %c0_i32_0 : i32, i32
  }
  func.func @transform_5(%arg0: i32, %arg1: i32) -> (i32, i32) {
    %c0_i32 = arith.constant 0 : i32
    %c0_i32_0 = arith.constant 0 : i32
    %c0_i32_1 = arith.constant 0 : i32
    return %c0_i32, %c0_i32_0 : i32, i32
  }
  func.func @transform_6(%arg0: i32, %arg1: i32) -> (i32, i32) {
    %c0_i32 = arith.constant 0 : i32
    %c0_i32_0 = arith.constant 0 : i32
    %c0_i32_1 = arith.constant 0 : i32
    return %c0_i32, %c0_i32_0 : i32, i32
  }
  func.func @transform_7(%arg0: i32, %arg1: i32) -> (i32, i32) {
    %c0_i32 = arith.constant 0 : i32
    %c0_i32_0 = arith.constant 0 : i32
    %c0_i32_1 = arith.constant 0 : i32
    return %c0_i32, %c0_i32_0 : i32, i32
  }
  func.func @transform_8(%arg0: i32, %arg1: i32) -> (i32, i32) {
    %c0_i32 = arith.constant 0 : i32
    %c0_i32_0 = arith.constant 0 : i32
    %c0_i32_1 = arith.constant 0 : i32
    return %c0_i32, %c0_i32_0 : i32, i32
  }
  func.func @transform_9(%arg0: i32, %arg1: i32) -> (i32, i32) {
    %c0_i32 = arith.constant 0 : i32
    %c0_i32_0 = arith.constant 0 : i32
    %c0_i32_1 = arith.constant 0 : i32
    return %c0_i32, %c0_i32_0 : i32, i32
  }
  func.func @transform_10(%arg0: i32, %arg1: i32) -> (i32, i32) {
    %c0_i32 = arith.constant 0 : i32
    %c0_i32_0 = arith.constant 0 : i32
    %c0_i32_1 = arith.constant 0 : i32
    return %c0_i32, %c0_i32_0 : i32, i32
  }
  func.func @transform_11(%arg0: i32, %arg1: i32) -> (i32, i32) {
    %c0_i32 = arith.constant 0 : i32
    %c0_i32_0 = arith.constant 0 : i32
    %c0_i32_1 = arith.constant 0 : i32
    return %c0_i32, %c0_i32_0 : i32, i32
  }
  func.func @transform_12(%arg0: i32, %arg1: i32) -> (i32, i32) {
    %c0_i32 = arith.constant 0 : i32
    %c0_i32_0 = arith.constant 0 : i32
    %c0_i32_1 = arith.constant 0 : i32
    return %c0_i32, %c0_i32_0 : i32, i32
  }
  func.func @transform_13(%arg0: i32, %arg1: i32) -> (i32, i32) {
    %c0_i32 = arith.constant 0 : i32
    %c0_i32_0 = arith.constant 0 : i32
    %c0_i32_1 = arith.constant 0 : i32
    return %c0_i32, %c0_i32_0 : i32, i32
  }
  func.func @transform_14(%arg0: i32, %arg1: i32) -> (i32, i32) {
    %c0_i32 = arith.constant 0 : i32
    %c0_i32_0 = arith.constant 0 : i32
    %c0_i32_1 = arith.constant 0 : i32
    return %c0_i32, %c0_i32_0 : i32, i32
  }
  func.func @transform_15(%arg0: i32, %arg1: i32) -> (i32, i32) {
    %c0_i32 = arith.constant 0 : i32
    %c0_i32_0 = arith.constant 0 : i32
    %c0_i32_1 = arith.constant 0 : i32
    return %c0_i32, %c0_i32_0 : i32, i32
  }
  func.func @transform_16(%arg0: i32, %arg1: i32) -> (i32, i32) {
    %c0_i32 = arith.constant 0 : i32
    %c0_i32_0 = arith.constant 0 : i32
    %c0_i32_1 = arith.constant 0 : i32
    return %c0_i32, %c0_i32_0 : i32, i32
  }
  func.func @transform_17(%arg0: i32, %arg1: i32) -> (i32, i32) {
    %c0_i32 = arith.constant 0 : i32
    %c0_i32_0 = arith.constant 0 : i32
    %c0_i32_1 = arith.constant 0 : i32
    return %c0_i32, %c0_i32_0 : i32, i32
  }
  func.func @transform_18(%arg0: i32, %arg1: i32) -> (i32, i32) {
    %c0_i32 = arith.constant 0 : i32
    %c0_i32_0 = arith.constant 0 : i32
    %c0_i32_1 = arith.constant 0 : i32
    return %c0_i32, %c0_i32_0 : i32, i32
  }
  func.func @transform_19(%arg0: i32, %arg1: i32) -> (i32, i32, i32) {
    %c0_i32 = arith.constant 0 : i32
    %c0_i32_0 = arith.constant 0 : i32
    return %arg0, %arg1, %c0_i32 : i32, i32, i32
  }
}

module attributes {stable_mosaic.version = 11 : i64} {
  func.func @encoder_layer_kernel(%arg0: i32, %arg1: i32, %arg2: memref<1x1x8xf32, #tpu.memory_space<vmem>>, %arg3: memref<1x8x32xf32, #tpu.memory_space<vmem>>, %arg4: memref<1x8x32xbf16, #tpu.memory_space<vmem>>, %arg5: memref<32x32xbf16, #tpu.memory_space<vmem>>, %arg6: memref<1x32xf32, #tpu.memory_space<vmem>>, %arg7: memref<32x32xbf16, #tpu.memory_space<vmem>>, %arg8: memref<1x32xf32, #tpu.memory_space<vmem>>, %arg9: memref<32x32xbf16, #tpu.memory_space<vmem>>, %arg10: memref<1x32xf32, #tpu.memory_space<vmem>>, %arg11: memref<32x32xbf16, #tpu.memory_space<vmem>>, %arg12: memref<1x32xf32, #tpu.memory_space<vmem>>, %arg13: memref<1x32xf32, #tpu.memory_space<vmem>>, %arg14: memref<1x32xf32, #tpu.memory_space<vmem>>, %arg15: memref<32x64xbf16, #tpu.memory_space<vmem>>, %arg16: memref<1x64xf32, #tpu.memory_space<vmem>>, %arg17: memref<64x32xbf16, #tpu.memory_space<vmem>>, %arg18: memref<1x32xf32, #tpu.memory_space<vmem>>, %arg19: memref<1x32xf32, #tpu.memory_space<vmem>>, %arg20: memref<1x32xf32, #tpu.memory_space<vmem>>, %arg21: memref<1x8x32xf32, #tpu.memory_space<vmem>>, %arg22: memref<4x8x8xbf16, #tpu.memory_space<vmem>>, %arg23: memref<4x8x8xbf16, #tpu.memory_space<vmem>>) attributes {dimension_semantics = [#tpu.dimension_semantics<parallel>, #tpu.dimension_semantics<arbitrary>], iteration_bounds = array<i64: 2, 1>, scalar_prefetch = 0 : i64, scratch_operands = 2 : i64, tpu.core_type = #tpu.core_type<tc>, window_params = [{transform_indices = @transform_0, window_bounds = array<i64: 1, 1, 8>}, {transform_indices = @transform_1, window_bounds = array<i64: 1, 8, 32>}, {transform_indices = @transform_2, window_bounds = array<i64: 1, 8, 32>}, {pipeline_mode = #tpu.pipeline_mode<synchronous>, transform_indices = @transform_3, window_bounds = array<i64: 32, 32>}, {pipeline_mode = #tpu.pipeline_mode<synchronous>, transform_indices = @transform_4, window_bounds = array<i64: 1, 32>}, {pipeline_mode = #tpu.pipeline_mode<synchronous>, transform_indices = @transform_5, window_bounds = array<i64: 32, 32>}, {pipeline_mode = #tpu.pipeline_mode<synchronous>, transform_indices = @transform_6, window_bounds = array<i64: 1, 32>}, {pipeline_mode = #tpu.pipeline_mode<synchronous>, transform_indices = @transform_7, window_bounds = array<i64: 32, 32>}, {pipeline_mode = #tpu.pipeline_mode<synchronous>, transform_indices = @transform_8, window_bounds = array<i64: 1, 32>}, {pipeline_mode = #tpu.pipeline_mode<synchronous>, transform_indices = @transform_9, window_bounds = array<i64: 32, 32>}, {pipeline_mode = #tpu.pipeline_mode<synchronous>, transform_indices = @transform_10, window_bounds = array<i64: 1, 32>}, {pipeline_mode = #tpu.pipeline_mode<synchronous>, transform_indices = @transform_11, window_bounds = array<i64: 1, 32>}, {pipeline_mode = #tpu.pipeline_mode<synchronous>, transform_indices = @transform_12, window_bounds = array<i64: 1, 32>}, {pipeline_mode = #tpu.pipeline_mode<synchronous>, transform_indices = @transform_13, window_bounds = array<i64: 32, 64>}, {pipeline_mode = #tpu.pipeline_mode<synchronous>, transform_indices = @transform_14, window_bounds = array<i64: 1, 64>}, {pipeline_mode = #tpu.pipeline_mode<synchronous>, transform_indices = @transform_15, window_bounds = array<i64: 64, 32>}, {pipeline_mode = #tpu.pipeline_mode<synchronous>, transform_indices = @transform_16, window_bounds = array<i64: 1, 32>}, {pipeline_mode = #tpu.pipeline_mode<synchronous>, transform_indices = @transform_17, window_bounds = array<i64: 1, 32>}, {pipeline_mode = #tpu.pipeline_mode<synchronous>, transform_indices = @transform_18, window_bounds = array<i64: 1, 32>}, {transform_indices = @transform_19, window_bounds = array<i64: 1, 8, 32>}]} {
    %c0_i32 = arith.constant 0 : i32
    %0 = arith.cmpi eq, %arg1, %c0_i32 : i32
    %1 = arith.extui %0 : i1 to i32
    %c0_i32_0 = arith.constant 0 : i32
    %2 = arith.cmpi ne, %1, %c0_i32_0 : i32
    scf.if %2 {
      %c0_60 = arith.constant 0 : index
      %c0_61 = arith.constant 0 : index
      %c0_62 = arith.constant 0 : index
      %120 = vector.load %arg4[%c0_60, %c0_61, %c0_62] : memref<1x8x32xbf16, #tpu.memory_space<vmem>>, vector<1x8x32xbf16>
      %121 = vector.shape_cast %120 : vector<1x8x32xbf16> to vector<8x32xbf16>
      %c0_63 = arith.constant 0 : index
      %c0_64 = arith.constant 0 : index
      %122 = vector.load %arg7[%c0_63, %c0_64] : memref<32x32xbf16, #tpu.memory_space<vmem>>, vector<32x32xbf16>
      %cst_65 = arith.constant dense<0.000000e+00> : vector<8x32xf32>
      %123 = tpu.matmul %121, %122, %cst_65 {dimension_numbers = #tpu.dot_dimension_numbers<[1], [0], [0], [1], [0, 0, 1, 1], [], []>} : vector<8x32xbf16>, vector<32x32xbf16>, vector<8x32xf32> -> vector<8x32xf32>
      %c0_66 = arith.constant 0 : index
      %c0_67 = arith.constant 0 : index
      %124 = vector.load %arg8[%c0_66, %c0_67] : memref<1x32xf32, #tpu.memory_space<vmem>>, vector<1x32xf32>
      %125 = vector.broadcast %124 : vector<1x32xf32> to vector<8x32xf32>
      %126 = arith.addf %123, %125 : vector<8x32xf32>
      %c0_68 = arith.constant 0 : index
      %c0_69 = arith.constant 0 : index
      %127 = vector.load %arg9[%c0_68, %c0_69] : memref<32x32xbf16, #tpu.memory_space<vmem>>, vector<32x32xbf16>
      %cst_70 = arith.constant dense<0.000000e+00> : vector<8x32xf32>
      %128 = tpu.matmul %121, %127, %cst_70 {dimension_numbers = #tpu.dot_dimension_numbers<[1], [0], [0], [1], [0, 0, 1, 1], [], []>} : vector<8x32xbf16>, vector<32x32xbf16>, vector<8x32xf32> -> vector<8x32xf32>
      %c0_71 = arith.constant 0 : index
      %c0_72 = arith.constant 0 : index
      %129 = vector.load %arg10[%c0_71, %c0_72] : memref<1x32xf32, #tpu.memory_space<vmem>>, vector<1x32xf32>
      %130 = vector.broadcast %129 : vector<1x32xf32> to vector<8x32xf32>
      %131 = arith.addf %128, %130 : vector<8x32xf32>
      %132 = vector.shape_cast %126 : vector<8x32xf32> to vector<8x4x8xf32>
      %133 = tpu.transpose %132, [1, 0, 2] : vector<8x4x8xf32> -> vector<4x8x8xf32>
      %134 = arith.truncf %133 : vector<4x8x8xf32> to vector<4x8x8xbf16>
      %c0_73 = arith.constant 0 : index
      %c0_74 = arith.constant 0 : index
      %c0_75 = arith.constant 0 : index
      %135 = vector.load %arg22[%c0_73, %c0_74, %c0_75] : memref<4x8x8xbf16, #tpu.memory_space<vmem>>, vector<4x8x8xbf16>
      tpu.vector_store %arg22[%c0_73, %c0_74, %c0_75], %134 {strides = array<i32>} : memref<4x8x8xbf16, #tpu.memory_space<vmem>>, vector<4x8x8xbf16>,
      %136 = vector.shape_cast %131 : vector<8x32xf32> to vector<8x4x8xf32>
      %137 = tpu.transpose %136, [1, 0, 2] : vector<8x4x8xf32> -> vector<4x8x8xf32>
      %138 = arith.truncf %137 : vector<4x8x8xf32> to vector<4x8x8xbf16>
      %c0_76 = arith.constant 0 : index
      %c0_77 = arith.constant 0 : index
      %c0_78 = arith.constant 0 : index
      %139 = vector.load %arg23[%c0_76, %c0_77, %c0_78] : memref<4x8x8xbf16, #tpu.memory_space<vmem>>, vector<4x8x8xbf16>
      tpu.vector_store %arg23[%c0_76, %c0_77, %c0_78], %138 {strides = array<i32>} : memref<4x8x8xbf16, #tpu.memory_space<vmem>>, vector<4x8x8xbf16>,
    } else {
    }
    %c0 = arith.constant 0 : index
    %c0_1 = arith.constant 0 : index
    %c0_2 = arith.constant 0 : index
    %3 = vector.load %arg3[%c0, %c0_1, %c0_2] : memref<1x8x32xf32, #tpu.memory_space<vmem>>, vector<1x8x32xf32>
    %4 = vector.shape_cast %3 : vector<1x8x32xf32> to vector<8x32xf32>
    %5 = arith.truncf %4 : vector<8x32xf32> to vector<8x32xbf16>
    %c0_3 = arith.constant 0 : index
    %c0_4 = arith.constant 0 : index
    %6 = vector.load %arg5[%c0_3, %c0_4] : memref<32x32xbf16, #tpu.memory_space<vmem>>, vector<32x32xbf16>
    %cst = arith.constant dense<0.000000e+00> : vector<8x32xf32>
    %7 = tpu.matmul %5, %6, %cst {dimension_numbers = #tpu.dot_dimension_numbers<[1], [0], [0], [1], [0, 0, 1, 1], [], []>} : vector<8x32xbf16>, vector<32x32xbf16>, vector<8x32xf32> -> vector<8x32xf32>
    %c0_5 = arith.constant 0 : index
    %c0_6 = arith.constant 0 : index
    %8 = vector.load %arg6[%c0_5, %c0_6] : memref<1x32xf32, #tpu.memory_space<vmem>>, vector<1x32xf32>
    %9 = vector.broadcast %8 : vector<1x32xf32> to vector<8x32xf32>
    %10 = arith.addf %7, %9 : vector<8x32xf32>
    %11 = vector.shape_cast %10 : vector<8x32xf32> to vector<8x4x8xf32>
    %12 = tpu.transpose %11, [1, 0, 2] : vector<8x4x8xf32> -> vector<4x8x8xf32>
    %13 = arith.truncf %12 : vector<4x8x8xf32> to vector<4x8x8xbf16>
    %cst_7 = arith.constant 0xFF800000 : f32
    %14 = vector.broadcast %cst_7 : f32 to vector<4x8x1xf32>
    %cst_8 = arith.constant 0.000000e+00 : f32
    %15 = vector.broadcast %cst_8 : f32 to vector<4x8x1xf32>
    %cst_9 = arith.constant 0.000000e+00 : f32
    %16 = vector.broadcast %cst_9 : f32 to vector<4x8x8xf32>
    %c0_10 = arith.constant 0 : index
    %c0_11 = arith.constant 0 : index
    %c0_12 = arith.constant 0 : index
    %17 = vector.load %arg22[%c0_10, %c0_11, %c0_12] : memref<4x8x8xbf16, #tpu.memory_space<vmem>>, vector<4x8x8xbf16>
    %c0_13 = arith.constant 0 : index
    %c0_14 = arith.constant 0 : index
    %c0_15 = arith.constant 0 : index
    %18 = vector.load %arg23[%c0_13, %c0_14, %c0_15] : memref<4x8x8xbf16, #tpu.memory_space<vmem>>, vector<4x8x8xbf16>
    %c0_16 = arith.constant 0 : index
    %c0_17 = arith.constant 0 : index
    %c0_18 = arith.constant 0 : index
    %19 = vector.load %arg2[%c0_16, %c0_17, %c0_18] : memref<1x1x8xf32, #tpu.memory_space<vmem>>, vector<1x1x8xf32>
    %20 = vector.shape_cast %19 : vector<1x1x8xf32> to vector<1x8xf32>
    "tpu.trace_start"() <{level = 10 : i32, message = "hqd,hkd->hqk"}> : () -> ()
    %cst_19 = arith.constant dense<0.000000e+00> : vector<4x8x8xf32>
    %21 = tpu.matmul %13, %17, %cst_19 {dimension_numbers = #tpu.dot_dimension_numbers<[2], [2], [1], [1], [0, 0, 0, 1, 1, 1], [0], [0]>} : vector<4x8x8xbf16>, vector<4x8x8xbf16>, vector<4x8x8xf32> -> vector<4x8x8xf32>
    "tpu.trace_stop"() : () -> ()
    %22 = vector.shape_cast %20 : vector<1x8xf32> to vector<1x1x8xf32>
    %23 = vector.broadcast %22 : vector<1x1x8xf32> to vector<4x8x8xf32>
    %24 = arith.addf %21, %23 : vector<4x8x8xf32>
    %cst_20 = arith.constant dense<0xFF800000> : vector<4x8xf32>
    %25 = vector.multi_reduction <maximumf>, %24, %cst_20 [2] : vector<4x8x8xf32> to vector<4x8xf32>
    %26 = vector.shape_cast %25 : vector<4x8xf32> to vector<4x8x1xf32>
    %27 = arith.maximumf %14, %26 : vector<4x8x1xf32>
    %28 = arith.subf %14, %27 : vector<4x8x1xf32>
    %29 = math.exp %28 : vector<4x8x1xf32>
    %30 = vector.broadcast %27 : vector<4x8x1xf32> to vector<4x8x8xf32>
    %31 = arith.subf %24, %30 : vector<4x8x8xf32>
    %32 = math.exp %31 : vector<4x8x8xf32>
    %33 = arith.mulf %29, %15 : vector<4x8x1xf32>
    %cst_21 = arith.constant dense<0.000000e+00> : vector<4x8xf32>
    %34 = vector.multi_reduction <add>, %32, %cst_21 [2] : vector<4x8x8xf32> to vector<4x8xf32>
    %35 = vector.shape_cast %34 : vector<4x8xf32> to vector<4x8x1xf32>
    %36 = arith.addf %33, %35 : vector<4x8x1xf32>
    %37 = vector.broadcast %29 : vector<4x8x1xf32> to vector<4x8x8xf32>
    %38 = arith.mulf %37, %16 : vector<4x8x8xf32>
    %39 = arith.truncf %32 : vector<4x8x8xf32> to vector<4x8x8xbf16>
    "tpu.trace_start"() <{level = 10 : i32, message = "hqk,hkd->hqd"}> : () -> ()
    %cst_22 = arith.constant dense<0.000000e+00> : vector<4x8x8xf32>
    %40 = tpu.matmul %39, %18, %cst_22 {dimension_numbers = #tpu.dot_dimension_numbers<[2], [1], [1], [2], [0, 0, 0, 1, 1, 2], [0], [0]>} : vector<4x8x8xbf16>, vector<4x8x8xbf16>, vector<4x8x8xf32> -> vector<4x8x8xf32>
    "tpu.trace_stop"() : () -> ()
    %41 = arith.addf %38, %40 : vector<4x8x8xf32>
    %42 = tpu.reciprocal %36 {approx = true} : vector<4x8x1xf32> -> vector<4x8x1xf32>
    %43 = vector.broadcast %42 : vector<4x8x1xf32> to vector<4x8x8xf32>
    %44 = arith.mulf %41, %43 : vector<4x8x8xf32>
    %45 = tpu.transpose %44, [1, 0, 2] : vector<4x8x8xf32> -> vector<8x4x8xf32>
    %46 = vector.shape_cast %45 : vector<8x4x8xf32> to vector<8x32xf32>
    %47 = arith.truncf %46 : vector<8x32xf32> to vector<8x32xbf16>
    %c0_23 = arith.constant 0 : index
    %c0_24 = arith.constant 0 : index
    %48 = vector.load %arg11[%c0_23, %c0_24] : memref<32x32xbf16, #tpu.memory_space<vmem>>, vector<32x32xbf16>
    %cst_25 = arith.constant dense<0.000000e+00> : vector<8x32xf32>
    %49 = tpu.matmul %47, %48, %cst_25 {dimension_numbers = #tpu.dot_dimension_numbers<[1], [0], [0], [1], [0, 0, 1, 1], [], []>} : vector<8x32xbf16>, vector<32x32xbf16>, vector<8x32xf32> -> vector<8x32xf32>
    %c0_26 = arith.constant 0 : index
    %c0_27 = arith.constant 0 : index
    %50 = vector.load %arg12[%c0_26, %c0_27] : memref<1x32xf32, #tpu.memory_space<vmem>>, vector<1x32xf32>
    %51 = vector.broadcast %50 : vector<1x32xf32> to vector<8x32xf32>
    %52 = arith.addf %49, %51 : vector<8x32xf32>
    %53 = arith.addf %4, %52 : vector<8x32xf32>
    %c0_28 = arith.constant 0 : index
    %c0_29 = arith.constant 0 : index
    %54 = vector.load %arg13[%c0_28, %c0_29] : memref<1x32xf32, #tpu.memory_space<vmem>>, vector<1x32xf32>
    %c0_30 = arith.constant 0 : index
    %c0_31 = arith.constant 0 : index
    %55 = vector.load %arg14[%c0_30, %c0_31] : memref<1x32xf32, #tpu.memory_space<vmem>>, vector<1x32xf32>
    %cst_32 = arith.constant dense<0.000000e+00> : vector<8xf32>
    %56 = vector.multi_reduction <add>, %53, %cst_32 [1] : vector<8x32xf32> to vector<8xf32>
    %57 = vector.shape_cast %56 : vector<8xf32> to vector<8x1xf32>
    %cst_33 = arith.constant 3.200000e+01 : f32
    %58 = vector.broadcast %cst_33 : f32 to vector<8x1xf32>
    %59 = arith.divf %57, %58 : vector<8x1xf32>
    %60 = vector.broadcast %59 : vector<8x1xf32> to vector<8x32xf32>
    %61 = arith.subf %53, %60 : vector<8x32xf32>
    %62 = arith.mulf %61, %61 : vector<8x32xf32>
    %cst_34 = arith.constant dense<0.000000e+00> : vector<8xf32>
    %63 = vector.multi_reduction <add>, %62, %cst_34 [1] : vector<8x32xf32> to vector<8xf32>
    %64 = vector.shape_cast %63 : vector<8xf32> to vector<8x1xf32>
    %cst_35 = arith.constant 3.200000e+01 : f32
    %65 = vector.broadcast %cst_35 : f32 to vector<8x1xf32>
    %66 = arith.divf %64, %65 : vector<8x1xf32>
    %67 = vector.broadcast %59 : vector<8x1xf32> to vector<8x32xf32>
    %68 = arith.subf %53, %67 : vector<8x32xf32>
    %cst_36 = arith.constant 9.99999974E-6 : f32
    %69 = vector.broadcast %cst_36 : f32 to vector<8x1xf32>
    %70 = arith.addf %66, %69 : vector<8x1xf32>
    %71 = math.rsqrt %70 : vector<8x1xf32>
    %72 = vector.broadcast %71 : vector<8x1xf32> to vector<8x32xf32>
    %73 = arith.mulf %68, %72 : vector<8x32xf32>
    %74 = vector.broadcast %54 : vector<1x32xf32> to vector<8x32xf32>
    %75 = arith.mulf %73, %74 : vector<8x32xf32>
    %76 = vector.broadcast %55 : vector<1x32xf32> to vector<8x32xf32>
    %77 = arith.addf %75, %76 : vector<8x32xf32>
    %78 = arith.truncf %77 : vector<8x32xf32> to vector<8x32xbf16>
    %c0_37 = arith.constant 0 : index
    %c0_38 = arith.constant 0 : index
    %79 = vector.load %arg15[%c0_37, %c0_38] : memref<32x64xbf16, #tpu.memory_space<vmem>>, vector<32x64xbf16>
    %cst_39 = arith.constant dense<0.000000e+00> : vector<8x64xf32>
    %80 = tpu.matmul %78, %79, %cst_39 {dimension_numbers = #tpu.dot_dimension_numbers<[1], [0], [0], [1], [0, 0, 1, 1], [], []>} : vector<8x32xbf16>, vector<32x64xbf16>, vector<8x64xf32> -> vector<8x64xf32>
    %c0_40 = arith.constant 0 : index
    %c0_41 = arith.constant 0 : index
    %81 = vector.load %arg16[%c0_40, %c0_41] : memref<1x64xf32, #tpu.memory_space<vmem>>, vector<1x64xf32>
    %82 = vector.broadcast %81 : vector<1x64xf32> to vector<8x64xf32>
    %83 = arith.addf %80, %82 : vector<8x64xf32>
    %cst_42 = arith.constant 0.000000e+00 : f32
    %84 = vector.broadcast %cst_42 : f32 to vector<8x64xf32>
    %85 = arith.maximumf %83, %84 : vector<8x64xf32>
    %86 = arith.truncf %85 : vector<8x64xf32> to vector<8x64xbf16>
    %c0_43 = arith.constant 0 : index
    %c0_44 = arith.constant 0 : index
    %87 = vector.load %arg17[%c0_43, %c0_44] : memref<64x32xbf16, #tpu.memory_space<vmem>>, vector<64x32xbf16>
    %cst_45 = arith.constant dense<0.000000e+00> : vector<8x32xf32>
    %88 = tpu.matmul %86, %87, %cst_45 {dimension_numbers = #tpu.dot_dimension_numbers<[1], [0], [0], [1], [0, 0, 1, 1], [], []>} : vector<8x64xbf16>, vector<64x32xbf16>, vector<8x32xf32> -> vector<8x32xf32>
    %c0_46 = arith.constant 0 : index
    %c0_47 = arith.constant 0 : index
    %89 = vector.load %arg18[%c0_46, %c0_47] : memref<1x32xf32, #tpu.memory_space<vmem>>, vector<1x32xf32>
    %90 = vector.broadcast %89 : vector<1x32xf32> to vector<8x32xf32>
    %91 = arith.addf %88, %90 : vector<8x32xf32>
    %92 = arith.addf %77, %91 : vector<8x32xf32>
    %c0_48 = arith.constant 0 : index
    %c0_49 = arith.constant 0 : index
    %93 = vector.load %arg19[%c0_48, %c0_49] : memref<1x32xf32, #tpu.memory_space<vmem>>, vector<1x32xf32>
    %c0_50 = arith.constant 0 : index
    %c0_51 = arith.constant 0 : index
    %94 = vector.load %arg20[%c0_50, %c0_51] : memref<1x32xf32, #tpu.memory_space<vmem>>, vector<1x32xf32>
    %cst_52 = arith.constant dense<0.000000e+00> : vector<8xf32>
    %95 = vector.multi_reduction <add>, %92, %cst_52 [1] : vector<8x32xf32> to vector<8xf32>
    %96 = vector.shape_cast %95 : vector<8xf32> to vector<8x1xf32>
    %cst_53 = arith.constant 3.200000e+01 : f32
    %97 = vector.broadcast %cst_53 : f32 to vector<8x1xf32>
    %98 = arith.divf %96, %97 : vector<8x1xf32>
    %99 = vector.broadcast %98 : vector<8x1xf32> to vector<8x32xf32>
    %100 = arith.subf %92, %99 : vector<8x32xf32>
    %101 = arith.mulf %100, %100 : vector<8x32xf32>
    %cst_54 = arith.constant dense<0.000000e+00> : vector<8xf32>
    %102 = vector.multi_reduction <add>, %101, %cst_54 [1] : vector<8x32xf32> to vector<8xf32>
    %103 = vector.shape_cast %102 : vector<8xf32> to vector<8x1xf32>
    %cst_55 = arith.constant 3.200000e+01 : f32
    %104 = vector.broadcast %cst_55 : f32 to vector<8x1xf32>
    %105 = arith.divf %103, %104 : vector<8x1xf32>
    %106 = vector.broadcast %98 : vector<8x1xf32> to vector<8x32xf32>
    %107 = arith.subf %92, %106 : vector<8x32xf32>
    %cst_56 = arith.constant 9.99999974E-6 : f32
    %108 = vector.broadcast %cst_56 : f32 to vector<8x1xf32>
    %109 = arith.addf %105, %108 : vector<8x1xf32>
    %110 = math.rsqrt %109 : vector<8x1xf32>
    %111 = vector.broadcast %110 : vector<8x1xf32> to vector<8x32xf32>
    %112 = arith.mulf %107, %111 : vector<8x32xf32>
    %113 = vector.broadcast %93 : vector<1x32xf32> to vector<8x32xf32>
    %114 = arith.mulf %112, %113 : vector<8x32xf32>
    %115 = vector.broadcast %94 : vector<1x32xf32> to vector<8x32xf32>
    %116 = arith.addf %114, %115 : vector<8x32xf32>
    %c0_57 = arith.constant 0 : index
    %c0_58 = arith.constant 0 : index
    %c0_59 = arith.constant 0 : index
    %117 = vector.load %arg21[%c0_57, %c0_58, %c0_59] : memref<1x8x32xf32, #tpu.memory_space<vmem>>, vector<1x8x32xf32>
    %118 = vector.shape_cast %117 : vector<1x8x32xf32> to vector<8x32xf32>
    %119 = vector.shape_cast %116 : vector<8x32xf32> to vector<1x8x32xf32>
    tpu.vector_store %arg21[%c0_57, %c0_58, %c0_59], %119 {strides = array<i32>} : memref<1x8x32xf32, #tpu.memory_space<vmem>>, vector<1x8x32xf32>,
    return
  }
  func.func @transform_0(%arg0: i32, %arg1: i32) -> (i32, i32, i32) {
    %c0_i32 = arith.constant 0 : i32
    %c0_i32_0 = arith.constant 0 : i32
    %c0_i32_1 = arith.constant 0 : i32
    return %arg0, %c0_i32, %c0_i32_0 : i32, i32, i32
  }
  func.func @transform_1(%arg0: i32, %arg1: i32) -> (i32, i32, i32) {
    %c0_i32 = arith.constant 0 : i32
    %c0_i32_0 = arith.constant 0 : i32
    return %arg0, %arg1, %c0_i32 : i32, i32, i32
  }
  func.func @transform_2(%arg0: i32, %arg1: i32) -> (i32, i32, i32) {
    %c0_i32 = arith.constant 0 : i32
    %c0_i32_0 = arith.constant 0 : i32
    %c0_i32_1 = arith.constant 0 : i32
    return %arg0, %c0_i32, %c0_i32_0 : i32, i32, i32
  }
  func.func @transform_3(%arg0: i32, %arg1: i32) -> (i32, i32) {
    %c0_i32 = arith.constant 0 : i32
    %c0_i32_0 = arith.constant 0 : i32
    %c0_i32_1 = arith.constant 0 : i32
    return %c0_i32, %c0_i32_0 : i32, i32
  }
  func.func @transform_4(%arg0: i32, %arg1: i32) -> (i32, i32) {
    %c0_i32 = arith.constant 0 : i32
    %c0_i32_0 = arith.constant 0 : i32
    %c0_i32_1 = arith.constant 0 : i32
    return %c0_i32, %c0_i32_0 : i32, i32
  }
  func.func @transform_5(%arg0: i32, %arg1: i32) -> (i32, i32) {
    %c0_i32 = arith.constant 0 : i32
    %c0_i32_0 = arith.constant 0 : i32
    %c0_i32_1 = arith.constant 0 : i32
    return %c0_i32, %c0_i32_0 : i32, i32
  }
  func.func @transform_6(%arg0: i32, %arg1: i32) -> (i32, i32) {
    %c0_i32 = arith.constant 0 : i32
    %c0_i32_0 = arith.constant 0 : i32
    %c0_i32_1 = arith.constant 0 : i32
    return %c0_i32, %c0_i32_0 : i32, i32
  }
  func.func @transform_7(%arg0: i32, %arg1: i32) -> (i32, i32) {
    %c0_i32 = arith.constant 0 : i32
    %c0_i32_0 = arith.constant 0 : i32
    %c0_i32_1 = arith.constant 0 : i32
    return %c0_i32, %c0_i32_0 : i32, i32
  }
  func.func @transform_8(%arg0: i32, %arg1: i32) -> (i32, i32) {
    %c0_i32 = arith.constant 0 : i32
    %c0_i32_0 = arith.constant 0 : i32
    %c0_i32_1 = arith.constant 0 : i32
    return %c0_i32, %c0_i32_0 : i32, i32
  }
  func.func @transform_9(%arg0: i32, %arg1: i32) -> (i32, i32) {
    %c0_i32 = arith.constant 0 : i32
    %c0_i32_0 = arith.constant 0 : i32
    %c0_i32_1 = arith.constant 0 : i32
    return %c0_i32, %c0_i32_0 : i32, i32
  }
  func.func @transform_10(%arg0: i32, %arg1: i32) -> (i32, i32) {
    %c0_i32 = arith.constant 0 : i32
    %c0_i32_0 = arith.constant 0 : i32
    %c0_i32_1 = arith.constant 0 : i32
    return %c0_i32, %c0_i32_0 : i32, i32
  }
  func.func @transform_11(%arg0: i32, %arg1: i32) -> (i32, i32) {
    %c0_i32 = arith.constant 0 : i32
    %c0_i32_0 = arith.constant 0 : i32
    %c0_i32_1 = arith.constant 0 : i32
    return %c0_i32, %c0_i32_0 : i32, i32
  }
  func.func @transform_12(%arg0: i32, %arg1: i32) -> (i32, i32) {
    %c0_i32 = arith.constant 0 : i32
    %c0_i32_0 = arith.constant 0 : i32
    %c0_i32_1 = arith.constant 0 : i32
    return %c0_i32, %c0_i32_0 : i32, i32
  }
  func.func @transform_13(%arg0: i32, %arg1: i32) -> (i32, i32) {
    %c0_i32 = arith.constant 0 : i32
    %c0_i32_0 = arith.constant 0 : i32
    %c0_i32_1 = arith.constant 0 : i32
    return %c0_i32, %c0_i32_0 : i32, i32
  }
  func.func @transform_14(%arg0: i32, %arg1: i32) -> (i32, i32) {
    %c0_i32 = arith.constant 0 : i32
    %c0_i32_0 = arith.constant 0 : i32
    %c0_i32_1 = arith.constant 0 : i32
    return %c0_i32, %c0_i32_0 : i32, i32
  }
  func.func @transform_15(%arg0: i32, %arg1: i32) -> (i32, i32) {
    %c0_i32 = arith.constant 0 : i32
    %c0_i32_0 = arith.constant 0 : i32
    %c0_i32_1 = arith.constant 0 : i32
    return %c0_i32, %c0_i32_0 : i32, i32
  }
  func.func @transform_16(%arg0: i32, %arg1: i32) -> (i32, i32) {
    %c0_i32 = arith.constant 0 : i32
    %c0_i32_0 = arith.constant 0 : i32
    %c0_i32_1 = arith.constant 0 : i32
    return %c0_i32, %c0_i32_0 : i32, i32
  }
  func.func @transform_17(%arg0: i32, %arg1: i32) -> (i32, i32) {
    %c0_i32 = arith.constant 0 : i32
    %c0_i32_0 = arith.constant 0 : i32
    %c0_i32_1 = arith.constant 0 : i32
    return %c0_i32, %c0_i32_0 : i32, i32
  }
  func.func @transform_18(%arg0: i32, %arg1: i32) -> (i32, i32) {
    %c0_i32 = arith.constant 0 : i32
    %c0_i32_0 = arith.constant 0 : i32
    %c0_i32_1 = arith.constant 0 : i32
    return %c0_i32, %c0_i32_0 : i32, i32
  }
  func.func @transform_19(%arg0: i32, %arg1: i32) -> (i32, i32, i32) {
    %c0_i32 = arith.constant 0 : i32
    %c0_i32_0 = arith.constant 0 : i32
    return %arg0, %arg1, %c0_i32 : i32, i32, i32
  }
}

</mosaic_0001>

<bundles_post_ra>
// kernel: tpu_custom_call.1
= control target key start
LH: loop header
LB: loop body
LE: loop exit
PB: predicated region body
PF: predicated region fallthrough
CT: control target
= control target key end

     0   :  { %s4878_s0 = inlined_call_operand.hbm [shape: f32[2,1,8], index: 0, kind: input, shape index: {}]   ;;  %s4879_s1 = inlined_call_operand.hbm [shape: f32[2,8,32], index: 1, kind: input, shape index: {}]   ;;  %s4880_s2 = inlined_call_operand.hbm [shape: bf16[2,8,32], index: 2, kind: input, shape index: {}]   ;;  %s4881_s3 = inlined_call_operand.hbm [shape: bf16[32,32], index: 3, kind: input, shape index: {}]   ;;  %s4882_s4 = inlined_call_operand.hbm [shape: f32[1,32], index: 4, kind: input, shape index: {}]   ;;  %s4883_s5 = inlined_call_operand.hbm [shape: bf16[32,32], index: 5, kind: input, shape index: {}]   ;;  %s4884_s6 = inlined_call_operand.hbm [shape: f32[1,32], index: 6, kind: input, shape index: {}]   ;;  %s4885_s7 = inlined_call_operand.hbm [shape: bf16[32,32], index: 7, kind: input, shape index: {}]   ;;  %s4886_s8 = inlined_call_operand.hbm [shape: f32[1,32], index: 8, kind: input, shape index: {}]   ;;  %s4887_s9 = inlined_call_operand.hbm [shape: bf16[32,32], index: 9, kind: input, shape index: {}]   ;;  %s4888_s10 = inlined_call_operand.hbm [shape: f32[1,32], index: 10, kind: input, shape index: {}]   ;;  %s4889_s11 = inlined_call_operand.hbm [shape: f32[1,32], index: 11, kind: input, shape index: {}]   ;;  %s4890_s12 = inlined_call_operand.hbm [shape: f32[1,32], index: 12, kind: input, shape index: {}]   ;;  %s4891_s13 = inlined_call_operand.hbm [shape: bf16[32,64], index: 13, kind: input, shape index: {}]   ;;  %s4892_s14 = inlined_call_operand.hbm [shape: f32[1,64], index: 14, kind: input, shape index: {}]   ;;  %s4893_s15 = inlined_call_operand.hbm [shape: bf16[64,32], index: 15, kind: input, shape index: {}]   ;;  %s4894_s16 = inlined_call_operand.hbm [shape: f32[1,32], index: 16, kind: input, shape index: {}]   ;;  %s4895_s17 = inlined_call_operand.hbm [shape: f32[1,32], index: 17, kind: input, shape index: {}]   ;;  %s4896_s18 = inlined_call_operand.hbm [shape: f32[1,32], index: 18, kind: input, shape index: {}]   ;;  %s4897_s19 = inlined_call_operand.hbm [shape: f32[2,8,32], index: 19, kind: output, shape index: {}]  }
   0x1   :  { %4930 = sst [smem:[#allocation49_spill]] %s4878_s0 }
   0x2   :  { %4931 = sst [smem:[#allocation50_spill]] %s4879_s1 }
   0x3   :  { %4932 = sst [smem:[#allocation51_spill]] %s4880_s2 }
   0x4   :  { %4933 = sst [smem:[#allocation52_spill]] %s4881_s3 }
   0x5   :  { %4934 = sst [smem:[#allocation53_spill]] %s4882_s4 }
   0x6   :  { %4935 = sst [smem:[#allocation54_spill]] %s4883_s5 }
   0x7   :  { %4936 = sst [smem:[#allocation55_spill]] %s4884_s6 }
   0x8   :  { %4937 = sst [smem:[#allocation56_spill]] %s4885_s7 }
   0x9   :  { %4938 = sst [smem:[#allocation57_spill]] %s4886_s8 }
   0xa   :  { %4939 = sst [smem:[#allocation58_spill]] %s4887_s9 }
   0xb   :  { %4940 = sst [smem:[#allocation59_spill]] %s4888_s10 }
   0xc   :  { %4941 = sst [smem:[#allocation60_spill]] %s4889_s11 }
   0xd   :  { %4942 = sst [smem:[#allocation61_spill]] %s4890_s12 }
   0xe   :  { %4943 = sst [smem:[#allocation62_spill]] %s4891_s13 }
   0xf   :  { %4944 = sst [smem:[#allocation63_spill]] %s4892_s14 }
  0x10   :  { %4945 = sst [smem:[#allocation64_spill]] %s4893_s15 }
  0x11   :  { %4946 = sst [smem:[#allocation65_spill]] %s4894_s16 }
  0x12   :  { %4947 = sst [smem:[#allocation66_spill]] %s4895_s17 }
  0x13   :  { %4948 = sst [smem:[#allocation67_spill]] %s4896_s18 }
  0x14   :  { %4949 = sst [smem:[#allocation68_spill]] %s4897_s19 }
  0x15   :  { %24 = vsyncpa [#allocation5], 0 }
  0x16   :  { %26 = vsyncpa [#allocation5 + $0x1], 0 }
  0x17   :  { %27 = vsyncpa [#allocation8], 0 }
  0x18   :  { %29 = vsyncpa [#allocation8 + $0x1], 0 }
  0x19   :  { %30 = vsyncpa [#allocation11], 0 }
  0x1a   :  { %31 = vsyncpa [#allocation14], 0 }
  0x1b   :  { %32 = vsyncpa [#allocation17], 0 }
  0x1c   :  { %33 = vsyncpa [#allocation20], 0 }
  0x1d   :  { %34 = vsyncpa [#allocation23], 0 }
  0x1e   :  { %35 = vsyncpa [#allocation26], 0 }
  0x1f   :  { %36 = vsyncpa [#allocation29], 0 }
  0x20   :  { %37 = vsyncpa [#allocation32], 0 }
  0x21   :  { %38 = vsyncpa [#allocation6], 0 }
  0x22   :  { %40 = vsyncpa [#allocation6 + $0x1], 0  ;;  %s4066_s0 = smov 0   ;;  %s4068_s30 = smov 0  }
  0x23   :  { %s4070_s20 = smov 0   ;;  %s4072_s21 = smov 0  }
  0x24   :  { %s4074_s1 = smov 0   ;;  %s4076_s22 = smov 0  }
  0x25 LB: > { %4950 = sst [smem:[#allocation46_spill]] %s3924_s21  ;;  %s4097_s2 = sadd.s32 4294967295, %s3932_s22   ;;  %s3932_s22 = sphi %s4076_s22, %s46_s22   ;;  %s3928_s1 = sphi %s4074_s1, %s5017_s1   ;;  %s3924_s21 = sphi %s4072_s21, %s5016_s21   ;;  %s3920_s20 = sphi %s4070_s20, %s5015_s20   ;;  %s3916_s30 = sphi %s4068_s30, %s5014_s30   ;;  %s3912_s0 = sphi %s4066_s0, %s5013_s0  }
  0x26   : > { %p2759_p0 = scmp.ge.s32.totalorder %s3932_s22, 1  ;;  %p4911_p1 = scmp.eq.s32.totalorder %s4097_s2, 0 }
  0x27   : > { %p507_p2 = scmp.lt.s32.totalorder %s3932_s22, 3  ;;  %s3934_s24 = smov [#allocation10]  }
  0x28   : > { %s519_s25 = sshll.u32 %s3934_s24, 4  ;;  %s3935_s26 = smov [#allocation13]   ;;  %s4106_s25 = int_to_ptr.vmem [resolvable:$true] %s519_s25 }
  0x29   : > { %p4102_p3 = pnand %p2759_p0, %p507_p2  ;;  %s543_s27 = sshll.u32 %s3935_s26, 4  ;;  %s4117_s27 = int_to_ptr.vmem [resolvable:$true] %s543_s27 }
  0x2a   : > { %s3936_s28 = smov [#allocation16]   ;;  %s4954_s21 = sld [smem:[#allocation52_spill]] }
  0x2b   : > { %s4951_s23 = scalar_select %p4102_p3, 1, 0 }
  0x2c   : > { %p3061_p4 = pneg %p4102_p3  ;;  %s4119_s29 = sshll.u32 %s3936_s28, 4  ;;  %s568_s29 = int_to_ptr.vmem [resolvable:$true] %s4119_s29 }
  0x2d   : > { %4952 = sst [smem:[#allocation47_spill]] %s4951_s23 }
  0x2e   : > { %p4113_p6 = pnand %p3061_p4, %p4911_p1 }
  0x30   : > { %s4953_s3 = scalar_select %p4113_p6, 1, 0 }
  0x31   : > { %s4955_s18 = smov %s4954_s21  ;;  %s3276_s16 = scalar_lea.hbm %s4954_s21, 256 }
  0x32   : > { %p3277_p7 = scmp.ne.s32.totalorder %s4955_s18, %s3276_s16  ;;  %p4129_p8 = pneg %p4113_p6 }
  0x33   : > { %p3283_p11 = scmp.lt.u32.totalorder %s3276_s16, %s4955_s18 }
  0x34   : > { %s4956_s12 = scalar_select %p4129_p8, 1, 0 }
  0x35   : > { %p3279_p9 = pnand %p4129_p8, %p3277_p7 }
  0x37   : > { %p3280_p10 = pneg %p3279_p9 }
  0x39   : > { %p3285_p12 = pnand %p3283_p11, %p3280_p10 }
  0x3b   : > { %3288 = shalt.err (!%p3285_p12)
}
  0x3c   : > { %s3289_s14 = scalar_lea.vmem %s4106_s25, 256  ;;  %p3297_p4 = scmp.lt.s32.totalorder %s4106_s25, %s4106_s25 }
  0x3d   : > { %p3290_p13 = scmp.ne.s32.totalorder %s4106_s25, %s3289_s14  ;;  %p3298_p5 = scmp.lt.s32.totalorder %s3289_s14, %s3289_s14 }
  0x3f   : > { %p3292_p0 = pnand %p3290_p13, %p4129_p8  ;;  %p3299_p7 = por %p3298_p5, %p3297_p4 }
  0x41   : > { %p3293_p2 = pneg %p3292_p0 }
  0x43   : > { %p3300_p9 = pnand %p3299_p7, %p3293_p2 }
  0x45   : > { %3303 = shalt.err (!%p3300_p9)
}
  0x46   : > { %s3937_s19 = smov 64   ;;  %s3938_s16 = smov 4  }
  0x47   : > { %3064 = dma.hbm_to_vmem [thread:$0]  (!%p4113_p6), %s4955_s18, 256, %s4106_s25, [#allocation11], %s3937_s19, %s3937_s19, %s3938_s16  }
  0x48   : > { %s4957_s5 = sld [smem:[#allocation54_spill]] }
  0x4e   : > { %s3304_s28 = scalar_lea.hbm %s4957_s5, 256 }
  0x4f   : > { %p3305_p5 = scmp.ne.s32.totalorder %s4957_s5, %s3304_s28  ;;  %p3311_p12 = scmp.lt.u32.totalorder %s3304_s28, %s4957_s5 }
  0x51   : > { %p3307_p10 = pnand %p3305_p5, %p4129_p8 }
  0x53   : > { %p3308_p11 = pneg %p3307_p10 }
  0x55   : > { %p3313_p13 = pnand %p3311_p12, %p3308_p11 }
  0x57   : > { %3316 = shalt.err (!%p3313_p13)
}
  0x58   : > { %s3317_s25 = scalar_lea.vmem %s4117_s27, 256  ;;  %p3325_p7 = scmp.lt.s32.totalorder %s4117_s27, %s4117_s27 }
  0x59   : > { %p3318_p0 = scmp.ne.s32.totalorder %s4117_s27, %s3317_s25  ;;  %p3326_p9 = scmp.lt.s32.totalorder %s3317_s25, %s3317_s25 }
  0x5b   : > { %p3320_p2 = pnand %p3318_p0, %p4129_p8  ;;  %p3327_p5 = por %p3326_p9, %p3325_p7 }
  0x5d   : > { %p3321_p4 = pneg %p3320_p2 }
  0x5f   : > { %p3328_p10 = pnand %p3327_p5, %p3321_p4 }
  0x61   : > { %3331 = shalt.err (!%p3328_p10)
}
  0x62   : > { %3070 = dma.hbm_to_vmem [thread:$0]  (!%p4113_p6), %s4957_s5, 256, %s4117_s27, [#allocation14], %s3937_s19, %s3937_s19, %s3938_s16  }
  0x63   : > { %s4958_s7 = sld [smem:[#allocation56_spill]] }
  0x69   : > { %s3332_s23 = scalar_lea.hbm %s4958_s7, 256 }
  0x6a   : > { %p3333_p11 = scmp.ne.s32.totalorder %s4958_s7, %s3332_s23  ;;  %p3339_p0 = scmp.lt.u32.totalorder %s3332_s23, %s4958_s7 }
  0x6c   : > { %p3335_p12 = pnand %p3333_p11, %p4129_p8 }
  0x6e   : > { %p3336_p13 = pneg %p3335_p12 }
  0x70   : > { %p3341_p2 = pnand %p3339_p0, %p3336_p13 }
  0x72   : > { %3344 = shalt.err (!%p3341_p2)
}
  0x73   : > { %s3345_s25 = scalar_lea.vmem %s568_s29, 256  ;;  %p3353_p5 = scmp.lt.s32.totalorder %s568_s29, %s568_s29 }
  0x74   : > { %p3346_p4 = scmp.ne.s32.totalorder %s568_s29, %s3345_s25  ;;  %p3354_p10 = scmp.lt.s32.totalorder %s3345_s25, %s3345_s25 }
  0x76   : > { %p3348_p7 = pnand %p3346_p4, %p4129_p8  ;;  %p3355_p1 = por %p3354_p10, %p3353_p5 }
  0x78   : > { %p3349_p9 = pneg %p3348_p7 }
  0x7a   : > { %p3356_p3 = pnand %p3355_p1, %p3349_p9 }
  0x7c   : > { %3359 = shalt.err (!%p3356_p3)
}
  0x7d   : > { %3076 = dma.hbm_to_vmem [thread:$0]  (!%p4113_p6), %s4958_s7, 256, %s568_s29, [#allocation17], %s3937_s19, %s3937_s19, %s3938_s16  }
  0x7e   : > { %s3939_s8 = smov [#allocation19]   ;;  %s3940_s21 = smov [#allocation22]  }
  0x7f   : > { %s591_s10 = sshll.u32 %s3939_s8, 4  ;;  %s616_s23 = sshll.u32 %s3940_s21, 4  ;;  %s592_s10 = int_to_ptr.vmem [resolvable:$true] %s591_s10  ;;  %s617_s23 = int_to_ptr.vmem [resolvable:$true] %s616_s23 }
  0x80   : > { %s4959_s9 = sld [smem:[#allocation58_spill]] }
  0x86   : > { %s3360_s28 = scalar_lea.hbm %s4959_s9, 256 }
  0x87   : > { %p3361_p1 = scmp.ne.s32.totalorder %s4959_s9, %s3360_s28  ;;  %p3367_p12 = scmp.lt.u32.totalorder %s3360_s28, %s4959_s9 }
  0x89   : > { %p3363_p3 = pnand %p3361_p1, %p4129_p8 }
  0x8b   : > { %p3364_p11 = pneg %p3363_p3 }
  0x8d   : > { %p3369_p13 = pnand %p3367_p12, %p3364_p11 }
  0x8f   : > { %3372 = shalt.err (!%p3369_p13)
}
  0x90   : > { %s3373_s29 = scalar_lea.vmem %s592_s10, 256  ;;  %p3381_p7 = scmp.lt.s32.totalorder %s592_s10, %s592_s10 }
  0x91   : > { %p3374_p0 = scmp.ne.s32.totalorder %s592_s10, %s3373_s29  ;;  %p3382_p9 = scmp.lt.s32.totalorder %s3373_s29, %s3373_s29 }
  0x93   : > { %p3376_p2 = pnand %p3374_p0, %p4129_p8  ;;  %p3383_p5 = por %p3382_p9, %p3381_p7 }
  0x95   : > { %p3377_p4 = pneg %p3376_p2 }
  0x97   : > { %p3384_p10 = pnand %p3383_p5, %p3377_p4 }
  0x99   : > { %3387 = shalt.err (!%p3384_p10)
}
  0x9a   : > { %3082 = dma.hbm_to_vmem [thread:$0]  (!%p4113_p6), %s4959_s9, 256, %s592_s10, [#allocation20], %s3937_s19, %s3937_s19, %s3938_s16  }
  0x9b   : > { %s4960_s11 = sld [smem:[#allocation60_spill]] }
  0xa1   : > { %s3388_s24 = scalar_lea.hbm %s4960_s11, 16 }
  0xa2   : > { %p3389_p1 = scmp.ne.s32.totalorder %s4960_s11, %s3388_s24  ;;  %p3395_p12 = scmp.lt.u32.totalorder %s3388_s24, %s4960_s11 }
  0xa4   : > { %p3391_p3 = pnand %p3389_p1, %p4129_p8 }
  0xa6   : > { %p3392_p11 = pneg %p3391_p3 }
  0xa8   : > { %p3397_p13 = pnand %p3395_p12, %p3392_p11 }
  0xaa   : > { %3400 = shalt.err (!%p3397_p13)
}
  0xab   : > { %s3401_s27 = scalar_lea.vmem %s617_s23, 16  ;;  %s3408_s10 = scalar_lea.vmem %s617_s23, 32 }
  0xac   : > { %p3402_p0 = scmp.ne.s32.totalorder %s617_s23, %s3401_s27  ;;  %p3409_p7 = scmp.lt.s32.totalorder %s617_s23, %s617_s23 }
  0xad   : > { %p3410_p9 = scmp.lt.s32.totalorder %s3408_s10, %s3401_s27 }
  0xae   : > { %p3404_p2 = pnand %p3402_p0, %p4129_p8 }
  0xaf   : > { %p3411_p5 = por %p3410_p9, %p3409_p7 }
  0xb0   : > { %p3405_p4 = pneg %p3404_p2 }
  0xb2   : > { %p3412_p10 = pnand %p3411_p5, %p3405_p4 }
  0xb4   : > { %3415 = shalt.err (!%p3412_p10)
}
  0xb5   : > { %3088 = dma.hbm_to_vmem [thread:$0]  (!%p4113_p6), %s4960_s11, 16, %s617_s23, [#allocation23]  }
  0xb6   : > { %s3941_s6 = smov [#allocation25]   ;;  %s3942_s21 = smov [#allocation28]  }
  0xb7   : > { %s637_s8 = sshll.u32 %s3941_s6, 4  ;;  %s661_s24 = sshll.u32 %s3942_s21, 4  ;;  %s638_s8 = int_to_ptr.vmem [resolvable:$true] %s637_s8  ;;  %s662_s24 = int_to_ptr.vmem [resolvable:$true] %s661_s24 }
  0xb8   : > { %s4961_s13 = sld [smem:[#allocation62_spill]] }
  0xbe   : > { %s3416_s14 = scalar_lea.hbm %s4961_s13, 256 }
  0xbf   : > { %p3417_p1 = scmp.ne.s32.totalorder %s4961_s13, %s3416_s14  ;;  %p3423_p12 = scmp.lt.u32.totalorder %s3416_s14, %s4961_s13 }
  0xc1   : > { %p3419_p3 = pnand %p3417_p1, %p4129_p8 }
  0xc3   : > { %p3420_p11 = pneg %p3419_p3 }
  0xc5   : > { %p3425_p13 = pnand %p3423_p12, %p3420_p11 }
  0xc7   : > { %3428 = shalt.err (!%p3425_p13)
}
  0xc8   : > { %s3429_s23 = scalar_lea.vmem %s638_s8, 256  ;;  %p3437_p7 = scmp.lt.s32.totalorder %s638_s8, %s638_s8 }
  0xc9   : > { %p3430_p0 = scmp.ne.s32.totalorder %s638_s8, %s3429_s23  ;;  %p3438_p9 = scmp.lt.s32.totalorder %s3429_s23, %s3429_s23 }
  0xcb   : > { %p3432_p2 = pnand %p3430_p0, %p4129_p8  ;;  %p3439_p5 = por %p3438_p9, %p3437_p7 }
  0xcd   : > { %p3433_p4 = pneg %p3432_p2 }
  0xcf   : > { %p3440_p10 = pnand %p3439_p5, %p3433_p4 }
  0xd1   : > { %3443 = shalt.err (!%p3440_p10)
}
  0xd2   : > { %3094 = dma.hbm_to_vmem [thread:$0]  (!%p4113_p6), %s4961_s13, 256, %s638_s8, [#allocation26], %s3937_s19, %s3937_s19, %s3938_s16  }
  0xd3   : > { %s4962_s15 = sld [smem:[#allocation64_spill]] }
  0xd9   : > { %s3444_s28 = scalar_lea.hbm %s4962_s15, 512 }
  0xda   : > { %p3445_p1 = scmp.ne.s32.totalorder %s4962_s15, %s3444_s28  ;;  %p3451_p12 = scmp.lt.u32.totalorder %s3444_s28, %s4962_s15 }
  0xdc   : > { %p3447_p3 = pnand %p3445_p1, %p4129_p8 }
  0xde   : > { %p3448_p11 = pneg %p3447_p3 }
  0xe0   : > { %p3453_p13 = pnand %p3451_p12, %p3448_p11 }
  0xe2   : > { %3456 = shalt.err (!%p3453_p13)
}
  0xe3   : > { %s3457_s29 = scalar_lea.vmem %s662_s24, 512  ;;  %p3465_p7 = scmp.lt.s32.totalorder %s662_s24, %s662_s24 }
  0xe4   : > { %p3458_p0 = scmp.ne.s32.totalorder %s662_s24, %s3457_s29  ;;  %p3466_p9 = scmp.lt.s32.totalorder %s3457_s29, %s3457_s29 }
  0xe6   : > { %p3460_p2 = pnand %p3458_p0, %p4129_p8  ;;  %p3467_p5 = por %p3466_p9, %p3465_p7 }
  0xe8   : > { %p3461_p4 = pneg %p3460_p2 }
  0xea   : > { %p3468_p10 = pnand %p3467_p5, %p3461_p4 }
  0xec   : > { %3471 = shalt.err (!%p3468_p10)
}
  0xed   : > { %3100 = dma.hbm_to_vmem [thread:$0]  (!%p4113_p6), %s4962_s15, 512, %s662_s24, [#allocation29], %s3937_s19, %s3937_s19, %s3938_s16  }
  0xee   : > { %s3943_s5 = smov [#allocation31]   ;;  %s4963_s17 = sld [smem:[#allocation66_spill]] }
  0xef   : > { %s686_s6 = sshll.u32 %s3943_s5, 4  ;;  %s687_s6 = int_to_ptr.vmem [resolvable:$true] %s686_s6 }
  0xf4   : > { %s3472_s28 = scalar_lea.hbm %s4963_s17, 16 }
  0xf5   : > { %p3473_p1 = scmp.ne.s32.totalorder %s4963_s17, %s3472_s28  ;;  %p3479_p12 = scmp.lt.u32.totalorder %s3472_s28, %s4963_s17 }
  0xf7   : > { %p3475_p3 = pnand %p3473_p1, %p4129_p8 }
  0xf9   : > { %p3476_p11 = pneg %p3475_p3 }
  0xfb   : > { %p3481_p13 = pnand %p3479_p12, %p3476_p11 }
  0xfd   : > { %3484 = shalt.err (!%p3481_p13)
}
  0xfe   : > { %s3485_s19 = scalar_lea.vmem %s687_s6, 16  ;;  %s3492_s16 = scalar_lea.vmem %s687_s6, 32 }
  0xff   : > { %p3486_p0 = scmp.ne.s32.totalorder %s687_s6, %s3485_s19  ;;  %p3493_p7 = scmp.lt.s32.totalorder %s687_s6, %s687_s6 }
 0x100   : > { %p3494_p9 = scmp.lt.s32.totalorder %s3492_s16, %s3485_s19 }
 0x101   : > { %p3488_p2 = pnand %p3486_p0, %p4129_p8 }
 0x102   : > { %p3495_p5 = por %p3494_p9, %p3493_p7 }
 0x103   : > { %p3489_p4 = pneg %p3488_p2 }
 0x105   : > { %p3496_p10 = pnand %p3495_p5, %p3489_p4 }
 0x107   : > { %3499 = shalt.err (!%p3496_p10)
}
 0x108   : > { %3106 = dma.hbm_to_vmem [thread:$0]  (!%p4113_p6), %s4963_s17, 16, %s687_s6, [#allocation32]  }
 0x109   : > { %s2758_s8 = sadd.s32 4294967294, %s3932_s22   ;;  %s58_s23 = sadd.s32 1, %s3928_s1 }
 0x10a   : > { %p60_p1 = scmp.ge.s32.totalorder %s58_s23, 2  ;;  %s65_s5 = sadd.s32 1, %s3920_s20 }
 0x10b   : > { %p72_p3 = scmp.ne.s32.totalorder %s3920_s20, %s3916_s30  ;;  %p73_p11 = scmp.eq.s32.totalorder %s3932_s22, 0 }
 0x10c   : > { %s5019_s23 = smov (%p60_p1, %s58_s23), 0  ;;  %p78_p13 = scmp.ne.s32.totalorder %s3916_s30, %s3912_s0 }
 0x10d   : > { %4964 = sst [smem:[#allocation48_spill]] %s5019_s23  ;;  %p4308_p12 = por %p73_p11, %p72_p3 }
 0x10e   : > { %s62_s6 = ssub.s32 %s3928_s1, %s5019_s23  ;;  %p494_p0 = scmp.eq.s32.totalorder %s4097_s2, 1 }
 0x10f   : > { %p63_p2 = scmp.eq.s32.totalorder %s62_s6, 0  ;;  %p4966_p4 = scmp.eq.s32.totalorder %s4097_s2, 0 }
 0x110   : > { %p4323_p9 = por %p494_p0, %p72_p3  ;;  %p500_p5 = scmp.eq.s32.totalorder %s2758_s8, 1 }
 0x111   : > { %p4319_p7 = por %p4966_p4, %p78_p13  ;;  %p3140_p1 = scmp.lt.s32.totalorder %s3932_s22, 2 }
 0x112   : > { %s4968_s28 = scalar_select %p4323_p9, 1, 0 }
 0x113   : > { %s4967_s26 = scalar_select %p4319_p7, 1, 0 }
 0x114   : > { %s4328_s14 = scalar_select %p63_p2, %s3920_s20, %s65_s5  }
 0x115   : > { %p4330_p10 = por %p500_p5, %p78_p13  ;;  %s4336_s27 = sand.u32 1, %s3920_s20  }
 0x116   : > { %s725_s10 = sand.u32 1, %s3932_s22   ;;  %p4341_p11 = pnand %p3140_p1, %p4308_p12 }
 0x117   : > { %s4969_s25 = scalar_select %p4330_p10, 1, 0 }
 0x118   : > { %s4970_s19 = scalar_select %p4341_p11, 1, 0 }
 0x119   : > { %s2778_s16 = sshll.u32 %s4336_s27, 3  ;;  %s2779_s24 = sshll.u32 %s3928_s1, 7 }
 0x11a   : > { %s4971_s5 = sld [smem:[#allocation50_spill]]  ;;  %s729_s7 = scalar_lea.vmem [#allocation7], %s2778_s16 }
 0x11b   : > { %s737_s9 = sshll.u32 %s729_s7, 4  ;;  %s4354_s21 = scalar_lea.sflag [#allocation8], %s725_s10  ;;  %s4352_s9 = int_to_ptr.vmem [resolvable:$true] %s737_s9 }
 0x11c   : > { %p4360_p12 = pneg %p4341_p11 }
 0x11e   : > { %s4972_s13 = scalar_select %p4360_p12, 1, 0 }
 0x120   : > { %s4350_s6 = scalar_lea.hbm %s4971_s5, %s2779_s24  ;;  %s3505_s16 = scalar_lea.hbm %s4971_s5, 256 }
 0x121   : > { %s3500_s11 = scalar_lea.hbm %s4350_s6, 128  ;;  %p3506_p2 = scmp.lt.u32.totalorder %s4350_s6, %s4971_s5 }
 0x122   : > { %p3501_p3 = scmp.ne.s32.totalorder %s4350_s6, %s3500_s11  ;;  %p3507_p4 = scmp.lt.u32.totalorder %s3505_s16, %s3500_s11 }
 0x123   : > { %p3509_p1 = scmp.lt.u32.totalorder %s3500_s11, %s4350_s6 }
 0x124   : > { %p3503_p13 = pnand %p4360_p12, %p3501_p3  ;;  %p3508_p5 = por %p3507_p4, %p3506_p2 }
 0x126   : > { %p3504_p0 = pneg %p3503_p13  ;;  %p3510_p10 = por %p3509_p1, %p3508_p5 }
 0x128   : > { %p3511_p9 = pnand %p3510_p10, %p3504_p0 }
 0x12a   : > { %3514 = shalt.err (!%p3511_p9)
}
 0x12b   : > { %s3515_s10 = scalar_lea.vmem %s4352_s9, 128  ;;  %s3944_s24 = smov [#allocation7]  }
 0x12c   : > { %p3516_p3 = scmp.ne.s32.totalorder %s4352_s9, %s3515_s10  ;;  %s3520_s29 = sshll.u32 %s3944_s24, 4  ;;  %s3521_s29 = int_to_ptr.vmem [resolvable:$false] %s3520_s29 }
 0x12d   : > { %s3522_s7 = scalar_lea.vmem %s3521_s29, 256  ;;  %p3523_p6 = scmp.lt.s32.totalorder %s4352_s9, %s3521_s29 }
 0x12e   : > { %p3518_p13 = pnand %p3516_p3, %p4360_p12  ;;  %p3524_p8 = scmp.lt.s32.totalorder %s3522_s7, %s3515_s10 }
 0x130   : > { %p3519_p7 = pneg %p3518_p13  ;;  %p3525_p2 = por %p3524_p8, %p3523_p6 }
 0x132   : > { %p3526_p4 = pnand %p3525_p2, %p3519_p7 }
 0x134   : > { %3529 = shalt.err (!%p3526_p4)
}
 0x135   : > { %3116 = dma.hbm_to_vmem [thread:$0]  (!%p4341_p11), %s4350_s6, 128, %s4352_s9, %s4354_s21  }
 0x136   : > { %s3945_s11 = smov [#allocation12]   ;;  %s3946_s8 = smov [#allocation15]  }
 0x137   : > { %s533_s16 = sshll.u32 %s3945_s11, 4  ;;  %s557_s5 = sshll.u32 %s3946_s8, 4  ;;  %s534_s16 = int_to_ptr.vmem [resolvable:$true] %s533_s16  ;;  %s558_s5 = int_to_ptr.vmem [resolvable:$true] %s557_s5 }
 0x138   : > { %s4973_s4 = sld [smem:[#allocation53_spill]]  ;;  %p4974_p8 = scmp.ne.s32.totalorder %s4956_s12, 0 }
 0x13e   : > { %s3530_s29 = scalar_lea.hbm %s4973_s4, 16 }
 0x13f   : > { %p3531_p6 = scmp.ne.s32.totalorder %s4973_s4, %s3530_s29  ;;  %p3537_p10 = scmp.lt.u32.totalorder %s3530_s29, %s4973_s4 }
 0x141   : > { %p3533_p7 = pnand %p3531_p6, %p4974_p8 }
 0x143   : > { %p3534_p9 = pneg %p3533_p7 }
 0x145   : > { %p3539_p0 = pnand %p3537_p10, %p3534_p9 }
 0x147   : > { %3542 = shalt.err (!%p3539_p0)
}
 0x148   : > { %s3543_s9 = scalar_lea.vmem %s534_s16, 16  ;;  %s3550_s15 = scalar_lea.vmem %s534_s16, 32 }
 0x149   : > { %p3544_p5 = scmp.ne.s32.totalorder %s534_s16, %s3543_s9  ;;  %p3551_p13 = scmp.lt.s32.totalorder %s534_s16, %s534_s16 }
 0x14a   : > { %p3552_p2 = scmp.lt.s32.totalorder %s3550_s15, %s3543_s9 }
 0x14b   : > { %p3546_p1 = pnand %p3544_p5, %p4974_p8 }
 0x14c   : > { %p3553_p4 = por %p3552_p2, %p3551_p13 }
 0x14d   : > { %p3547_p3 = pneg %p3546_p1 }
 0x14f   : > { %p3554_p11 = pnand %p3553_p4, %p3547_p3 }
 0x151   : > { %3557 = shalt.err (!%p3554_p11)
}
 0x152   : > { %p4975_p6 = scmp.ne.s32.totalorder %s4953_s3, 0  ;;  %s4976_s8 = sld [smem:[#allocation55_spill]] }
 0x154   : > { %3067 = dma.hbm_to_vmem [thread:$0]  (!%p4975_p6), %s4973_s4, 16, %s534_s16, [#allocation11]  }
 0x158   : > { %s3558_s24 = scalar_lea.hbm %s4976_s8, 16 }
 0x159   : > { %p3559_p7 = scmp.ne.s32.totalorder %s4976_s8, %s3558_s24  ;;  %p3565_p11 = scmp.lt.u32.totalorder %s3558_s24, %s4976_s8 }
 0x15b   : > { %p3561_p9 = pnand %p3559_p7, %p4974_p8 }
 0x15d   : > { %p3562_p10 = pneg %p3561_p9 }
 0x15f   : > { %p3567_p0 = pnand %p3565_p11, %p3562_p10 }
 0x161   : > { %3570 = shalt.err (!%p3567_p0)
}
 0x162   : > { %s3571_s15 = scalar_lea.vmem %s558_s5, 16  ;;  %s3578_s16 = scalar_lea.vmem %s558_s5, 32 }
 0x163   : > { %p3572_p5 = scmp.ne.s32.totalorder %s558_s5, %s3571_s15  ;;  %p3579_p13 = scmp.lt.s32.totalorder %s558_s5, %s558_s5 }
 0x164   : > { %p3580_p2 = scmp.lt.s32.totalorder %s3578_s16, %s3571_s15 }
 0x165   : > { %p3574_p1 = pnand %p3572_p5, %p4974_p8 }
 0x166   : > { %p3581_p4 = por %p3580_p2, %p3579_p13 }
 0x167   : > { %p3575_p3 = pneg %p3574_p1 }
 0x169   : > { %p3582_p12 = pnand %p3581_p4, %p3575_p3 }
 0x16b   : > { %3585 = shalt.err (!%p3582_p12)
}
 0x16c   : > { %3073 = dma.hbm_to_vmem [thread:$0]  (!%p4975_p6), %s4976_s8, 16, %s558_s5, [#allocation14]  }
 0x16d   : > { %s3947_s17 = smov [#allocation18]   ;;  %s3948_s24 = smov [#allocation21]  }
 0x16e   : > { %s581_s18 = sshll.u32 %s3947_s17, 4  ;;  %s605_s29 = sshll.u32 %s3948_s24, 4  ;;  %s582_s18 = int_to_ptr.vmem [resolvable:$true] %s581_s18  ;;  %s606_s29 = int_to_ptr.vmem [resolvable:$true] %s605_s29 }
 0x16f   : > { %s4977_s9 = sld [smem:[#allocation57_spill]] }
 0x175   : > { %s3586_s4 = scalar_lea.hbm %s4977_s9, 16 }
 0x176   : > { %p3587_p12 = scmp.ne.s32.totalorder %s4977_s9, %s3586_s4  ;;  %p3593_p10 = scmp.lt.u32.totalorder %s3586_s4, %s4977_s9 }
 0x178   : > { %p3589_p7 = pnand %p3587_p12, %p4974_p8 }
 0x17a   : > { %p3590_p9 = pneg %p3589_p7 }
 0x17c   : > { %p3595_p11 = pnand %p3593_p10, %p3590_p9 }
 0x17e   : > { %3598 = shalt.err (!%p3595_p11)
}
 0x17f   : > { %s3599_s5 = scalar_lea.vmem %s582_s18, 16  ;;  %s3606_s11 = scalar_lea.vmem %s582_s18, 32 }
 0x180   : > { %p3600_p0 = scmp.ne.s32.totalorder %s582_s18, %s3599_s5  ;;  %p3607_p3 = scmp.lt.s32.totalorder %s582_s18, %s582_s18 }
 0x181   : > { %p3608_p13 = scmp.lt.s32.totalorder %s3606_s11, %s3599_s5 }
 0x182   : > { %p3602_p5 = pnand %p3600_p0, %p4974_p8 }
 0x183   : > { %p3609_p2 = por %p3608_p13, %p3607_p3 }
 0x184   : > { %p3603_p1 = pneg %p3602_p5 }
 0x186   : > { %p3610_p4 = pnand %p3609_p2, %p3603_p1 }
 0x188   : > { %3613 = shalt.err (!%p3610_p4)
}
 0x189   : > { %3079 = dma.hbm_to_vmem [thread:$0]  (!%p4975_p6), %s4977_s9, 16, %s582_s18, [#allocation17]  }
 0x18a   : > { %s4978_s10 = sld [smem:[#allocation59_spill]] }
 0x190   : > { %s3614_s7 = scalar_lea.hbm %s4978_s10, 16 }
 0x191   : > { %p3615_p12 = scmp.ne.s32.totalorder %s4978_s10, %s3614_s7  ;;  %p3621_p10 = scmp.lt.u32.totalorder %s3614_s7, %s4978_s10 }
 0x193   : > { %p3617_p7 = pnand %p3615_p12, %p4974_p8 }
 0x195   : > { %p3618_p9 = pneg %p3617_p7 }
 0x197   : > { %p3623_p11 = pnand %p3621_p10, %p3618_p9 }
 0x199   : > { %3626 = shalt.err (!%p3623_p11)
}
 0x19a   : > { %s3627_s11 = scalar_lea.vmem %s606_s29, 16  ;;  %s3634_s18 = scalar_lea.vmem %s606_s29, 32 }
 0x19b   : > { %p3628_p0 = scmp.ne.s32.totalorder %s606_s29, %s3627_s11  ;;  %p3635_p3 = scmp.lt.s32.totalorder %s606_s29, %s606_s29 }
 0x19c   : > { %p3636_p13 = scmp.lt.s32.totalorder %s3634_s18, %s3627_s11 }
 0x19d   : > { %p3630_p5 = pnand %p3628_p0, %p4974_p8 }
 0x19e   : > { %p3637_p2 = por %p3636_p13, %p3635_p3 }
 0x19f   : > { %p3631_p1 = pneg %p3630_p5 }
 0x1a1   : > { %p3638_p4 = pnand %p3637_p2, %p3631_p1 }
 0x1a3   : > { %3641 = shalt.err (!%p3638_p4)
}
 0x1a4   : > { %3085 = dma.hbm_to_vmem [thread:$0]  (!%p4975_p6), %s4978_s10, 16, %s606_s29, [#allocation20]  }
 0x1a5   : > { %s3949_s4 = smov [#allocation24]   ;;  %s3950_s7 = smov [#allocation27]  }
 0x1a6   : > { %s627_s23 = sshll.u32 %s3949_s4, 4  ;;  %s651_s15 = sshll.u32 %s3950_s7, 4  ;;  %s628_s23 = int_to_ptr.vmem [resolvable:$true] %s627_s23  ;;  %s652_s15 = int_to_ptr.vmem [resolvable:$true] %s651_s15 }
 0x1a7   : > { %s4979_s5 = sld [smem:[#allocation61_spill]] }
 0x1ad   : > { %s3642_s8 = scalar_lea.hbm %s4979_s5, 16 }
 0x1ae   : > { %p3643_p12 = scmp.ne.s32.totalorder %s4979_s5, %s3642_s8  ;;  %p3649_p10 = scmp.lt.u32.totalorder %s3642_s8, %s4979_s5 }
 0x1b0   : > { %p3645_p7 = pnand %p3643_p12, %p4974_p8 }
 0x1b2   : > { %p3646_p9 = pneg %p3645_p7 }
 0x1b4   : > { %p3651_p11 = pnand %p3649_p10, %p3646_p9 }
 0x1b6   : > { %3654 = shalt.err (!%p3651_p11)
}
 0x1b7   : > { %s3655_s29 = scalar_lea.vmem %s628_s23, 16  ;;  %s3662_s24 = scalar_lea.vmem %s628_s23, 32 }
 0x1b8   : > { %p3656_p0 = scmp.ne.s32.totalorder %s628_s23, %s3655_s29  ;;  %p3663_p3 = scmp.lt.s32.totalorder %s628_s23, %s628_s23 }
 0x1b9   : > { %p3664_p13 = scmp.lt.s32.totalorder %s3662_s24, %s3655_s29 }
 0x1ba   : > { %p3658_p5 = pnand %p3656_p0, %p4974_p8 }
 0x1bb   : > { %p3665_p2 = por %p3664_p13, %p3663_p3 }
 0x1bc   : > { %p3659_p1 = pneg %p3658_p5 }
 0x1be   : > { %p3666_p4 = pnand %p3665_p2, %p3659_p1 }
 0x1c0   : > { %3669 = shalt.err (!%p3666_p4)
}
 0x1c1   : > { %3091 = dma.hbm_to_vmem [thread:$0]  (!%p4975_p6), %s4979_s5, 16, %s628_s23, [#allocation23]  }
 0x1c2   : > { %s4980_s16 = sld [smem:[#allocation63_spill]] }
 0x1c8   : > { %s3670_s6 = scalar_lea.hbm %s4980_s16, 16 }
 0x1c9   : > { %p3671_p12 = scmp.ne.s32.totalorder %s4980_s16, %s3670_s6  ;;  %p3677_p10 = scmp.lt.u32.totalorder %s3670_s6, %s4980_s16 }
 0x1cb   : > { %p3673_p7 = pnand %p3671_p12, %p4974_p8 }
 0x1cd   : > { %p3674_p9 = pneg %p3673_p7 }
 0x1cf   : > { %p3679_p11 = pnand %p3677_p10, %p3674_p9 }
 0x1d1   : > { %3682 = shalt.err (!%p3679_p11)
}
 0x1d2   : > { %s3683_s24 = scalar_lea.vmem %s652_s15, 16  ;;  %s3690_s23 = scalar_lea.vmem %s652_s15, 32 }
 0x1d3   : > { %p3684_p0 = scmp.ne.s32.totalorder %s652_s15, %s3683_s24  ;;  %p3691_p3 = scmp.lt.s32.totalorder %s652_s15, %s652_s15 }
 0x1d4   : > { %p3692_p13 = scmp.lt.s32.totalorder %s3690_s23, %s3683_s24 }
 0x1d5   : > { %p3686_p5 = pnand %p3684_p0, %p4974_p8 }
 0x1d6   : > { %p3693_p2 = por %p3692_p13, %p3691_p3 }
 0x1d7   : > { %p3687_p1 = pneg %p3686_p5 }
 0x1d9   : > { %p3694_p4 = pnand %p3693_p2, %p3687_p1 }
 0x1db   : > { %3697 = shalt.err (!%p3694_p4)
}
 0x1dc   : > { %3097 = dma.hbm_to_vmem [thread:$0]  (!%p4975_p6), %s4980_s16, 16, %s652_s15, [#allocation26]  }
 0x1dd   : > { %s3951_s8 = smov [#allocation30]   ;;  %s3952_s6 = smov [#allocation33]  }
 0x1de   : > { %s675_s9 = sshll.u32 %s3951_s8, 4  ;;  %s697_s11 = sshll.u32 %s3952_s6, 4  ;;  %s676_s9 = int_to_ptr.vmem [resolvable:$true] %s675_s9  ;;  %s698_s11 = int_to_ptr.vmem [resolvable:$true] %s697_s11 }
 0x1df   : > { %s4981_s29 = sld [smem:[#allocation65_spill]] }
 0x1e5   : > { %s3698_s5 = scalar_lea.hbm %s4981_s29, 16 }
 0x1e6   : > { %p3699_p12 = scmp.ne.s32.totalorder %s4981_s29, %s3698_s5  ;;  %p3705_p10 = scmp.lt.u32.totalorder %s3698_s5, %s4981_s29 }
 0x1e8   : > { %p3701_p7 = pnand %p3699_p12, %p4974_p8 }
 0x1ea   : > { %p3702_p9 = pneg %p3701_p7 }
 0x1ec   : > { %p3707_p11 = pnand %p3705_p10, %p3702_p9 }
 0x1ee   : > { %3710 = shalt.err (!%p3707_p11)
}
 0x1ef   : > { %s3711_s15 = scalar_lea.vmem %s676_s9, 16  ;;  %s3718_s7 = scalar_lea.vmem %s676_s9, 32 }
 0x1f0   : > { %p3712_p0 = scmp.ne.s32.totalorder %s676_s9, %s3711_s15  ;;  %p3719_p3 = scmp.lt.s32.totalorder %s676_s9, %s676_s9 }
 0x1f1   : > { %p3720_p13 = scmp.lt.s32.totalorder %s3718_s7, %s3711_s15 }
 0x1f2   : > { %p3714_p5 = pnand %p3712_p0, %p4974_p8 }
 0x1f3   : > { %p3721_p2 = por %p3720_p13, %p3719_p3 }
 0x1f4   : > { %p3715_p1 = pneg %p3714_p5 }
 0x1f6   : > { %p3722_p4 = pnand %p3721_p2, %p3715_p1 }
 0x1f8   : > { %3725 = shalt.err (!%p3722_p4)
}
 0x1f9   : > { %3103 = dma.hbm_to_vmem [thread:$0]  (!%p4975_p6), %s4981_s29, 16, %s676_s9, [#allocation29]  }
 0x1fa   : > { %s4982_s18 = sld [smem:[#allocation67_spill]] }
 0x200   : > { %s3726_s17 = scalar_lea.hbm %s4982_s18, 16 }
 0x201   : > { %p3727_p12 = scmp.ne.s32.totalorder %s4982_s18, %s3726_s17  ;;  %p3733_p10 = scmp.lt.u32.totalorder %s3726_s17, %s4982_s18 }
 0x203   : > { %p3729_p7 = pnand %p3727_p12, %p4974_p8 }
 0x205   : > { %p3730_p9 = pneg %p3729_p7 }
 0x207   : > { %p3735_p11 = pnand %p3733_p10, %p3730_p9 }
 0x209   : > { %3738 = shalt.err (!%p3735_p11)
}
 0x20a   : > { %s3739_s7 = scalar_lea.vmem %s698_s11, 16  ;;  %s3746_s9 = scalar_lea.vmem %s698_s11, 32 }
 0x20b   : > { %p3740_p0 = scmp.ne.s32.totalorder %s698_s11, %s3739_s7  ;;  %p3747_p3 = scmp.lt.s32.totalorder %s698_s11, %s698_s11 }
 0x20c   : > { %p3748_p13 = scmp.lt.s32.totalorder %s3746_s9, %s3739_s7 }
 0x20d   : > { %p3742_p5 = pnand %p3740_p0, %p4974_p8 }
 0x20e   : > { %p3749_p2 = por %p3748_p13, %p3747_p3 }
 0x20f   : > { %p3743_p1 = pneg %p3742_p5 }
 0x211   : > { %p3750_p4 = pnand %p3749_p2, %p3743_p1 }
 0x213   : > { %3753 = shalt.err (!%p3750_p4)
}
 0x214   : > { %3109 = dma.hbm_to_vmem [thread:$0]  (!%p4975_p6), %s4982_s18, 16, %s698_s11, [#allocation32]  }
 0x215   : > { %s2777_s12 = sshll.u32 %s3928_s1, 4  ;;  %s4983_s17 = sld [smem:[#allocation49_spill]] }
 0x216   : > { %s711_s3 = scalar_lea.vmem [#allocation4], %s4336_s27  ;;  %s2780_s4 = sshll.u32 %s4336_s27, 2 }
 0x217   : > { %s718_s23 = sshll.u32 %s711_s3, 4  ;;  %s709_s15 = scalar_lea.sflag [#allocation5], %s4336_s27  ;;  %s4535_s23 = int_to_ptr.vmem [resolvable:$true] %s718_s23 }
 0x218   : > { %p4984_p12 = scmp.ne.s32.totalorder %s4972_s13, 0 }
 0x21b   : > { %s4532_s24 = scalar_lea.hbm %s4983_s17, %s2777_s12  ;;  %s3759_s8 = scalar_lea.hbm %s4983_s17, 32 }
 0x21c   : > { %s3754_s7 = scalar_lea.hbm %s4532_s24, 16  ;;  %p3760_p9 = scmp.lt.u32.totalorder %s4532_s24, %s4983_s17 }
 0x21d   : > { %p3755_p8 = scmp.ne.s32.totalorder %s4532_s24, %s3754_s7  ;;  %p3761_p10 = scmp.lt.u32.totalorder %s3759_s8, %s3754_s7 }
 0x21e   : > { %p3763_p0 = scmp.lt.u32.totalorder %s3754_s7, %s4532_s24 }
 0x21f   : > { %p3757_p6 = pnand %p3755_p8, %p4984_p12  ;;  %p3762_p11 = por %p3761_p10, %p3760_p9 }
 0x221   : > { %p3758_p7 = pneg %p3757_p6  ;;  %p3764_p5 = por %p3763_p0, %p3762_p11 }
 0x223   : > { %p3765_p1 = pnand %p3764_p5, %p3758_p7 }
 0x225   : > { %3768 = shalt.err (!%p3765_p1)
}
 0x226   : > { %s3769_s10 = scalar_lea.vmem %s4535_s23, 16  ;;  %s3953_s5 = smov [#allocation4]  }
 0x227   : > { %p3770_p3 = scmp.ne.s32.totalorder %s4535_s23, %s3769_s10  ;;  %s3774_s3 = sshll.u32 %s3953_s5, 4  ;;  %s3775_s3 = int_to_ptr.vmem [resolvable:$false] %s3774_s3 }
 0x228   : > { %s3776_s11 = scalar_lea.vmem %s3775_s3, 32  ;;  %p3777_p4 = scmp.lt.s32.totalorder %s4535_s23, %s3775_s3 }
 0x229   : > { %p3772_p13 = pnand %p3770_p3, %p4984_p12  ;;  %p3778_p8 = scmp.lt.s32.totalorder %s3776_s11, %s3769_s10 }
 0x22b   : > { %p3773_p2 = pneg %p3772_p13  ;;  %p3779_p6 = por %p3778_p8, %p3777_p4 }
 0x22d   : > { %p3780_p9 = pnand %p3779_p6, %p3773_p2 }
 0x22f   : > { %3783 = shalt.err (!%p3780_p9)
}
 0x230   : > { %p4985_p7 = scmp.ne.s32.totalorder %s4970_s19, 0  ;;  %s2781_s7 = sshll.u32 %s3928_s1, 6 }
 0x231   : > { %s4986_s6 = sld [smem:[#allocation51_spill]]  ;;  %s748_s10 = scalar_lea.vmem [#allocation9], %s2780_s4 }
 0x232   : > { %3113 = dma.hbm_to_vmem [thread:$0]  (!%p4985_p7), %s4532_s24, 16, %s4535_s23, %s709_s15  }
 0x233   : > { %s755_s5 = sshll.u32 %s748_s10, 4  ;;  %s756_s5 = int_to_ptr.vmem [resolvable:$true] %s755_s5 }
 0x237   : > { %s4564_s12 = scalar_lea.hbm %s4986_s6, %s2781_s7  ;;  %s3789_s15 = scalar_lea.hbm %s4986_s6, 128 }
 0x238   : > { %s3784_s3 = scalar_lea.hbm %s4564_s12, 64  ;;  %p3790_p5 = scmp.lt.u32.totalorder %s4564_s12, %s4986_s6 }
 0x239   : > { %p3785_p10 = scmp.ne.s32.totalorder %s4564_s12, %s3784_s3  ;;  %p3791_p1 = scmp.lt.u32.totalorder %s3789_s15, %s3784_s3 }
 0x23a   : > { %p3793_p13 = scmp.lt.u32.totalorder %s3784_s3, %s4564_s12 }
 0x23b   : > { %p3787_p11 = pnand %p3785_p10, %p4984_p12  ;;  %p3792_p3 = por %p3791_p1, %p3790_p5 }
 0x23d   : > { %p3788_p0 = pneg %p3787_p11  ;;  %p3794_p2 = por %p3793_p13, %p3792_p3 }
 0x23f   : > { %p3795_p4 = pnand %p3794_p2, %p3788_p0 }
 0x241   : > { %3798 = shalt.err (!%p3795_p4)
}
 0x242   : > { %s3799_s27 = scalar_lea.vmem %s756_s5, 64  ;;  %s3954_s4 = smov [#allocation9]  }
 0x243   : > { %p3800_p8 = scmp.ne.s32.totalorder %s756_s5, %s3799_s27  ;;  %s3804_s9 = sshll.u32 %s3954_s4, 4  ;;  %s3805_s9 = int_to_ptr.vmem [resolvable:$false] %s3804_s9 }
 0x244   : > { %s3806_s8 = scalar_lea.vmem %s3805_s9, 128  ;;  %p3807_p10 = scmp.lt.s32.totalorder %s756_s5, %s3805_s9 }
 0x245   : > { %p3802_p6 = pnand %p3800_p8, %p4984_p12  ;;  %p3808_p11 = scmp.lt.s32.totalorder %s3806_s8, %s3799_s27 }
 0x247   : > { %p3803_p9 = pneg %p3802_p6  ;;  %p3809_p7 = por %p3808_p11, %p3807_p10 }
 0x249   : > { %p3810_p1 = pnand %p3809_p7, %p3803_p9 }
 0x24b   : > { %3813 = shalt.err (!%p3810_p1)
}
 0x24c   : > { %p4987_p5 = scmp.ne.s32.totalorder %s4970_s19, 0  ;;  %s4988_s10 = sld [smem:[#allocation47_spill]] }
 0x24e   : > { %3119 = dma.hbm_to_vmem [thread:$0]  (!%p4987_p5), %s4564_s12, 64, %s756_s5, %s4354_s21  }
 0x252   : > { %p4989_p0 = scmp.ne.s32.totalorder %s4988_s10, 0 }
 0x253   : > { %s4589_s13 = sand.u32 (!%p4989_p0), 1, %s3916_s30   ;;  %p4990_p12 = scmp.ne.s32.totalorder (!%p4989_p0), %s4967_s26, 0 }
 0x254   : > { %764 = sbr.rel (%p4989_p0) target bundleno = 3042 (0xbe2), region = 96  ;;  %s767_s3 = scalar_lea.sflag (!%p4989_p0), [#allocation5], %s4589_s13 }
 0x255   : > { %s769_s24 = scalar_lea.vmem (!%p4989_p0), [#allocation4], %s4589_s13 }
 0x25b   : > { %3867 = dma.done.wait (%p4990_p12), %s767_s3, 16  }
 0x25c   : > { %3869 = vsyncadd (%p4990_p12), %s767_s3, 4294967280  ;;  %s774_s19 = sand.u32 1, %s4097_s2   ;;  %s2783_s21 = sshll.u32 %s4589_s13, 3 }
 0x25d   : > { %s775_s12 = scalar_lea.sflag [#allocation8], %s774_s19  ;;  %s4601_s5 = scalar_lea.vmem [#allocation7], %s2783_s21 }
 0x25e   : > { %3871 = dma.done.wait (%p4990_p12), %s775_s12, 192  }
 0x25f   : > { %3873 = vsyncadd (%p4990_p12), %s775_s12, 4294967104  ;;  %s2784_s23 = sshll.u32 %s4589_s13, 2  ;;  %p4991_p7 = scmp.eq.s32.totalorder %s4097_s2, 0 }
 0x260   : > { %s787_s15 = scalar_lea.vmem [#allocation9], %s2784_s23 }
 0x261   : > { %3875 = dma.done.wait (%p4991_p7), [#allocation11], 272   ;;  %p4992_p3 = pmov %p4991_p7 }
 0x263   : > { %3877 = vsyncadd (%p4992_p3), [#allocation11], 4294967024  ;;  %p4993_p13 = pmov %p4992_p3 }
 0x264   : > { %p4994_p2 = pmov %p4992_p3 }
 0x265   : > { %3879 = dma.done.wait (%p4993_p13), [#allocation14], 272  }
 0x266   : > { %3881 = vsyncadd (%p4994_p2), [#allocation14], 4294967024  ;;  %p4995_p4 = pmov %p4994_p2 }
 0x267   : > { %p4996_p8 = pmov %p4994_p2 }
 0x268   : > { %3883 = dma.done.wait (%p4995_p4), [#allocation17], 272  }
 0x269   : > { %3885 = vsyncadd (%p4996_p8), [#allocation17], 4294967024  ;;  %p4997_p6 = pmov %p4994_p2 }
 0x26a   : > { %p4998_p9 = pmov %p4994_p2 }
 0x26b   : > { %3887 = dma.done.wait (%p4997_p6), [#allocation20], 272  }
 0x26c   : > { %3889 = vsyncadd (%p4998_p9), [#allocation20], 4294967024  ;;  %p4999_p10 = pmov %p4994_p2 }
 0x26d   : > { %p5000_p11 = pmov %p4994_p2 }
 0x26e   : > { %3891 = dma.done.wait (%p4999_p10), [#allocation23], 32  }
 0x26f   : > { %3893 = vsyncadd (%p5000_p11), [#allocation23], 4294967264  ;;  %p5001_p1 = pmov %p4994_p2 }
 0x271   : > { %3895 = dma.done.wait (%p5001_p1), [#allocation26], 272   ;;  %p5002_p5 = pmov %p5001_p1 }
 0x272   : > { %p5003_p0 = pmov %p5001_p1 }
 0x273   : > { %3897 = vsyncadd (%p5002_p5), [#allocation26], 4294967024 }
 0x274   : > { %3899 = dma.done.wait (%p5003_p0), [#allocation29], 528   ;;  %p5004_p12 = pmov %p5003_p0 }
 0x275   : > { %p5005_p7 = pmov %p5003_p0 }
 0x276   : > { %3901 = vsyncadd (%p5004_p12), [#allocation29], 4294966768 }
 0x277   : > { %3903 = dma.done.wait (%p5005_p7), [#allocation32], 32   ;;  %p5006_p3 = pmov %p5003_p0 }
 0x278   : > { %v3955_v0 = vmov 0.0   ;;  %vm3956_vm0 = vmmov 0   ;;  %v3234_v1 = vld [vmem:[#allocation13] sm:$0xff]   ;;  %v3235_v2 = vld [vmem:[#allocation13 + $0x8] sm:$0xff]   ;;  %vm944_vm1 = vcmask 261120   ;;  %v3238_v5 = vld [vmem:[#allocation16] sm:$0xff]   ;;  %v1066_v30 = vlaneseq }
 0x279   : > { %3905 = vsyncadd (%p5006_p3), [#allocation32], 4294967264  ;;  %2889 = vmatprep.subr.bf16.mxu0 %v3955_v0  ;;  %2893 = vmatprep.mubr.msk.bf16.mxu0 %vm3956_vm0, %v3955_v0  ;;  %v920_v3 = vld [vmem:[%s787_s15] sm:$0xf]  ;;  %v3236_v4 = vld [vmem:[#allocation10] sm:$0xff]   ;;  %s3957_s2 = smov 104  }
 0x27a   : > { %2897 = vmatprep.subr.bf16.mxu1 %v3955_v0  ;;  %2901 = vmatprep.mubr.msk.bf16.mxu1 %vm3956_vm0, %v3955_v0  ;;  %v3237_v6 = vld [vmem:[#allocation10 + $0x8] sm:$0xff]   ;;  %v2802_v10 = vld [vmem:[#allocation15] ss:$0 sm:$0xff]  ;;  %s3958_s26 = smov 120   ;;  %v2814_v16 = vld [vmem:[#allocation12] ss:$0 sm:$0xff] }
 0x27b   : > { %2890 = vmatpush3.bf16.msra.mxu0 %v3234_v1  ;;  %2898 = vmatpush3.bf16.msra.mxu1 %v3238_v5  ;;  %v4649_v7 = vld [vmem:[%s4601_s5] sm:$0xff]  ;;  %s3959_s11 = smov 112   ;;  %v3960_v28 = vmov 1983009808   ;;  %v3961_v31 = vmov 1934713408  }
 0x27c   : > { %2891 = vmatprep.subr.bf16.mxu0 %v3955_v0  ;;  %2899 = vmatprep.subr.bf16.mxu1 %v3955_v0  ;;  %v1361_v8 = vpack.c.bf16 %v4649_v7, %v4649_v7  ;;  %v3239_v9 = vld [vmem:[#allocation16 + $0x8] sm:$0xff]   ;;  %v2806_v22 = vld [vmem:[#allocation18] ss:$0 sm:$0xff]  ;;  %v1064_v29 = vunpack.c.l.s4 %v3960_v28  ;;  %v1096_v32 = vunpack.c.l.s4 %v3961_v31  ;;  %v1067_v34 = vshrl.u32 %v1066_v30, 7  ;;  %s3962_s7 = smov 16   ;;  %s3963_s27 = smov 8  }
 0x27d   : > { %vm1201_vm2 = vcmask 60416   ;;  %vm1594_vm3 = vcmask 64512   ;;  %vm1842_vm4 = vcmask 1043456   ;;  %s3964_s4 = smov 24   ;;  %vm2185_vm5 = vcmask 130048   ;;  %s5007_s9 = sld [smem:[#allocation46_spill]] }
 0x27e   : > { %v1065_v33 = vunpack.c.0.s8 %v1064_v29  ;;  %v1097_v37 = vunpack.c.0.s8 %v1096_v32  ;;  %vm2187_vm6 = vcmask 195584   ;;  %vm2395_vm7 = vcmask 523264   ;;  %s914_s10 = scalar_lea.vmem [#allocation34], %s2783_s21  ;;  %s5008_s12 = sld [smem:[#allocation68_spill]] }
 0x27f   : > { %2892 = vmatpush3.bf16.msra.mxu0 %v3235_v2  ;;  %2900 = vmatpush3.bf16.msra.mxu1 %v3239_v9  ;;  %s2485_s3 = sshll.u32 %s914_s10, 4  ;;  %s2471_s23 = scalar_lea.sflag [#allocation6], %s4589_s13  ;;  %s4830_s3 = int_to_ptr.vmem [resolvable:$true] %s2485_s3 }
 0x280   : > { %2905 = vmatprep.subr.bf16.mxu0 %v3955_v0  ;;  %2913 = vmatprep.subr.bf16.mxu1 %v3955_v0  ;;  %v4676_v38 = vsub.s32 %v1065_v33, %v1067_v34  ;;  %v4678_v44 = vsub.s32 %v1097_v37, %v1067_v34  ;;  %s3814_s15 = scalar_lea.vmem %s4830_s3, 128  ;;  %p5009_p2 = scmp.ne.s32.totalorder %s4968_s28, 0 }
 0x281   : > { %p3815_p13 = scmp.ne.s32.totalorder %s4830_s3, %s3814_s15  ;;  %s3965_s21 = smov [#allocation34]  }
 0x282   : > { %2894 = vmatmul.mubr.msk.bf16.vlgmr.msra.gmra.mrb[0].mxu0 %vm944_vm1, %v920_v3  ;;  %2902 = vmatmul.mubr.msk.bf16.vlgmr.msra.gmra.mrb[0].mxu1 %vm944_vm1, %v920_v3 }
 0x283   : > { %2906 = vmatpush3.bf16.msra.mxu0 %v3236_v4  ;;  %2909 = vmatprep.mubr.msk.bf16.mxu0 %vm3956_vm0, %v3955_v0  ;;  %s2850_s8 = sshll.u32 %s5007_s9, 7  ;;  %p3816_p4 = pnand %p3815_p13, %p5009_p2 }
 0x284   : > { %2907 = vmatprep.subr.bf16.mxu0 %v3955_v0  ;;  %2915 = vmatprep.mubr.msk.bf16.mxu1 %vm3956_vm0, %v3955_v0  ;;  %s4828_s5 = scalar_lea.hbm %s5008_s12, %s2850_s8 }
 0x285   : > { %p3817_p8 = pneg %p3816_p4 }
 0x287   : > { %2908 = vmatpush3.bf16.msra.mxu0 %v3237_v6 }
 0x288   : > { %2919 = vmatprep.subr.bf16.mxu0 %v3955_v0 }
 0x28a   : > { %2910 = vmatmul.mubr.msk.bf16.vlgmr.msra.gmra.mrb[4].mxu0 %vm944_vm1, %v1361_v8 }
 0x28b   : > { %2921 = vmatprep.mubr.msk.bf16.mxu0 %vm3956_vm0, %v3955_v0 }
 0x355   : > { %v982_v11 = vpop.f32.mrb[0].mxu0  ;;  %v1045_v23 = vpop.f32.mrb[0].mxu1 }
 0x356   : > { %v983_v12 = vadd.f32 %v2802_v10, %v982_v11  ;;  %v2895_v13 = vpop.f32.mrb[1].mxu0  ;;  %v4671_v24 = vadd.f32 %v2806_v22, %v1045_v23  ;;  %v2903_v25 = vpop.f32.mrb[1].mxu1 }
 0x357   : > { %v985_v14 = vpop.f32.mrb[2].mxu0  ;;  %v1048_v26 = vpop.f32.mrb[2].mxu1 }
 0x358   : > { %1058 = vrot.lane.b32.xlu1 %v983_v12, %s3957_s2  ;;  %1052 = vrot.lane.b32.xlu0 %v983_v12, %s3958_s26  ;;  %v2896_v15 = vpop.f32.mrb[3].mxu0  ;;  %v2904_v27 = vpop.f32.mrb[3].mxu1 }
 0x35c   : > { %1055 = vrot.lane.b32.xlu0 %v983_v12, %s3959_s11 }
 0x35d   : > { %v1423_v17 = vpop.f32.mrb[4].mxu0 }
 0x35e   : > { %v4666_v18 = vadd.f32 %v2814_v16, %v1423_v17  ;;  %v2911_v19 = vpop.f32.mrb[5].mxu0 }
 0x35f   : > { %v1426_v20 = vpop.f32.mrb[6].mxu0 }
 0x360   : > { %1433 = vrot.lane.b32.xlu0 %v4666_v18, %s3959_s11  ;;  %1430 = vrot.lane.b32.xlu1 %v4666_v18, %s3958_s26  ;;  %v2912_v21 = vpop.f32.mrb[7].mxu0 }
 0x364   : > { %1436 = vrot.lane.b32.xlu1 %v4666_v18, %s3957_s2  ;;  %1207 = vrot.lane.b32.xlu0 %v4671_v24, %s3958_s26 }
 0x368   : > { %1210 = vrot.lane.b32.xlu1 %v4671_v24, %s3959_s11  ;;  %1213 = vrot.lane.b32.xlu0 %v4671_v24, %s3957_s2  ;;  %s3818_s2 = sshll.u32 %s3965_s21, 4  ;;  %s3819_s2 = int_to_ptr.vmem [resolvable:$false] %s3818_s2 }
 0x369   : > { %s3820_s26 = scalar_lea.vmem %s3819_s2, 256  ;;  %p3821_p6 = scmp.lt.s32.totalorder %s4830_s3, %s3819_s2 }
 0x36a   : > { %p3822_p9 = scmp.lt.s32.totalorder %s3820_s26, %s3814_s15 }
 0x36c   : > { %p3823_p10 = por %p3822_p9, %p3821_p6 }
 0x36e   : > { %p3824_p11 = pnand %p3823_p10, %p3817_p8 }
 0x3ca   : > { %v1059_v35 = vpop.permute.xlu1 %1058  ;;  %v1053_v36 = vpop.permute.xlu0 %1052 }
 0x3cb   : > { %v1077_v39 = vcombine.low %v1053_v36, %v1059_v35  ;;  %v1078_v40 = vcombine.high %v1053_v36, %v1059_v35 }
 0x3cd   : > { %v1085_v45 = vrot.slane %v1077_v39, %v4676_v38  ;;  %v1092_v46 = vrot.slane %v1078_v40, %v4676_v38 }
 0x3ce   : > { %v1056_v41 = vpop.permute.xlu0 %1055 }
 0x3cf   : > { %v1061_v42 = vcombine.low %v983_v12, %v1056_v41  ;;  %v1062_v43 = vcombine.high %v983_v12, %v1056_v41 }
 0x3d1   : > { %v1069_v47 = vrot.slane %v1061_v42, %v4676_v38  ;;  %v1076_v48 = vrot.slane %v1062_v43, %v4676_v38 }
 0x3d2   : > { %v1431_v49 = vpop.permute.xlu1 %1430  ;;  %v1434_v54 = vpop.permute.xlu0 %1433 }
 0x3d3   : > { %v1093_v50 = vcombine.low %v1069_v47, %v1085_v45  ;;  %v1094_v51 = vcombine.high %v1069_v47, %v1085_v45  ;;  %v1109_v52 = vcombine.low %v1076_v48, %v1092_v46  ;;  %v1110_v53 = vcombine.high %v1076_v48, %v1092_v46 }
 0x3d4   : > { %v1439_v59 = vcombine.low %v4666_v18, %v1434_v54  ;;  %v1440_v60 = vcombine.high %v4666_v18, %v1434_v54 }
 0x3d5   : > { %v1101_v55 = vrot.slane %v1093_v50, %v4678_v44  ;;  %v1108_v56 = vrot.slane %v1094_v51, %v4678_v44  ;;  %v1117_v57 = vrot.slane %v1109_v52, %v4678_v44  ;;  %v1124_v58 = vrot.slane %v1110_v53, %v4678_v44 }
 0x3d6   : > { %v1437_v61 = vpop.permute.xlu1 %1436  ;;  %v1447_v10 = vrot.slane %v1439_v59, %v4676_v38  ;;  %v1454_v11 = vrot.slane %v1440_v60, %v4676_v38 }
 0x3d7   : > { %v1129_v62 = vcombine.low %v1101_v55, %v1108_v56  ;;  %v2810_v63 = vcombine.high %v1101_v55, %v1108_v56  ;;  %v1145_v1 = vcombine.low %v1117_v57, %v1124_v58  ;;  %v2811_v2 = vcombine.high %v1117_v57, %v1124_v58 }
 0x3d8   : > { %v1455_v3 = vcombine.low %v1431_v49, %v1437_v61  ;;  %v1456_v4 = vcombine.high %v1431_v49, %v1437_v61 }
 0x3d9   : > { %v1136_v5 = vrot.slane %v1129_v62, %v4676_v38  ;;  %v1144_v6 = vrot.slane %v2810_v63, %v4676_v38  ;;  %v1152_v8 = vrot.slane %v1145_v1, %v4676_v38  ;;  %v1160_v9 = vrot.slane %v2811_v2, %v4676_v38 }
 0x3da   : > { %v1463_v12 = vrot.slane %v1455_v3, %v4676_v38  ;;  %v1470_v13 = vrot.slane %v1456_v4, %v4676_v38 }
 0x3db   : > { %v1161_v14 = vcombine.low %v1136_v5, %v1144_v6  ;;  %v1162_v15 = vcombine.high %v1136_v5, %v1144_v6  ;;  %v1177_v16 = vcombine.low %v1152_v8, %v1160_v9  ;;  %v1178_v17 = vcombine.high %v1152_v8, %v1160_v9 }
 0x3dc   : > { %v1471_v18 = vcombine.low %v1447_v10, %v1463_v12  ;;  %v1472_v19 = vcombine.high %v1447_v10, %v1463_v12  ;;  %v1487_v20 = vcombine.low %v1454_v11, %v1470_v13  ;;  %v1488_v21 = vcombine.high %v1454_v11, %v1470_v13  ;;  %v1208_v11 = vpop.permute.xlu0 %1207  ;;  %v1211_v12 = vpop.permute.xlu1 %1210 }
 0x3dd   : > { %v1169_v22 = vrot.slane %v1161_v14, %v4678_v44  ;;  %v1176_v23 = vrot.slane %v1162_v15, %v4678_v44  ;;  %v1185_v25 = vrot.slane %v1177_v16, %v4678_v44  ;;  %v1192_v26 = vrot.slane %v1178_v17, %v4678_v44 }
 0x3de   : > { %v1479_v27 = vrot.slane %v1471_v18, %v4678_v44  ;;  %v1486_v28 = vrot.slane %v1472_v19, %v4678_v44  ;;  %v1495_v29 = vrot.slane %v1487_v20, %v4678_v44  ;;  %v1502_v30 = vrot.slane %v1488_v21, %v4678_v44 }
 0x3df   : > { %v1193_v31 = vcombine.low %v1169_v22, %v1185_v25  ;;  %v1194_v32 = vcombine.high %v1169_v22, %v1185_v25  ;;  %v1195_v33 = vcombine.low %v1176_v23, %v1192_v26  ;;  %v1196_v34 = vcombine.high %v1176_v23, %v1192_v26 }
 0x3e0   : > { %v1507_v35 = vcombine.low %v1479_v27, %v1486_v28  ;;  %v2818_v36 = vcombine.high %v1479_v27, %v1486_v28  ;;  %v1523_v37 = vcombine.low %v1495_v29, %v1502_v30  ;;  %v2819_v39 = vcombine.high %v1495_v29, %v1502_v30  ;;  %v1214_v15 = vpop.permute.xlu0 %1213 }
 0x3e1   : > { %v1197_v40 = vpack.c.bf16 %v1193_v31, %v1193_v31  ;;  %v1198_v41 = vpack.c.bf16 %v1194_v32, %v1194_v32  ;;  %v1199_v42 = vpack.c.bf16 %v1195_v33, %v1195_v33  ;;  %v1200_v43 = vpack.c.bf16 %v1196_v34, %v1196_v34 }
 0x3e2   : > { %v1514_v45 = vrot.slane %v1507_v35, %v4676_v38  ;;  %v1522_v46 = vrot.slane %v2818_v36, %v4676_v38  ;;  %v1530_v47 = vrot.slane %v1523_v37, %v4676_v38  ;;  %v1538_v48 = vrot.slane %v2819_v39, %v4676_v38 }
 0x3e3   : > { %1202 = vst.msk [vmem:[#allocation2] sm:$0xf] %vm1201_vm2, %v1197_v40  ;;  %1203 = vst.msk [vmem:[#allocation2 + $0x4] sm:$0xf] %vm1201_vm2, %v1198_v41  ;;  %v1216_v13 = vcombine.low %v4671_v24, %v1211_v12  ;;  %v1217_v14 = vcombine.high %v4671_v24, %v1211_v12  ;;  %v1232_v16 = vcombine.low %v1208_v11, %v1214_v15 }
 0x3e4   : > { %1204 = vst.msk [vmem:[#allocation2 + $0x8] sm:$0xf] %vm1201_vm2, %v1199_v42  ;;  %1205 = vst.msk [vmem:[#allocation2 + $0xc] sm:$0xf] %vm1201_vm2, %v1200_v43  ;;  %v1539_v49 = vcombine.low %v1514_v45, %v1522_v46  ;;  %v1555_v50 = vcombine.low %v1530_v47, %v1538_v48  ;;  %v1540_v57 = vcombine.high %v1514_v45, %v1522_v46 }
 0x3e5   : > { %v1556_v58 = vcombine.high %v1530_v47, %v1538_v48  ;;  %v1233_v17 = vcombine.high %v1208_v11, %v1214_v15  ;;  %v1224_v18 = vrot.slane %v1216_v13, %v4676_v38  ;;  %v1231_v19 = vrot.slane %v1217_v14, %v4676_v38 }
 0x3e6   : > { %v1547_v51 = vrot.slane %v1539_v49, %v4678_v44  ;;  %v1563_v52 = vrot.slane %v1555_v50, %v4678_v44  ;;  %v1554_v2 = vrot.slane %v1540_v57, %v4678_v44  ;;  %v1240_v20 = vrot.slane %v1232_v16, %v4676_v38 }
 0x3e7   : > { %v1570_v3 = vrot.slane %v1556_v58, %v4678_v44  ;;  %v1247_v21 = vrot.slane %v1233_v17, %v4676_v38 }
 0x3e8   : > { %v1571_v59 = vcombine.low %v1547_v51, %v1563_v52  ;;  %v1572_v60 = vcombine.high %v1547_v51, %v1563_v52  ;;  %v1248_v22 = vcombine.low %v1224_v18, %v1240_v20  ;;  %v1249_v23 = vcombine.high %v1224_v18, %v1240_v20 }
 0x3e9   : > { %v1573_v6 = vcombine.low %v1554_v2, %v1570_v3  ;;  %v1574_v8 = vcombine.high %v1554_v2, %v1570_v3  ;;  %v1264_v25 = vcombine.low %v1231_v19, %v1247_v21  ;;  %v1265_v26 = vcombine.high %v1231_v19, %v1247_v21 }
 0x3ea   : > { %v1579_v53 = vld [vmem:[#allocation2] sm:$0xf]  ;;  %v1580_v54 = vld [vmem:[#allocation2 + $0x4] sm:$0xf]  ;;  %v1575_v63 = vpack.c.bf16 %v1571_v59, %v1571_v59  ;;  %v1576_v1 = vpack.c.bf16 %v1572_v60, %v1572_v60  ;;  %v1256_v27 = vrot.slane %v1248_v22, %v4678_v44  ;;  %v1263_v28 = vrot.slane %v1249_v23, %v4678_v44 }
 0x3eb   : > { %v1599_v55 = vsel %vm1594_vm3, %v1579_v53, 0  ;;  %v1645_v56 = vsel %vm1594_vm3, %v1580_v54, 0  ;;  %v1581_v61 = vld [vmem:[#allocation2 + $0x8] sm:$0xf]  ;;  %v1582_v62 = vld [vmem:[#allocation2 + $0xc] sm:$0xf]  ;;  %v1577_v9 = vpack.c.bf16 %v1573_v6, %v1573_v6  ;;  %v1578_v10 = vpack.c.bf16 %v1574_v8, %v1574_v8 }
 0x3ec   : > { %2914 = vmatpush3.bf16.xpose.msra.mxu1 %v1599_v55  ;;  %2920 = vmatpush3.bf16.xpose.msra.mxu0 %v1645_v56  ;;  %v1691_v4 = vsel %vm1594_vm3, %v1581_v61, 0  ;;  %v1737_v5 = vsel %vm1594_vm3, %v1582_v62, 0  ;;  %v1272_v24 = vrot.slane %v1264_v25, %v4678_v44  ;;  %v1279_v29 = vrot.slane %v1265_v26, %v4678_v44  ;;  %v2820_v60 = vld [vmem:[%s769_s24] ss:$0 sm:$0xff] }
 0x3ed   : > { %2925 = vmatprep.subr.bf16.mxu1 %v3955_v0  ;;  %2931 = vmatprep.subr.bf16.mxu0 %v3955_v0  ;;  %v1284_v30 = vcombine.low %v1256_v27, %v1263_v28  ;;  %v2812_v31 = vcombine.high %v1256_v27, %v1263_v28 }
 0x3ee   : > { %v1300_v32 = vcombine.low %v1272_v24, %v1279_v29  ;;  %v2813_v33 = vcombine.high %v1272_v24, %v1279_v29 }
 0x3ef   : > { %v1291_v34 = vrot.slane %v1284_v30, %v4676_v38  ;;  %v1299_v35 = vrot.slane %v2812_v31, %v4676_v38 }
 0x3f0   : > { %v1307_v36 = vrot.slane %v1300_v32, %v4676_v38  ;;  %v1315_v37 = vrot.slane %v2813_v33, %v4676_v38 }
 0x3f1   : > { %v1316_v39 = vcombine.low %v1291_v34, %v1299_v35  ;;  %v1317_v40 = vcombine.high %v1291_v34, %v1299_v35 }
 0x3f2   : > { %v1332_v41 = vcombine.low %v1307_v36, %v1315_v37  ;;  %v1333_v42 = vcombine.high %v1307_v36, %v1315_v37 }
 0x3f3   : > { %2916 = vmatmul.mubr.msk.bf16.vlgmr.msra.gmra.mrb[4].mxu1 %vm1594_vm3, %v1575_v63  ;;  %2922 = vmatmul.mubr.msk.bf16.vlgmr.msra.gmra.mrb[8].mxu0 %vm1594_vm3, %v1576_v1  ;;  %v1324_v43 = vrot.slane %v1316_v39, %v4678_v44  ;;  %v1331_v45 = vrot.slane %v1317_v40, %v4678_v44 }
 0x3f4   : > { %2926 = vmatpush3.bf16.xpose.msra.mxu1 %v1691_v4  ;;  %2932 = vmatpush3.bf16.xpose.msra.mxu0 %v1737_v5  ;;  %v1340_v46 = vrot.slane %v1332_v41, %v4678_v44  ;;  %v1347_v47 = vrot.slane %v1333_v42, %v4678_v44 }
 0x3f5   : > { %2927 = vmatprep.mubr.msk.bf16.mxu1 %vm3956_vm0, %v3955_v0  ;;  %2933 = vmatprep.mubr.msk.bf16.mxu0 %vm3956_vm0, %v3955_v0 }
 0x3f6   : > { %2937 = vmatprep.subr.bf16.mxu1 %v3955_v0  ;;  %2943 = vmatprep.subr.bf16.mxu0 %v3955_v0  ;;  %v1348_v48 = vcombine.low %v1324_v43, %v1340_v46  ;;  %v1349_v49 = vcombine.high %v1324_v43, %v1340_v46  ;;  %v1350_v50 = vcombine.low %v1331_v45, %v1347_v47 }
 0x3f7   : > { %v1351_v51 = vcombine.high %v1331_v45, %v1347_v47 }
 0x3f8   : > { %v1352_v52 = vpack.c.bf16 %v1348_v48, %v1348_v48  ;;  %v1353_v53 = vpack.c.bf16 %v1349_v49, %v1349_v49  ;;  %v1354_v54 = vpack.c.bf16 %v1350_v50, %v1350_v50 }
 0x3f9   : > { %v1355_v55 = vpack.c.bf16 %v1351_v51, %v1351_v51 }
 0x3fa   : > { %1356 = vst.msk [vmem:[#allocation3] sm:$0xf] %vm1201_vm2, %v1352_v52  ;;  %1357 = vst.msk [vmem:[#allocation3 + $0x4] sm:$0xf] %vm1201_vm2, %v1353_v53 }
 0x3fb   : > { %2928 = vmatmul.mubr.msk.bf16.vlgmr.msra.gmra.mrb[8].mxu1 %vm1594_vm3, %v1577_v9  ;;  %2934 = vmatmul.mubr.msk.bf16.vlgmr.msra.gmra.mrb[12].mxu0 %vm1594_vm3, %v1578_v10  ;;  %1358 = vst.msk [vmem:[#allocation3 + $0x8] sm:$0xf] %vm1201_vm2, %v1354_v54  ;;  %1359 = vst.msk [vmem:[#allocation3 + $0xc] sm:$0xf] %vm1201_vm2, %v1355_v55 }
 0x3fc   : > { %2939 = vmatprep.mubr.msk.bf16.mxu1 %vm3956_vm0, %v3955_v0  ;;  %2945 = vmatprep.mubr.msk.bf16.mxu0 %vm3956_vm0, %v3955_v0 }
 0x401   : > { %v1583_v56 = vld [vmem:[#allocation3] sm:$0xf]  ;;  %v1584_v57 = vld [vmem:[#allocation3 + $0x4] sm:$0xf] }
 0x402   : > { %v1844_v58 = vsel %vm1842_vm4, %v1583_v56, 0  ;;  %v1890_v59 = vsel %vm1842_vm4, %v1584_v57, 0  ;;  %v1585_v36 = vld [vmem:[#allocation3 + $0x8] sm:$0xf]  ;;  %v1586_v41 = vld [vmem:[#allocation3 + $0xc] sm:$0xf] }
 0x403   : > { %2938 = vmatpush3.bf16.msra.mxu1 %v1844_v58  ;;  %2944 = vmatpush3.bf16.msra.mxu0 %v1890_v59  ;;  %v1936_v45 = vsel %vm1842_vm4, %v1585_v36, 0  ;;  %v1982_v46 = vsel %vm1842_vm4, %v1586_v41, 0 }
 0x404   : > { %2949 = vmatprep.subr.bf16.mxu1 %v3955_v0  ;;  %2955 = vmatprep.subr.bf16.mxu0 %v3955_v0 }
 0x4c6   : > { %v1635_v61 = vpop.f32.mrb[4].mxu1  ;;  %v1681_v62 = vpop.f32.mrb[8].mxu0 }
 0x4c7   : > { %v1636_v63 = vadd.f32 %v2820_v60, %v1635_v61  ;;  %v1682_v1 = vadd.f32 %v2820_v60, %v1681_v62  ;;  %v2917_v2 = vpop.f32.mrb[5].mxu1  ;;  %v2923_v3 = vpop.f32.mrb[9].mxu0 }
 0x4c8   : > { %v1638_v4 = vpop.f32.mrb[6].mxu1  ;;  %v1684_v5 = vpop.f32.mrb[10].mxu0 }
 0x4c9   : > { %v2918_v6 = vpop.f32.mrb[7].mxu1  ;;  %v2924_v8 = vpop.f32.mrb[11].mxu0  ;;  %v1779_v9 = vsel %vm1594_vm3, %v1636_v63, -inf  ;;  %v1782_v10 = vsel %vm1594_vm3, %v1682_v1, -inf }
 0x4ca   : > { %1780 = vmax.xlane.f32.xlu1 %v1779_v9  ;;  %1783 = vmax.xlane.f32.xlu0 %v1782_v10 }
 0x4ce   : > { %v1727_v11 = vpop.f32.mrb[8].mxu1  ;;  %v1773_v12 = vpop.f32.mrb[12].mxu0 }
 0x4cf   : > { %v1728_v13 = vadd.f32 %v2820_v60, %v1727_v11  ;;  %v1774_v14 = vadd.f32 %v2820_v60, %v1773_v12  ;;  %v2929_v15 = vpop.f32.mrb[9].mxu1  ;;  %v2935_v16 = vpop.f32.mrb[13].mxu0 }
 0x4d0   : > { %v1730_v17 = vpop.f32.mrb[10].mxu1  ;;  %v1776_v18 = vpop.f32.mrb[14].mxu0 }
 0x4d1   : > { %v2930_v19 = vpop.f32.mrb[11].mxu1  ;;  %v2936_v20 = vpop.f32.mrb[15].mxu0  ;;  %v1785_v21 = vsel %vm1594_vm3, %v1728_v13, -inf  ;;  %v1788_v22 = vsel %vm1594_vm3, %v1774_v14, -inf }
 0x4d2   : > { %1786 = vmax.xlane.f32.xlu0 %v1785_v21  ;;  %1789 = vmax.xlane.f32.xlu1 %v1788_v22 }
 0x557   : > { %v1781_v23 = vpop.xlane.xlu1 %1780  ;;  %v1784_v25 = vpop.xlane.xlu0 %1783 }
 0x558   : > { %v1803_v26 = vsub.f32 %v1636_v63, %v1781_v23  ;;  %v1804_v27 = vsub.f32 %v1682_v1, %v1784_v25  ;;  %v1791_v53 = vsub.f32 -inf, %v1781_v23  ;;  %v1792_v54 = vsub.f32 -inf, %v1784_v25 }
 0x55a   : > { %v1807_v28 = vmul.f32 1.442695, %v1803_v26  ;;  %v1809_v24 = vmul.f32 1.442695, %v1804_v27  ;;  %v1795_v55 = vmul.f32 1.442695, %v1791_v53 }
 0x55b   : > { %v1797_v56 = vmul.f32 1.442695, %v1792_v54 }
 0x55c   : > { %3248 = vpow2.f32 %v1807_v28 }
 0x55d   : > { %3250 = vpow2.f32 %v1809_v24 }
 0x55f   : > { %v1787_v29 = vpop.xlane.xlu0 %1786  ;;  %v1790_v30 = vpop.xlane.xlu1 %1789 }
 0x560   : > { %v1805_v31 = vsub.f32 %v1728_v13, %v1787_v29  ;;  %v1806_v32 = vsub.f32 %v1774_v14, %v1790_v30  ;;  %v1793_v57 = vsub.f32 -inf, %v1787_v29  ;;  %v1794_v58 = vsub.f32 -inf, %v1790_v30 }
 0x562   : > { %v1811_v33 = vmul.f32 1.442695, %v1805_v31  ;;  %v1813_v34 = vmul.f32 1.442695, %v1806_v32  ;;  %v1799_v59 = vmul.f32 1.442695, %v1793_v57 }
 0x563   : > { %v1801_v60 = vmul.f32 1.442695, %v1794_v58  ;;  %v3240_v57 = vld [vmem:[#allocation19] sm:$0xff]  }
 0x564   : > { %3252 = vpow2.f32 %v1811_v33 }
 0x565   : > { %3254 = vpow2.f32 %v1813_v34 }
 0x566   : > { %v3249_v35 = vpop.eup %3248  ;;  %3256 = vpow2.f32 %v1795_v55 }
 0x567   : > { %v1819_v37 = vsel %vm1594_vm3, %v3249_v35, 0.0  ;;  %v1835_v39 = vpack.c.bf16 %v3249_v35, %v3249_v35  ;;  %v3251_v40 = vpop.eup %3250  ;;  %3258 = vpow2.f32 %v1797_v56 }
 0x568   : > { %1820 = vadd.xlane.f32.xlu0 %v1819_v37  ;;  %v1822_v42 = vsel %vm1594_vm3, %v3251_v40, 0.0  ;;  %v1836_v43 = vpack.c.bf16 %v3251_v40, %v3251_v40  ;;  %3260 = vpow2.f32 %v1799_v59 }
 0x569   : > { %2940 = vmatmul.mubr.msk.bf16.vlgmr.msra.gmra.mrb[12].mxu1 %vm1594_vm3, %v1835_v39  ;;  %1823 = vadd.xlane.f32.xlu1 %v1822_v42  ;;  %3262 = vpow2.f32 %v1801_v60 }
 0x56a   : > { %2950 = vmatpush3.bf16.msra.mxu1 %v1936_v45  ;;  %2946 = vmatmul.mubr.msk.bf16.vlgmr.msra.gmra.mrb[16].mxu0 %vm1594_vm3, %v1836_v43 }
 0x56b   : > { %2951 = vmatprep.mubr.msk.bf16.mxu1 %vm3956_vm0, %v3955_v0  ;;  %2956 = vmatpush3.bf16.msra.mxu0 %v1982_v46 }
 0x56c   : > { %2957 = vmatprep.mubr.msk.bf16.mxu0 %vm3956_vm0, %v3955_v0  ;;  %2961 = vmatprep.subr.bf16.mxu1 %v3955_v0 }
 0x56d   : > { %2969 = vmatprep.subr.bf16.mxu0 %v3955_v0 }
 0x56e   : > { %v3253_v47 = vpop.eup %3252 }
 0x56f   : > { %v1825_v48 = vsel %vm1594_vm3, %v3253_v47, 0.0  ;;  %v1837_v49 = vpack.c.bf16 %v3253_v47, %v3253_v47  ;;  %v3255_v50 = vpop.eup %3254 }
 0x570   : > { %1826 = vadd.xlane.f32.xlu0 %v1825_v48  ;;  %v1828_v51 = vsel %vm1594_vm3, %v3255_v50, 0.0  ;;  %v1838_v52 = vpack.c.bf16 %v3255_v50, %v3255_v50  ;;  %v3257_v61 = vpop.eup %3256 }
 0x571   : > { %2952 = vmatmul.mubr.msk.bf16.vlgmr.msra.gmra.mrb[16].mxu1 %vm1594_vm3, %v1837_v49  ;;  %1829 = vadd.xlane.f32.xlu1 %v1828_v51  ;;  %v3259_v62 = vpop.eup %3258  ;;  %v1815_v1 = vmul.f32 0.0, %v3257_v61 }
 0x572   : > { %2965 = vmatprep.mubr.msk.bf16.mxu1 %vm3956_vm0, %v3955_v0  ;;  %2958 = vmatmul.mubr.msk.bf16.vlgmr.msra.gmra.mrb[20].mxu0 %vm1594_vm3, %v1838_v52  ;;  %v1816_v4 = vmul.f32 0.0, %v3259_v62  ;;  %v3261_v6 = vpop.eup %3260 }
 0x573   : > { %2973 = vmatprep.mubr.msk.bf16.mxu0 %vm3956_vm0, %v3955_v0  ;;  %v3263_v8 = vpop.eup %3262  ;;  %v1817_v10 = vmul.f32 0.0, %v3261_v6  ;;  %2962 = vmatpush3.bf16.msra.mxu1 %v3240_v57 }
 0x574   : > { %v1818_v13 = vmul.f32 0.0, %v3263_v8  ;;  %2963 = vmatprep.subr.bf16.mxu1 %v3955_v0 }
 0x5f5   : > { %v1821_v63 = vpop.xlane.xlu0 %1820 }
 0x5f6   : > { %v1824_v2 = vpop.xlane.xlu1 %1823  ;;  %v1831_v3 = vadd.f32 %v1821_v63, %v1815_v1 }
 0x5f7   : > { %v1832_v5 = vadd.f32 %v1824_v2, %v1816_v4 }
 0x5f8   : > { %3264 = vrcp.f32 %v1831_v3  ;;  %v3241_v3 = vld [vmem:[#allocation19 + $0x8] sm:$0xff]  }
 0x5f9   : > { %3266 = vrcp.f32 %v1832_v5  ;;  %2964 = vmatpush3.bf16.msra.mxu1 %v3241_v3 }
 0x5fa   : > { %2977 = vmatprep.subr.bf16.mxu1 %v3955_v0 }
 0x5fd   : > { %v1827_v9 = vpop.xlane.xlu0 %1826 }
 0x5fe   : > { %v1830_v11 = vpop.xlane.xlu1 %1829  ;;  %v1833_v12 = vadd.f32 %v1827_v9, %v1817_v10 }
 0x5ff   : > { %v1834_v14 = vadd.f32 %v1830_v11, %v1818_v13 }
 0x600   : > { %3268 = vrcp.f32 %v1833_v12 }
 0x601   : > { %3270 = vrcp.f32 %v1834_v14 }
 0x602   : > { %v3265_v18 = vpop.eup %3264 }
 0x603   : > { %v3267_v26 = vpop.eup %3266 }
 0x60a   : > { %v3269_v32 = vpop.eup %3268 }
 0x60b   : > { %v3271_v40 = vpop.eup %3270 }
 0x63c   : > { %v1880_v15 = vpop.f32.mrb[12].mxu1 }
 0x63d   : > { %v2024_v16 = vadd.f32 %v1880_v15, %v1815_v1  ;;  %v2941_v17 = vpop.f32.mrb[13].mxu1  ;;  %v1926_v19 = vpop.f32.mrb[16].mxu0 }
 0x63e   : > { %v1883_v20 = vpop.f32.mrb[14].mxu1  ;;  %v2025_v22 = vadd.f32 %v1926_v19, %v1816_v4  ;;  %v2947_v23 = vpop.f32.mrb[17].mxu0 }
 0x63f   : > { %v2032_v21 = vmul.f32 %v3265_v18, %v2024_v16  ;;  %v2942_v25 = vpop.f32.mrb[15].mxu1  ;;  %v1929_v27 = vpop.f32.mrb[18].mxu0 }
 0x640   : > { %v2033_v28 = vmul.f32 %v3267_v26, %v2025_v22  ;;  %v2948_v24 = vpop.f32.mrb[19].mxu0  ;;  %v2831_v27 = vld [vmem:[#allocation21] ss:$0 sm:$0xff] }
 0x644   : > { %v1972_v29 = vpop.f32.mrb[16].mxu1 }
 0x645   : > { %v2026_v30 = vadd.f32 %v1972_v29, %v1817_v10  ;;  %v2953_v31 = vpop.f32.mrb[17].mxu1  ;;  %v2018_v33 = vpop.f32.mrb[20].mxu0 }
 0x646   : > { %v1975_v34 = vpop.f32.mrb[18].mxu1  ;;  %v2027_v36 = vadd.f32 %v2018_v33, %v1818_v13  ;;  %v2959_v37 = vpop.f32.mrb[21].mxu0 }
 0x647   : > { %v2034_v35 = vmul.f32 %v3269_v32, %v2026_v30  ;;  %v2954_v39 = vpop.f32.mrb[19].mxu1  ;;  %v2021_v41 = vpop.f32.mrb[22].mxu0 }
 0x648   : > { %v2035_v45 = vmul.f32 %v3271_v40, %v2027_v36  ;;  %v2960_v46 = vpop.f32.mrb[23].mxu0  ;;  %v3242_v40 = vld [vmem:[#allocation25] sm:$0xff]   ;;  %v3243_v41 = vld [vmem:[#allocation25 + $0x8] sm:$0xff]  }
 0x649   : > { %v2036_v42 = vcombine.low %v2032_v21, %v2034_v35  ;;  %v2037_v43 = vcombine.high %v2032_v21, %v2034_v35  ;;  %2970 = vmatpush3.bf16.msra.mxu0 %v3242_v40 }
 0x64a   : > { %v2052_v49 = vcombine.low %v2033_v28, %v2035_v45  ;;  %v2053_v50 = vcombine.high %v2033_v28, %v2035_v45  ;;  %2971 = vmatprep.subr.bf16.mxu0 %v3955_v0 }
 0x64b   : > { %v2044_v47 = vrot.slane %v2036_v42, %v4676_v38  ;;  %v2051_v48 = vrot.slane %v2037_v43, %v4676_v38  ;;  %v3244_v42 = vld [vmem:[#allocation28] sm:$0xff]   ;;  %v3245_v43 = vld [vmem:[#allocation28 + $0x8] sm:$0xff]  }
 0x64c   : > { %v2060_v51 = vrot.slane %v2052_v49, %v4676_v38  ;;  %v2067_v52 = vrot.slane %v2053_v50, %v4676_v38  ;;  %v2836_v50 = vld [vmem:[#allocation24] ss:$0 sm:$0xff] }
 0x64d   : > { %2972 = vmatpush3.bf16.msra.mxu0 %v3243_v41 }
 0x64e   : > { %v2068_v53 = vcombine.low %v2044_v47, %v2060_v51  ;;  %v2069_v54 = vcombine.high %v2044_v47, %v2060_v51  ;;  %v2084_v55 = vcombine.low %v2051_v48, %v2067_v52  ;;  %v2085_v56 = vcombine.high %v2051_v48, %v2067_v52  ;;  %v2835_v48 = vld [vmem:[#allocation22] ss:$0 sm:$0xff] }
 0x650   : > { %v2076_v58 = vrot.slane %v2068_v53, %v4678_v44  ;;  %v2083_v59 = vrot.slane %v2069_v54, %v4678_v44  ;;  %v2092_v60 = vrot.slane %v2084_v55, %v4678_v44  ;;  %v2099_v61 = vrot.slane %v2085_v56, %v4678_v44  ;;  %v3246_v54 = vld [vmem:[#allocation28 + $0x10] sm:$0xff]   ;;  %v3247_v55 = vld [vmem:[#allocation28 + $0x18] sm:$0xff]  }
 0x651   : > { %v2837_v56 = vld [vmem:[#allocation27] ss:$0 sm:$0xff] }
 0x652   : > { %v2104_v62 = vcombine.low %v2076_v58, %v2083_v59  ;;  %v2829_v63 = vcombine.high %v2076_v58, %v2083_v59  ;;  %v2120_v1 = vcombine.low %v2092_v60, %v2099_v61  ;;  %v2830_v2 = vcombine.high %v2092_v60, %v2099_v61 }
 0x654   : > { %v2111_v4 = vrot.slane %v2104_v62, %v4676_v38  ;;  %v2119_v5 = vrot.slane %v2829_v63, %v4676_v38  ;;  %v2127_v6 = vrot.slane %v2120_v1, %v4676_v38  ;;  %v2135_v8 = vrot.slane %v2830_v2, %v4676_v38  ;;  %v2841_v1 = vld [vmem:[#allocation30] ss:$0 sm:$0xff] }
 0x656   : > { %v2137_v9 = vcombine.high %v2111_v4, %v2119_v5  ;;  %v2153_v10 = vcombine.high %v2127_v6, %v2135_v8  ;;  %v2136_v11 = vcombine.low %v2111_v4, %v2119_v5  ;;  %v2152_v12 = vcombine.low %v2127_v6, %v2135_v8 }
 0x658   : > { %v2151_v13 = vrot.slane %v2137_v9, %v4678_v44  ;;  %v2167_v14 = vrot.slane %v2153_v10, %v4678_v44  ;;  %v2144_v15 = vrot.slane %v2136_v11, %v4678_v44  ;;  %v2160_v16 = vrot.slane %v2152_v12, %v4678_v44 }
 0x65a   : > { %v2170_v17 = vcombine.low %v2151_v13, %v2167_v14  ;;  %v2169_v18 = vcombine.high %v2144_v15, %v2160_v16  ;;  %v2171_v19 = vcombine.high %v2151_v13, %v2167_v14  ;;  %v2168_v20 = vcombine.low %v2144_v15, %v2160_v16 }
 0x65c   : > { %2177 = vrot.lane.b32.xlu1 %v2170_v17, %s3962_s7  ;;  %2173 = vrot.lane.b32.xlu0 %v2169_v18, %s3963_s27  ;;  %v2847_v18 = vld [vmem:[#allocation31] ss:$0 sm:$0xff] }
 0x660   : > { %2181 = vrot.lane.b32.xlu1 %v2171_v19, %s3964_s4 }
 0x6ce   : > { %v2178_v38 = vpop.permute.xlu1 %2177  ;;  %v2174_v21 = vpop.permute.xlu0 %2173 }
 0x6cf   : > { %v2184_v22 = vsel %vm1594_vm3, %v2168_v20, %v2174_v21  ;;  %v2848_v20 = vld [vmem:[#allocation33] ss:$0 sm:$0xff] }
 0x6d0   : > { %v2186_v25 = vsel %vm2185_vm5, %v2184_v22, %v2178_v38 }
 0x6d2   : > { %v2182_v23 = vpop.permute.xlu1 %2181 }
 0x6d3   : > { %v2188_v26 = vsel %vm2187_vm6, %v2186_v25, %v2182_v23 }
 0x6d4   : > { %v2189_v44 = vpack.c.bf16 %v2188_v26, %v2188_v26 }
 0x6d6   : > { %2966 = vmatmul.mubr.msk.bf16.vlgmr.msra.gmra.mrb[20].mxu1 %vm944_vm1, %v2189_v44 }
 0x6d7   : > { %2985 = vmatprep.mubr.msk.bf16.mxu1 %vm3956_vm0, %v3955_v0  ;;  %2978 = vmatpush3.bf16.msra.mxu1 %v3244_v42 }
 0x6d8   : > { %2979 = vmatprep.subr.bf16.mxu1 %v3955_v0 }
 0x6db   : > { %2980 = vmatpush3.bf16.msra.mxu1 %v3245_v43 }
 0x6dc   : > { %2981 = vmatprep.subr.bf16.mxu1 %v3955_v0 }
 0x6df   : > { %2982 = vmatpush3.bf16.msra.mxu1 %v3246_v54 }
 0x6e0   : > { %2983 = vmatprep.subr.bf16.mxu1 %v3955_v0 }
 0x6e3   : > { %2984 = vmatpush3.bf16.msra.mxu1 %v3247_v55 }
 0x7a9   : > { %v2250_v28 = vpop.f32.mrb[20].mxu1 }
 0x7aa   : > { %v2251_v24 = vadd.f32 %v2831_v27, %v2250_v28  ;;  %v2967_v29 = vpop.f32.mrb[21].mxu1 }
 0x7ab   : > { %v2253_v30 = vpop.f32.mrb[22].mxu1 }
 0x7ac   : > { %v2968_v31 = vpop.f32.mrb[23].mxu1  ;;  %v2256_v32 = vadd.f32 %v2251_v24, %v4649_v7 }
 0x7ae   : > { %v2259_v33 = vsel %vm944_vm1, %v2256_v32, 0.0 }
 0x7af   : > { %2260 = vadd.xlane.f32.xlu0 %v2259_v33 }
 0x83c   : > { %v2261_v34 = vpop.xlane.xlu0 %2260 }
 0x83d   : > { %v2263_v35 = vmul.f32 0.03125, %v2261_v34 }
 0x83f   : > { %v2264_v36 = vsub.f32 %v2256_v32, %v2263_v35 }
 0x841   : > { %v2265_v37 = vmul.f32 %v2264_v36, %v2264_v36 }
 0x843   : > { %v2266_v39 = vsel %vm944_vm1, %v2265_v37, 0.0 }
 0x844   : > { %2267 = vadd.xlane.f32.xlu1 %v2266_v39 }
 0x8d1   : > { %v2268_v7 = vpop.xlane.xlu1 %2267 }
 0x8d2   : > { %v2269_v45 = vmul.f32 0.03125, %v2268_v7 }
 0x8d4   : > { %v2270_v46 = vadd.f32 1e-05, %v2269_v45 }
 0x8d6   : > { %3272 = vrsqrt.f32 %v2270_v46 }
 0x8e0   : > { %v3273_v47 = vpop.eup %3272 }
 0x8e1   : > { %v2272_v49 = vmul.f32 %v3273_v47, %v2264_v36 }
 0x8e3   : > { %v2279_v51 = vmul.f32 %v2835_v48, %v2272_v49 }
 0x8e5   : > { %v2286_v52 = vadd.f32 %v2836_v50, %v2279_v51 }
 0x8e7   : > { %v2287_v53 = vpack.c.bf16 %v2286_v52, %v2286_v52 }
 0x8e9   : > { %2974 = vmatmul.mubr.msk.bf16.vlgmr.msra.gmra.mrb[24].mxu0 %vm944_vm1, %v2287_v53 }
 0x9bc   : > { %v2348_v57 = vpop.f32.mrb[24].mxu0 }
 0x9bd   : > { %v2349_v58 = vadd.f32 %v2837_v56, %v2348_v57  ;;  %v2975_v59 = vpop.f32.mrb[25].mxu0 }
 0x9be   : > { %v2351_v60 = vpop.f32.mrb[26].mxu0 }
 0x9bf   : > { %v2354_v61 = vmax.f32 %v2349_v58, 0.0  ;;  %v2976_v62 = vpop.f32.mrb[27].mxu0 }
 0x9c1   : > { %v2355_v63 = vpack.c.bf16 %v2354_v61, %v2354_v61 }
 0x9c3   : > { %2986 = vmatmul.mubr.msk.bf16.vlgmr.msra.gmra.mrb[24].mxu1 %vm2395_vm7, %v2355_v63 }
 0xa96   : > { %v2433_v2 = vpop.f32.mrb[24].mxu1 }
 0xa97   : > { %v2434_v3 = vadd.f32 %v2841_v1, %v2433_v2  ;;  %v2987_v4 = vpop.f32.mrb[25].mxu1 }
 0xa98   : > { %v2436_v5 = vpop.f32.mrb[26].mxu1 }
 0xa99   : > { %v2988_v6 = vpop.f32.mrb[27].mxu1  ;;  %v2439_v8 = vadd.f32 %v2434_v3, %v2286_v52 }
 0xa9b   : > { %v2442_v0 = vsel %vm944_vm1, %v2439_v8, 0.0 }
 0xa9c   : > { %2443 = vadd.xlane.f32.xlu0 %v2442_v0 }
 0xb29   : > { %v2444_v9 = vpop.xlane.xlu0 %2443 }
 0xb2a   : > { %v2445_v10 = vmul.f32 0.03125, %v2444_v9 }
 0xb2c   : > { %v2446_v11 = vsub.f32 %v2439_v8, %v2445_v10 }
 0xb2e   : > { %v2447_v12 = vmul.f32 %v2446_v11, %v2446_v11 }
 0xb30   : > { %v2448_v13 = vsel %vm944_vm1, %v2447_v12, 0.0 }
 0xb31   : > { %2449 = vadd.xlane.f32.xlu0 %v2448_v13 }
 0xbbe   : > { %v2450_v14 = vpop.xlane.xlu0 %2449 }
 0xbbf   : > { %v2451_v15 = vmul.f32 0.03125, %v2450_v14 }
 0xbc1   : > { %v2452_v16 = vadd.f32 1e-05, %v2451_v15 }
 0xbc3   : > { %3274 = vrsqrt.f32 %v2452_v16 }
 0xbcd   : > { %v3275_v17 = vpop.eup %3274 }
 0xbce   : > { %v2454_v19 = vmul.f32 %v3275_v17, %v2446_v11 }
 0xbd0   : > { %v2461_v38 = vmul.f32 %v2847_v18, %v2454_v19 }
 0xbd2   : > { %v2468_v21 = vadd.f32 %v2848_v20, %v2461_v38 }
 0xbd4   : > { %2469 = vst.msk [vmem:[%s914_s10] sm:$0xff] %vm944_vm1, %v2468_v21 }
 0xbd5   : > { %3827 = shalt.err (!%p3824_p11)
}
 0xbd6   : > { %s3828_s13 = scalar_lea.hbm %s4828_s5, 128  ;;  %s3832_s27 = scalar_lea.hbm %s5008_s12, 256 }
 0xbd7   : > { %p3829_p1 = scmp.ne.s32.totalorder %s4828_s5, %s3828_s13  ;;  %p3833_p12 = scmp.lt.u32.totalorder %s4828_s5, %s5008_s12 }
 0xbd8   : > { %p3834_p7 = scmp.lt.u32.totalorder %s3832_s27, %s3828_s13  ;;  %p3836_p13 = scmp.lt.u32.totalorder %s3828_s13, %s4828_s5 }
 0xbd9   : > { %p3830_p5 = pnand %p3829_p1, %p5009_p2 }
 0xbda   : > { %p3835_p3 = por %p3834_p7, %p3833_p12 }
 0xbdb   : > { %p3831_p0 = pneg %p3830_p5 }
 0xbdc   : > { %p3837_p4 = por %p3836_p13, %p3835_p3 }
 0xbde   : > { %p3838_p8 = pnand %p3837_p4, %p3831_p0 }
 0xbe0   : > { %3841 = shalt.err (!%p3838_p8)
}
 0xbe1   : > { %3059 = dma.vmem_to_hbm [thread:$0]  (%p5009_p2), %s4830_s3, 128, %s4828_s5, %s2471_s23  }
 0xbe2 PF: > { %s2497_s8 = sand.u32 1, %s3912_s0   ;;  %p5010_p6 = scmp.ne.s32.totalorder %s4969_s25, 0 }
 0xbe3   : > { %p5011_p9 = scmp.ge.s32.totalorder %s3932_s22, 2  ;;  %s2498_s10 = scalar_lea.sflag [#allocation6], %s2497_s8 }
 0xbe5   : > { %p3121_p10 = pnand %p5011_p9, %p5010_p6 }
 0xbe7   : > { %3907 = dma.done.wait (!%p3121_p10), %s2498_s10, 128  }
 0xbe8   : > { %3909 = vsyncadd (!%p3121_p10), %s2498_s10, 4294967168  ;;  %s46_s22 = sadd.s32 1, %s3932_s22   ;;  %s5012_s28 = sld [smem:[#allocation48_spill]] }
 0xbe9   : > { %p43_p11 = scmp.ge.s32.totalorder %s46_s22, 4   ;;  %s5013_s0 = smov %s3916_s30 }
 0xbea   : > { %s5014_s30 = smov %s3920_s20  ;;  %s5015_s20 = smov %s4328_s14 }
 0xbeb   : > { %s5016_s21 = smov %s3928_s1  ;;  %45 = sbr.rel (!%p43_p11) target bundleno = 37 (0x25), region = 233 }
 0xbee   : > { %s5017_s1 = smov %s5012_s28 }
 0xbf2   :  { %2503 = vsyncpa [#allocation5], 1 }
 0xbf3   :  { %2505 = vsyncpa [#allocation5 + $0x1], 1 }
 0xbf4   :  { %2506 = vsyncpa [#allocation8], 1 }
 0xbf5   :  { %2508 = vsyncpa [#allocation8 + $0x1], 1 }
 0xbf6   :  { %2509 = vsyncpa [#allocation11], 1 }
 0xbf7   :  { %2510 = vsyncpa [#allocation14], 1 }
 0xbf8   :  { %2511 = vsyncpa [#allocation17], 1 }
 0xbf9   :  { %2512 = vsyncpa [#allocation20], 1 }
 0xbfa   :  { %2513 = vsyncpa [#allocation23], 1 }
 0xbfb   :  { %2514 = vsyncpa [#allocation26], 1 }
 0xbfc   :  { %2515 = vsyncpa [#allocation29], 1 }
 0xbfd   :  { %2516 = vsyncpa [#allocation32], 1 }
 0xbfe   :  { %2517 = vsyncpa [#allocation6], 1 }
 0xbff   :  { %2519 = vsyncpa [#allocation6 + $0x1], 1 }

// kernel: tpu_custom_call.1
= control target key start
LH: loop header
LB: loop body
LE: loop exit
PB: predicated region body
PF: predicated region fallthrough
CT: control target
= control target key end

     0   :  { %s4878_s0 = inlined_call_operand.hbm [shape: f32[2,1,8], index: 0, kind: input, shape index: {}]   ;;  %s4879_s1 = inlined_call_operand.hbm [shape: f32[2,8,32], index: 1, kind: input, shape index: {}]   ;;  %s4880_s2 = inlined_call_operand.hbm [shape: bf16[2,8,32], index: 2, kind: input, shape index: {}]   ;;  %s4881_s3 = inlined_call_operand.hbm [shape: bf16[32,32], index: 3, kind: input, shape index: {}]   ;;  %s4882_s4 = inlined_call_operand.hbm [shape: f32[1,32], index: 4, kind: input, shape index: {}]   ;;  %s4883_s5 = inlined_call_operand.hbm [shape: bf16[32,32], index: 5, kind: input, shape index: {}]   ;;  %s4884_s6 = inlined_call_operand.hbm [shape: f32[1,32], index: 6, kind: input, shape index: {}]   ;;  %s4885_s7 = inlined_call_operand.hbm [shape: bf16[32,32], index: 7, kind: input, shape index: {}]   ;;  %s4886_s8 = inlined_call_operand.hbm [shape: f32[1,32], index: 8, kind: input, shape index: {}]   ;;  %s4887_s9 = inlined_call_operand.hbm [shape: bf16[32,32], index: 9, kind: input, shape index: {}]   ;;  %s4888_s10 = inlined_call_operand.hbm [shape: f32[1,32], index: 10, kind: input, shape index: {}]   ;;  %s4889_s11 = inlined_call_operand.hbm [shape: f32[1,32], index: 11, kind: input, shape index: {}]   ;;  %s4890_s12 = inlined_call_operand.hbm [shape: f32[1,32], index: 12, kind: input, shape index: {}]   ;;  %s4891_s13 = inlined_call_operand.hbm [shape: bf16[32,64], index: 13, kind: input, shape index: {}]   ;;  %s4892_s14 = inlined_call_operand.hbm [shape: f32[1,64], index: 14, kind: input, shape index: {}]   ;;  %s4893_s15 = inlined_call_operand.hbm [shape: bf16[64,32], index: 15, kind: input, shape index: {}]   ;;  %s4894_s16 = inlined_call_operand.hbm [shape: f32[1,32], index: 16, kind: input, shape index: {}]   ;;  %s4895_s17 = inlined_call_operand.hbm [shape: f32[1,32], index: 17, kind: input, shape index: {}]   ;;  %s4896_s18 = inlined_call_operand.hbm [shape: f32[1,32], index: 18, kind: input, shape index: {}]   ;;  %s4897_s19 = inlined_call_operand.hbm [shape: f32[2,8,32], index: 19, kind: output, shape index: {}]  }
   0x1   :  { %4930 = sst [smem:[#allocation49_spill]] %s4878_s0 }
   0x2   :  { %4931 = sst [smem:[#allocation50_spill]] %s4879_s1 }
   0x3   :  { %4932 = sst [smem:[#allocation51_spill]] %s4880_s2 }
   0x4   :  { %4933 = sst [smem:[#allocation52_spill]] %s4881_s3 }
   0x5   :  { %4934 = sst [smem:[#allocation53_spill]] %s4882_s4 }
   0x6   :  { %4935 = sst [smem:[#allocation54_spill]] %s4883_s5 }
   0x7   :  { %4936 = sst [smem:[#allocation55_spill]] %s4884_s6 }
   0x8   :  { %4937 = sst [smem:[#allocation56_spill]] %s4885_s7 }
   0x9   :  { %4938 = sst [smem:[#allocation57_spill]] %s4886_s8 }
   0xa   :  { %4939 = sst [smem:[#allocation58_spill]] %s4887_s9 }
   0xb   :  { %4940 = sst [smem:[#allocation59_spill]] %s4888_s10 }
   0xc   :  { %4941 = sst [smem:[#allocation60_spill]] %s4889_s11 }
   0xd   :  { %4942 = sst [smem:[#allocation61_spill]] %s4890_s12 }
   0xe   :  { %4943 = sst [smem:[#allocation62_spill]] %s4891_s13 }
   0xf   :  { %4944 = sst [smem:[#allocation63_spill]] %s4892_s14 }
  0x10   :  { %4945 = sst [smem:[#allocation64_spill]] %s4893_s15 }
  0x11   :  { %4946 = sst [smem:[#allocation65_spill]] %s4894_s16 }
  0x12   :  { %4947 = sst [smem:[#allocation66_spill]] %s4895_s17 }
  0x13   :  { %4948 = sst [smem:[#allocation67_spill]] %s4896_s18 }
  0x14   :  { %4949 = sst [smem:[#allocation68_spill]] %s4897_s19 }
  0x15   :  { %24 = vsyncpa [#allocation5], 0 }
  0x16   :  { %26 = vsyncpa [#allocation5 + $0x1], 0 }
  0x17   :  { %27 = vsyncpa [#allocation8], 0 }
  0x18   :  { %29 = vsyncpa [#allocation8 + $0x1], 0 }
  0x19   :  { %30 = vsyncpa [#allocation11], 0 }
  0x1a   :  { %31 = vsyncpa [#allocation14], 0 }
  0x1b   :  { %32 = vsyncpa [#allocation17], 0 }
  0x1c   :  { %33 = vsyncpa [#allocation20], 0 }
  0x1d   :  { %34 = vsyncpa [#allocation23], 0 }
  0x1e   :  { %35 = vsyncpa [#allocation26], 0 }
  0x1f   :  { %36 = vsyncpa [#allocation29], 0 }
  0x20   :  { %37 = vsyncpa [#allocation32], 0 }
  0x21   :  { %38 = vsyncpa [#allocation6], 0 }
  0x22   :  { %40 = vsyncpa [#allocation6 + $0x1], 0  ;;  %s4066_s0 = smov 0   ;;  %s4068_s30 = smov 0  }
  0x23   :  { %s4070_s20 = smov 0   ;;  %s4072_s21 = smov 0  }
  0x24   :  { %s4074_s1 = smov 0   ;;  %s4076_s22 = smov 0  }
  0x25 LB: > { %4950 = sst [smem:[#allocation46_spill]] %s3924_s21  ;;  %s4097_s2 = sadd.s32 4294967295, %s3932_s22   ;;  %s3932_s22 = sphi %s4076_s22, %s46_s22   ;;  %s3928_s1 = sphi %s4074_s1, %s5017_s1   ;;  %s3924_s21 = sphi %s4072_s21, %s5016_s21   ;;  %s3920_s20 = sphi %s4070_s20, %s5015_s20   ;;  %s3916_s30 = sphi %s4068_s30, %s5014_s30   ;;  %s3912_s0 = sphi %s4066_s0, %s5013_s0  }
  0x26   : > { %p2759_p0 = scmp.ge.s32.totalorder %s3932_s22, 1  ;;  %p4911_p1 = scmp.eq.s32.totalorder %s4097_s2, 0 }
  0x27   : > { %p507_p2 = scmp.lt.s32.totalorder %s3932_s22, 3  ;;  %s3934_s24 = smov [#allocation10]  }
  0x28   : > { %s519_s25 = sshll.u32 %s3934_s24, 4  ;;  %s3935_s26 = smov [#allocation13]   ;;  %s4106_s25 = int_to_ptr.vmem [resolvable:$true] %s519_s25 }
  0x29   : > { %p4102_p3 = pnand %p2759_p0, %p507_p2  ;;  %s543_s27 = sshll.u32 %s3935_s26, 4  ;;  %s4117_s27 = int_to_ptr.vmem [resolvable:$true] %s543_s27 }
  0x2a   : > { %s3936_s28 = smov [#allocation16]   ;;  %s4954_s21 = sld [smem:[#allocation52_spill]] }
  0x2b   : > { %s4951_s23 = scalar_select %p4102_p3, 1, 0 }
  0x2c   : > { %p3061_p4 = pneg %p4102_p3  ;;  %s4119_s29 = sshll.u32 %s3936_s28, 4  ;;  %s568_s29 = int_to_ptr.vmem [resolvable:$true] %s4119_s29 }
  0x2d   : > { %4952 = sst [smem:[#allocation47_spill]] %s4951_s23 }
  0x2e   : > { %p4113_p6 = pnand %p3061_p4, %p4911_p1 }
  0x30   : > { %s4953_s3 = scalar_select %p4113_p6, 1, 0 }
  0x31   : > { %s4955_s18 = smov %s4954_s21  ;;  %s3276_s16 = scalar_lea.hbm %s4954_s21, 256 }
  0x32   : > { %p3277_p7 = scmp.ne.s32.totalorder %s4955_s18, %s3276_s16  ;;  %p4129_p8 = pneg %p4113_p6 }
  0x33   : > { %p3283_p11 = scmp.lt.u32.totalorder %s3276_s16, %s4955_s18 }
  0x34   : > { %s4956_s12 = scalar_select %p4129_p8, 1, 0 }
  0x35   : > { %p3279_p9 = pnand %p4129_p8, %p3277_p7 }
  0x37   : > { %p3280_p10 = pneg %p3279_p9 }
  0x39   : > { %p3285_p12 = pnand %p3283_p11, %p3280_p10 }
  0x3b   : > { %3288 = shalt.err (!%p3285_p12)
}
  0x3c   : > { %s3289_s14 = scalar_lea.vmem %s4106_s25, 256  ;;  %p3297_p4 = scmp.lt.s32.totalorder %s4106_s25, %s4106_s25 }
  0x3d   : > { %p3290_p13 = scmp.ne.s32.totalorder %s4106_s25, %s3289_s14  ;;  %p3298_p5 = scmp.lt.s32.totalorder %s3289_s14, %s3289_s14 }
  0x3f   : > { %p3292_p0 = pnand %p3290_p13, %p4129_p8  ;;  %p3299_p7 = por %p3298_p5, %p3297_p4 }
  0x41   : > { %p3293_p2 = pneg %p3292_p0 }
  0x43   : > { %p3300_p9 = pnand %p3299_p7, %p3293_p2 }
  0x45   : > { %3303 = shalt.err (!%p3300_p9)
}
  0x46   : > { %s3937_s19 = smov 64   ;;  %s3938_s16 = smov 4  }
  0x47   : > { %3064 = dma.hbm_to_vmem [thread:$0]  (!%p4113_p6), %s4955_s18, 256, %s4106_s25, [#allocation11], %s3937_s19, %s3937_s19, %s3938_s16  }
  0x48   : > { %s4957_s5 = sld [smem:[#allocation54_spill]] }
  0x4e   : > { %s3304_s28 = scalar_lea.hbm %s4957_s5, 256 }
  0x4f   : > { %p3305_p5 = scmp.ne.s32.totalorder %s4957_s5, %s3304_s28  ;;  %p3311_p12 = scmp.lt.u32.totalorder %s3304_s28, %s4957_s5 }
  0x51   : > { %p3307_p10 = pnand %p3305_p5, %p4129_p8 }
  0x53   : > { %p3308_p11 = pneg %p3307_p10 }
  0x55   : > { %p3313_p13 = pnand %p3311_p12, %p3308_p11 }
  0x57   : > { %3316 = shalt.err (!%p3313_p13)
}
  0x58   : > { %s3317_s25 = scalar_lea.vmem %s4117_s27, 256  ;;  %p3325_p7 = scmp.lt.s32.totalorder %s4117_s27, %s4117_s27 }
  0x59   : > { %p3318_p0 = scmp.ne.s32.totalorder %s4117_s27, %s3317_s25  ;;  %p3326_p9 = scmp.lt.s32.totalorder %s3317_s25, %s3317_s25 }
  0x5b   : > { %p3320_p2 = pnand %p3318_p0, %p4129_p8  ;;  %p3327_p5 = por %p3326_p9, %p3325_p7 }
  0x5d   : > { %p3321_p4 = pneg %p3320_p2 }
  0x5f   : > { %p3328_p10 = pnand %p3327_p5, %p3321_p4 }
  0x61   : > { %3331 = shalt.err (!%p3328_p10)
}
  0x62   : > { %3070 = dma.hbm_to_vmem [thread:$0]  (!%p4113_p6), %s4957_s5, 256, %s4117_s27, [#allocation14], %s3937_s19, %s3937_s19, %s3938_s16  }
  0x63   : > { %s4958_s7 = sld [smem:[#allocation56_spill]] }
  0x69   : > { %s3332_s23 = scalar_lea.hbm %s4958_s7, 256 }
  0x6a   : > { %p3333_p11 = scmp.ne.s32.totalorder %s4958_s7, %s3332_s23  ;;  %p3339_p0 = scmp.lt.u32.totalorder %s3332_s23, %s4958_s7 }
  0x6c   : > { %p3335_p12 = pnand %p3333_p11, %p4129_p8 }
  0x6e   : > { %p3336_p13 = pneg %p3335_p12 }
  0x70   : > { %p3341_p2 = pnand %p3339_p0, %p3336_p13 }
  0x72   : > { %3344 = shalt.err (!%p3341_p2)
}
  0x73   : > { %s3345_s25 = scalar_lea.vmem %s568_s29, 256  ;;  %p3353_p5 = scmp.lt.s32.totalorder %s568_s29, %s568_s29 }
  0x74   : > { %p3346_p4 = scmp.ne.s32.totalorder %s568_s29, %s3345_s25  ;;  %p3354_p10 = scmp.lt.s32.totalorder %s3345_s25, %s3345_s25 }
  0x76   : > { %p3348_p7 = pnand %p3346_p4, %p4129_p8  ;;  %p3355_p1 = por %p3354_p10, %p3353_p5 }
  0x78   : > { %p3349_p9 = pneg %p3348_p7 }
  0x7a   : > { %p3356_p3 = pnand %p3355_p1, %p3349_p9 }
  0x7c   : > { %3359 = shalt.err (!%p3356_p3)
}
  0x7d   : > { %3076 = dma.hbm_to_vmem [thread:$0]  (!%p4113_p6), %s4958_s7, 256, %s568_s29, [#allocation17], %s3937_s19, %s3937_s19, %s3938_s16  }
  0x7e   : > { %s3939_s8 = smov [#allocation19]   ;;  %s3940_s21 = smov [#allocation22]  }
  0x7f   : > { %s591_s10 = sshll.u32 %s3939_s8, 4  ;;  %s616_s23 = sshll.u32 %s3940_s21, 4  ;;  %s592_s10 = int_to_ptr.vmem [resolvable:$true] %s591_s10  ;;  %s617_s23 = int_to_ptr.vmem [resolvable:$true] %s616_s23 }
  0x80   : > { %s4959_s9 = sld [smem:[#allocation58_spill]] }
  0x86   : > { %s3360_s28 = scalar_lea.hbm %s4959_s9, 256 }
  0x87   : > { %p3361_p1 = scmp.ne.s32.totalorder %s4959_s9, %s3360_s28  ;;  %p3367_p12 = scmp.lt.u32.totalorder %s3360_s28, %s4959_s9 }
  0x89   : > { %p3363_p3 = pnand %p3361_p1, %p4129_p8 }
  0x8b   : > { %p3364_p11 = pneg %p3363_p3 }
  0x8d   : > { %p3369_p13 = pnand %p3367_p12, %p3364_p11 }
  0x8f   : > { %3372 = shalt.err (!%p3369_p13)
}
  0x90   : > { %s3373_s29 = scalar_lea.vmem %s592_s10, 256  ;;  %p3381_p7 = scmp.lt.s32.totalorder %s592_s10, %s592_s10 }
  0x91   : > { %p3374_p0 = scmp.ne.s32.totalorder %s592_s10, %s3373_s29  ;;  %p3382_p9 = scmp.lt.s32.totalorder %s3373_s29, %s3373_s29 }
  0x93   : > { %p3376_p2 = pnand %p3374_p0, %p4129_p8  ;;  %p3383_p5 = por %p3382_p9, %p3381_p7 }
  0x95   : > { %p3377_p4 = pneg %p3376_p2 }
  0x97   : > { %p3384_p10 = pnand %p3383_p5, %p3377_p4 }
  0x99   : > { %3387 = shalt.err (!%p3384_p10)
}
  0x9a   : > { %3082 = dma.hbm_to_vmem [thread:$0]  (!%p4113_p6), %s4959_s9, 256, %s592_s10, [#allocation20], %s3937_s19, %s3937_s19, %s3938_s16  }
  0x9b   : > { %s4960_s11 = sld [smem:[#allocation60_spill]] }
  0xa1   : > { %s3388_s24 = scalar_lea.hbm %s4960_s11, 16 }
  0xa2   : > { %p3389_p1 = scmp.ne.s32.totalorder %s4960_s11, %s3388_s24  ;;  %p3395_p12 = scmp.lt.u32.totalorder %s3388_s24, %s4960_s11 }
  0xa4   : > { %p3391_p3 = pnand %p3389_p1, %p4129_p8 }
  0xa6   : > { %p3392_p11 = pneg %p3391_p3 }
  0xa8   : > { %p3397_p13 = pnand %p3395_p12, %p3392_p11 }
  0xaa   : > { %3400 = shalt.err (!%p3397_p13)
}
  0xab   : > { %s3401_s27 = scalar_lea.vmem %s617_s23, 16  ;;  %s3408_s10 = scalar_lea.vmem %s617_s23, 32 }
  0xac   : > { %p3402_p0 = scmp.ne.s32.totalorder %s617_s23, %s3401_s27  ;;  %p3409_p7 = scmp.lt.s32.totalorder %s617_s23, %s617_s23 }
  0xad   : > { %p3410_p9 = scmp.lt.s32.totalorder %s3408_s10, %s3401_s27 }
  0xae   : > { %p3404_p2 = pnand %p3402_p0, %p4129_p8 }
  0xaf   : > { %p3411_p5 = por %p3410_p9, %p3409_p7 }
  0xb0   : > { %p3405_p4 = pneg %p3404_p2 }
  0xb2   : > { %p3412_p10 = pnand %p3411_p5, %p3405_p4 }
  0xb4   : > { %3415 = shalt.err (!%p3412_p10)
}
  0xb5   : > { %3088 = dma.hbm_to_vmem [thread:$0]  (!%p4113_p6), %s4960_s11, 16, %s617_s23, [#allocation23]  }
  0xb6   : > { %s3941_s6 = smov [#allocation25]   ;;  %s3942_s21 = smov [#allocation28]  }
  0xb7   : > { %s637_s8 = sshll.u32 %s3941_s6, 4  ;;  %s661_s24 = sshll.u32 %s3942_s21, 4  ;;  %s638_s8 = int_to_ptr.vmem [resolvable:$true] %s637_s8  ;;  %s662_s24 = int_to_ptr.vmem [resolvable:$true] %s661_s24 }
  0xb8   : > { %s4961_s13 = sld [smem:[#allocation62_spill]] }
  0xbe   : > { %s3416_s14 = scalar_lea.hbm %s4961_s13, 256 }
  0xbf   : > { %p3417_p1 = scmp.ne.s32.totalorder %s4961_s13, %s3416_s14  ;;  %p3423_p12 = scmp.lt.u32.totalorder %s3416_s14, %s4961_s13 }
  0xc1   : > { %p3419_p3 = pnand %p3417_p1, %p4129_p8 }
  0xc3   : > { %p3420_p11 = pneg %p3419_p3 }
  0xc5   : > { %p3425_p13 = pnand %p3423_p12, %p3420_p11 }
  0xc7   : > { %3428 = shalt.err (!%p3425_p13)
}
  0xc8   : > { %s3429_s23 = scalar_lea.vmem %s638_s8, 256  ;;  %p3437_p7 = scmp.lt.s32.totalorder %s638_s8, %s638_s8 }
  0xc9   : > { %p3430_p0 = scmp.ne.s32.totalorder %s638_s8, %s3429_s23  ;;  %p3438_p9 = scmp.lt.s32.totalorder %s3429_s23, %s3429_s23 }
  0xcb   : > { %p3432_p2 = pnand %p3430_p0, %p4129_p8  ;;  %p3439_p5 = por %p3438_p9, %p3437_p7 }
  0xcd   : > { %p3433_p4 = pneg %p3432_p2 }
  0xcf   : > { %p3440_p10 = pnand %p3439_p5, %p3433_p4 }
  0xd1   : > { %3443 = shalt.err (!%p3440_p10)
}
  0xd2   : > { %3094 = dma.hbm_to_vmem [thread:$0]  (!%p4113_p6), %s4961_s13, 256, %s638_s8, [#allocation26], %s3937_s19, %s3937_s19, %s3938_s16  }
  0xd3   : > { %s4962_s15 = sld [smem:[#allocation64_spill]] }
  0xd9   : > { %s3444_s28 = scalar_lea.hbm %s4962_s15, 512 }
  0xda   : > { %p3445_p1 = scmp.ne.s32.totalorder %s4962_s15, %s3444_s28  ;;  %p3451_p12 = scmp.lt.u32.totalorder %s3444_s28, %s4962_s15 }
  0xdc   : > { %p3447_p3 = pnand %p3445_p1, %p4129_p8 }
  0xde   : > { %p3448_p11 = pneg %p3447_p3 }
  0xe0   : > { %p3453_p13 = pnand %p3451_p12, %p3448_p11 }
  0xe2   : > { %3456 = shalt.err (!%p3453_p13)
}
  0xe3   : > { %s3457_s29 = scalar_lea.vmem %s662_s24, 512  ;;  %p3465_p7 = scmp.lt.s32.totalorder %s662_s24, %s662_s24 }
  0xe4   : > { %p3458_p0 = scmp.ne.s32.totalorder %s662_s24, %s3457_s29  ;;  %p3466_p9 = scmp.lt.s32.totalorder %s3457_s29, %s3457_s29 }
  0xe6   : > { %p3460_p2 = pnand %p3458_p0, %p4129_p8  ;;  %p3467_p5 = por %p3466_p9, %p3465_p7 }
  0xe8   : > { %p3461_p4 = pneg %p3460_p2 }
  0xea   : > { %p3468_p10 = pnand %p3467_p5, %p3461_p4 }
  0xec   : > { %3471 = shalt.err (!%p3468_p10)
}
  0xed   : > { %3100 = dma.hbm_to_vmem [thread:$0]  (!%p4113_p6), %s4962_s15, 512, %s662_s24, [#allocation29], %s3937_s19, %s3937_s19, %s3938_s16  }
  0xee   : > { %s3943_s5 = smov [#allocation31]   ;;  %s4963_s17 = sld [smem:[#allocation66_spill]] }
  0xef   : > { %s686_s6 = sshll.u32 %s3943_s5, 4  ;;  %s687_s6 = int_to_ptr.vmem [resolvable:$true] %s686_s6 }
  0xf4   : > { %s3472_s28 = scalar_lea.hbm %s4963_s17, 16 }
  0xf5   : > { %p3473_p1 = scmp.ne.s32.totalorder %s4963_s17, %s3472_s28  ;;  %p3479_p12 = scmp.lt.u32.totalorder %s3472_s28, %s4963_s17 }
  0xf7   : > { %p3475_p3 = pnand %p3473_p1, %p4129_p8 }
  0xf9   : > { %p3476_p11 = pneg %p3475_p3 }
  0xfb   : > { %p3481_p13 = pnand %p3479_p12, %p3476_p11 }
  0xfd   : > { %3484 = shalt.err (!%p3481_p13)
}
  0xfe   : > { %s3485_s19 = scalar_lea.vmem %s687_s6, 16  ;;  %s3492_s16 = scalar_lea.vmem %s687_s6, 32 }
  0xff   : > { %p3486_p0 = scmp.ne.s32.totalorder %s687_s6, %s3485_s19  ;;  %p3493_p7 = scmp.lt.s32.totalorder %s687_s6, %s687_s6 }
 0x100   : > { %p3494_p9 = scmp.lt.s32.totalorder %s3492_s16, %s3485_s19 }
 0x101   : > { %p3488_p2 = pnand %p3486_p0, %p4129_p8 }
 0x102   : > { %p3495_p5 = por %p3494_p9, %p3493_p7 }
 0x103   : > { %p3489_p4 = pneg %p3488_p2 }
 0x105   : > { %p3496_p10 = pnand %p3495_p5, %p3489_p4 }
 0x107   : > { %3499 = shalt.err (!%p3496_p10)
}
 0x108   : > { %3106 = dma.hbm_to_vmem [thread:$0]  (!%p4113_p6), %s4963_s17, 16, %s687_s6, [#allocation32]  }
 0x109   : > { %s2758_s8 = sadd.s32 4294967294, %s3932_s22   ;;  %s58_s23 = sadd.s32 1, %s3928_s1 }
 0x10a   : > { %p60_p1 = scmp.ge.s32.totalorder %s58_s23, 2  ;;  %s65_s5 = sadd.s32 1, %s3920_s20 }
 0x10b   : > { %p72_p3 = scmp.ne.s32.totalorder %s3920_s20, %s3916_s30  ;;  %p73_p11 = scmp.eq.s32.totalorder %s3932_s22, 0 }
 0x10c   : > { %s5019_s23 = smov (%p60_p1, %s58_s23), 0  ;;  %p78_p13 = scmp.ne.s32.totalorder %s3916_s30, %s3912_s0 }
 0x10d   : > { %4964 = sst [smem:[#allocation48_spill]] %s5019_s23  ;;  %p4308_p12 = por %p73_p11, %p72_p3 }
 0x10e   : > { %s62_s6 = ssub.s32 %s3928_s1, %s5019_s23  ;;  %p494_p0 = scmp.eq.s32.totalorder %s4097_s2, 1 }
 0x10f   : > { %p63_p2 = scmp.eq.s32.totalorder %s62_s6, 0  ;;  %p4966_p4 = scmp.eq.s32.totalorder %s4097_s2, 0 }
 0x110   : > { %p4323_p9 = por %p494_p0, %p72_p3  ;;  %p500_p5 = scmp.eq.s32.totalorder %s2758_s8, 1 }
 0x111   : > { %p4319_p7 = por %p4966_p4, %p78_p13  ;;  %p3140_p1 = scmp.lt.s32.totalorder %s3932_s22, 2 }
 0x112   : > { %s4968_s28 = scalar_select %p4323_p9, 1, 0 }
 0x113   : > { %s4967_s26 = scalar_select %p4319_p7, 1, 0 }
 0x114   : > { %s4328_s14 = scalar_select %p63_p2, %s3920_s20, %s65_s5  }
 0x115   : > { %p4330_p10 = por %p500_p5, %p78_p13  ;;  %s4336_s27 = sand.u32 1, %s3920_s20  }
 0x116   : > { %s725_s10 = sand.u32 1, %s3932_s22   ;;  %p4341_p11 = pnand %p3140_p1, %p4308_p12 }
 0x117   : > { %s4969_s25 = scalar_select %p4330_p10, 1, 0 }
 0x118   : > { %s4970_s19 = scalar_select %p4341_p11, 1, 0 }
 0x119   : > { %s2778_s16 = sshll.u32 %s4336_s27, 3  ;;  %s2779_s24 = sshll.u32 %s3928_s1, 7 }
 0x11a   : > { %s4971_s5 = sld [smem:[#allocation50_spill]]  ;;  %s729_s7 = scalar_lea.vmem [#allocation7], %s2778_s16 }
 0x11b   : > { %s737_s9 = sshll.u32 %s729_s7, 4  ;;  %s4354_s21 = scalar_lea.sflag [#allocation8], %s725_s10  ;;  %s4352_s9 = int_to_ptr.vmem [resolvable:$true] %s737_s9 }
 0x11c   : > { %p4360_p12 = pneg %p4341_p11 }
 0x11e   : > { %s4972_s13 = scalar_select %p4360_p12, 1, 0 }
 0x120   : > { %s4350_s6 = scalar_lea.hbm %s4971_s5, %s2779_s24  ;;  %s3505_s16 = scalar_lea.hbm %s4971_s5, 256 }
 0x121   : > { %s3500_s11 = scalar_lea.hbm %s4350_s6, 128  ;;  %p3506_p2 = scmp.lt.u32.totalorder %s4350_s6, %s4971_s5 }
 0x122   : > { %p3501_p3 = scmp.ne.s32.totalorder %s4350_s6, %s3500_s11  ;;  %p3507_p4 = scmp.lt.u32.totalorder %s3505_s16, %s3500_s11 }
 0x123   : > { %p3509_p1 = scmp.lt.u32.totalorder %s3500_s11, %s4350_s6 }
 0x124   : > { %p3503_p13 = pnand %p4360_p12, %p3501_p3  ;;  %p3508_p5 = por %p3507_p4, %p3506_p2 }
 0x126   : > { %p3504_p0 = pneg %p3503_p13  ;;  %p3510_p10 = por %p3509_p1, %p3508_p5 }
 0x128   : > { %p3511_p9 = pnand %p3510_p10, %p3504_p0 }
 0x12a   : > { %3514 = shalt.err (!%p3511_p9)
}
 0x12b   : > { %s3515_s10 = scalar_lea.vmem %s4352_s9, 128  ;;  %s3944_s24 = smov [#allocation7]  }
 0x12c   : > { %p3516_p3 = scmp.ne.s32.totalorder %s4352_s9, %s3515_s10  ;;  %s3520_s29 = sshll.u32 %s3944_s24, 4  ;;  %s3521_s29 = int_to_ptr.vmem [resolvable:$false] %s3520_s29 }
 0x12d   : > { %s3522_s7 = scalar_lea.vmem %s3521_s29, 256  ;;  %p3523_p6 = scmp.lt.s32.totalorder %s4352_s9, %s3521_s29 }
 0x12e   : > { %p3518_p13 = pnand %p3516_p3, %p4360_p12  ;;  %p3524_p8 = scmp.lt.s32.totalorder %s3522_s7, %s3515_s10 }
 0x130   : > { %p3519_p7 = pneg %p3518_p13  ;;  %p3525_p2 = por %p3524_p8, %p3523_p6 }
 0x132   : > { %p3526_p4 = pnand %p3525_p2, %p3519_p7 }
 0x134   : > { %3529 = shalt.err (!%p3526_p4)
}
 0x135   : > { %3116 = dma.hbm_to_vmem [thread:$0]  (!%p4341_p11), %s4350_s6, 128, %s4352_s9, %s4354_s21  }
 0x136   : > { %s3945_s11 = smov [#allocation12]   ;;  %s3946_s8 = smov [#allocation15]  }
 0x137   : > { %s533_s16 = sshll.u32 %s3945_s11, 4  ;;  %s557_s5 = sshll.u32 %s3946_s8, 4  ;;  %s534_s16 = int_to_ptr.vmem [resolvable:$true] %s533_s16  ;;  %s558_s5 = int_to_ptr.vmem [resolvable:$true] %s557_s5 }
 0x138   : > { %s4973_s4 = sld [smem:[#allocation53_spill]]  ;;  %p4974_p8 = scmp.ne.s32.totalorder %s4956_s12, 0 }
 0x13e   : > { %s3530_s29 = scalar_lea.hbm %s4973_s4, 16 }
 0x13f   : > { %p3531_p6 = scmp.ne.s32.totalorder %s4973_s4, %s3530_s29  ;;  %p3537_p10 = scmp.lt.u32.totalorder %s3530_s29, %s4973_s4 }
 0x141   : > { %p3533_p7 = pnand %p3531_p6, %p4974_p8 }
 0x143   : > { %p3534_p9 = pneg %p3533_p7 }
 0x145   : > { %p3539_p0 = pnand %p3537_p10, %p3534_p9 }
 0x147   : > { %3542 = shalt.err (!%p3539_p0)
}
 0x148   : > { %s3543_s9 = scalar_lea.vmem %s534_s16, 16  ;;  %s3550_s15 = scalar_lea.vmem %s534_s16, 32 }
 0x149   : > { %p3544_p5 = scmp.ne.s32.totalorder %s534_s16, %s3543_s9  ;;  %p3551_p13 = scmp.lt.s32.totalorder %s534_s16, %s534_s16 }
 0x14a   : > { %p3552_p2 = scmp.lt.s32.totalorder %s3550_s15, %s3543_s9 }
 0x14b   : > { %p3546_p1 = pnand %p3544_p5, %p4974_p8 }
 0x14c   : > { %p3553_p4 = por %p3552_p2, %p3551_p13 }
 0x14d   : > { %p3547_p3 = pneg %p3546_p1 }
 0x14f   : > { %p3554_p11 = pnand %p3553_p4, %p3547_p3 }
 0x151   : > { %3557 = shalt.err (!%p3554_p11)
}
 0x152   : > { %p4975_p6 = scmp.ne.s32.totalorder %s4953_s3, 0  ;;  %s4976_s8 = sld [smem:[#allocation55_spill]] }
 0x154   : > { %3067 = dma.hbm_to_vmem [thread:$0]  (!%p4975_p6), %s4973_s4, 16, %s534_s16, [#allocation11]  }
 0x158   : > { %s3558_s24 = scalar_lea.hbm %s4976_s8, 16 }
 0x159   : > { %p3559_p7 = scmp.ne.s32.totalorder %s4976_s8, %s3558_s24  ;;  %p3565_p11 = scmp.lt.u32.totalorder %s3558_s24, %s4976_s8 }
 0x15b   : > { %p3561_p9 = pnand %p3559_p7, %p4974_p8 }
 0x15d   : > { %p3562_p10 = pneg %p3561_p9 }
 0x15f   : > { %p3567_p0 = pnand %p3565_p11, %p3562_p10 }
 0x161   : > { %3570 = shalt.err (!%p3567_p0)
}
 0x162   : > { %s3571_s15 = scalar_lea.vmem %s558_s5, 16  ;;  %s3578_s16 = scalar_lea.vmem %s558_s5, 32 }
 0x163   : > { %p3572_p5 = scmp.ne.s32.totalorder %s558_s5, %s3571_s15  ;;  %p3579_p13 = scmp.lt.s32.totalorder %s558_s5, %s558_s5 }
 0x164   : > { %p3580_p2 = scmp.lt.s32.totalorder %s3578_s16, %s3571_s15 }
 0x165   : > { %p3574_p1 = pnand %p3572_p5, %p4974_p8 }
 0x166   : > { %p3581_p4 = por %p3580_p2, %p3579_p13 }
 0x167   : > { %p3575_p3 = pneg %p3574_p1 }
 0x169   : > { %p3582_p12 = pnand %p3581_p4, %p3575_p3 }
 0x16b   : > { %3585 = shalt.err (!%p3582_p12)
}
 0x16c   : > { %3073 = dma.hbm_to_vmem [thread:$0]  (!%p4975_p6), %s4976_s8, 16, %s558_s5, [#allocation14]  }
 0x16d   : > { %s3947_s17 = smov [#allocation18]   ;;  %s3948_s24 = smov [#allocation21]  }
 0x16e   : > { %s581_s18 = sshll.u32 %s3947_s17, 4  ;;  %s605_s29 = sshll.u32 %s3948_s24, 4  ;;  %s582_s18 = int_to_ptr.vmem [resolvable:$true] %s581_s18  ;;  %s606_s29 = int_to_ptr.vmem [resolvable:$true] %s605_s29 }
 0x16f   : > { %s4977_s9 = sld [smem:[#allocation57_spill]] }
 0x175   : > { %s3586_s4 = scalar_lea.hbm %s4977_s9, 16 }
 0x176   : > { %p3587_p12 = scmp.ne.s32.totalorder %s4977_s9, %s3586_s4  ;;  %p3593_p10 = scmp.lt.u32.totalorder %s3586_s4, %s4977_s9 }
 0x178   : > { %p3589_p7 = pnand %p3587_p12, %p4974_p8 }
 0x17a   : > { %p3590_p9 = pneg %p3589_p7 }
 0x17c   : > { %p3595_p11 = pnand %p3593_p10, %p3590_p9 }
 0x17e   : > { %3598 = shalt.err (!%p3595_p11)
}
 0x17f   : > { %s3599_s5 = scalar_lea.vmem %s582_s18, 16  ;;  %s3606_s11 = scalar_lea.vmem %s582_s18, 32 }
 0x180   : > { %p3600_p0 = scmp.ne.s32.totalorder %s582_s18, %s3599_s5  ;;  %p3607_p3 = scmp.lt.s32.totalorder %s582_s18, %s582_s18 }
 0x181   : > { %p3608_p13 = scmp.lt.s32.totalorder %s3606_s11, %s3599_s5 }
 0x182   : > { %p3602_p5 = pnand %p3600_p0, %p4974_p8 }
 0x183   : > { %p3609_p2 = por %p3608_p13, %p3607_p3 }
 0x184   : > { %p3603_p1 = pneg %p3602_p5 }
 0x186   : > { %p3610_p4 = pnand %p3609_p2, %p3603_p1 }
 0x188   : > { %3613 = shalt.err (!%p3610_p4)
}
 0x189   : > { %3079 = dma.hbm_to_vmem [thread:$0]  (!%p4975_p6), %s4977_s9, 16, %s582_s18, [#allocation17]  }
 0x18a   : > { %s4978_s10 = sld [smem:[#allocation59_spill]] }
 0x190   : > { %s3614_s7 = scalar_lea.hbm %s4978_s10, 16 }
 0x191   : > { %p3615_p12 = scmp.ne.s32.totalorder %s4978_s10, %s3614_s7  ;;  %p3621_p10 = scmp.lt.u32.totalorder %s3614_s7, %s4978_s10 }
 0x193   : > { %p3617_p7 = pnand %p3615_p12, %p4974_p8 }
 0x195   : > { %p3618_p9 = pneg %p3617_p7 }
 0x197   : > { %p3623_p11 = pnand %p3621_p10, %p3618_p9 }
 0x199   : > { %3626 = shalt.err (!%p3623_p11)
}
 0x19a   : > { %s3627_s11 = scalar_lea.vmem %s606_s29, 16  ;;  %s3634_s18 = scalar_lea.vmem %s606_s29, 32 }
 0x19b   : > { %p3628_p0 = scmp.ne.s32.totalorder %s606_s29, %s3627_s11  ;;  %p3635_p3 = scmp.lt.s32.totalorder %s606_s29, %s606_s29 }
 0x19c   : > { %p3636_p13 = scmp.lt.s32.totalorder %s3634_s18, %s3627_s11 }
 0x19d   : > { %p3630_p5 = pnand %p3628_p0, %p4974_p8 }
 0x19e   : > { %p3637_p2 = por %p3636_p13, %p3635_p3 }
 0x19f   : > { %p3631_p1 = pneg %p3630_p5 }
 0x1a1   : > { %p3638_p4 = pnand %p3637_p2, %p3631_p1 }
 0x1a3   : > { %3641 = shalt.err (!%p3638_p4)
}
 0x1a4   : > { %3085 = dma.hbm_to_vmem [thread:$0]  (!%p4975_p6), %s4978_s10, 16, %s606_s29, [#allocation20]  }
 0x1a5   : > { %s3949_s4 = smov [#allocation24]   ;;  %s3950_s7 = smov [#allocation27]  }
 0x1a6   : > { %s627_s23 = sshll.u32 %s3949_s4, 4  ;;  %s651_s15 = sshll.u32 %s3950_s7, 4  ;;  %s628_s23 = int_to_ptr.vmem [resolvable:$true] %s627_s23  ;;  %s652_s15 = int_to_ptr.vmem [resolvable:$true] %s651_s15 }
 0x1a7   : > { %s4979_s5 = sld [smem:[#allocation61_spill]] }
 0x1ad   : > { %s3642_s8 = scalar_lea.hbm %s4979_s5, 16 }
 0x1ae   : > { %p3643_p12 = scmp.ne.s32.totalorder %s4979_s5, %s3642_s8  ;;  %p3649_p10 = scmp.lt.u32.totalorder %s3642_s8, %s4979_s5 }
 0x1b0   : > { %p3645_p7 = pnand %p3643_p12, %p4974_p8 }
 0x1b2   : > { %p3646_p9 = pneg %p3645_p7 }
 0x1b4   : > { %p3651_p11 = pnand %p3649_p10, %p3646_p9 }
 0x1b6   : > { %3654 = shalt.err (!%p3651_p11)
}
 0x1b7   : > { %s3655_s29 = scalar_lea.vmem %s628_s23, 16  ;;  %s3662_s24 = scalar_lea.vmem %s628_s23, 32 }
 0x1b8   : > { %p3656_p0 = scmp.ne.s32.totalorder %s628_s23, %s3655_s29  ;;  %p3663_p3 = scmp.lt.s32.totalorder %s628_s23, %s628_s23 }
 0x1b9   : > { %p3664_p13 = scmp.lt.s32.totalorder %s3662_s24, %s3655_s29 }
 0x1ba   : > { %p3658_p5 = pnand %p3656_p0, %p4974_p8 }
 0x1bb   : > { %p3665_p2 = por %p3664_p13, %p3663_p3 }
 0x1bc   : > { %p3659_p1 = pneg %p3658_p5 }
 0x1be   : > { %p3666_p4 = pnand %p3665_p2, %p3659_p1 }
 0x1c0   : > { %3669 = shalt.err (!%p3666_p4)
}
 0x1c1   : > { %3091 = dma.hbm_to_vmem [thread:$0]  (!%p4975_p6), %s4979_s5, 16, %s628_s23, [#allocation23]  }
 0x1c2   : > { %s4980_s16 = sld [smem:[#allocation63_spill]] }
 0x1c8   : > { %s3670_s6 = scalar_lea.hbm %s4980_s16, 16 }
 0x1c9   : > { %p3671_p12 = scmp.ne.s32.totalorder %s4980_s16, %s3670_s6  ;;  %p3677_p10 = scmp.lt.u32.totalorder %s3670_s6, %s4980_s16 }
 0x1cb   : > { %p3673_p7 = pnand %p3671_p12, %p4974_p8 }
 0x1cd   : > { %p3674_p9 = pneg %p3673_p7 }
 0x1cf   : > { %p3679_p11 = pnand %p3677_p10, %p3674_p9 }
 0x1d1   : > { %3682 = shalt.err (!%p3679_p11)
}
 0x1d2   : > { %s3683_s24 = scalar_lea.vmem %s652_s15, 16  ;;  %s3690_s23 = scalar_lea.vmem %s652_s15, 32 }
 0x1d3   : > { %p3684_p0 = scmp.ne.s32.totalorder %s652_s15, %s3683_s24  ;;  %p3691_p3 = scmp.lt.s32.totalorder %s652_s15, %s652_s15 }
 0x1d4   : > { %p3692_p13 = scmp.lt.s32.totalorder %s3690_s23, %s3683_s24 }
 0x1d5   : > { %p3686_p5 = pnand %p3684_p0, %p4974_p8 }
 0x1d6   : > { %p3693_p2 = por %p3692_p13, %p3691_p3 }
 0x1d7   : > { %p3687_p1 = pneg %p3686_p5 }
 0x1d9   : > { %p3694_p4 = pnand %p3693_p2, %p3687_p1 }
 0x1db   : > { %3697 = shalt.err (!%p3694_p4)
}
 0x1dc   : > { %3097 = dma.hbm_to_vmem [thread:$0]  (!%p4975_p6), %s4980_s16, 16, %s652_s15, [#allocation26]  }
 0x1dd   : > { %s3951_s8 = smov [#allocation30]   ;;  %s3952_s6 = smov [#allocation33]  }
 0x1de   : > { %s675_s9 = sshll.u32 %s3951_s8, 4  ;;  %s697_s11 = sshll.u32 %s3952_s6, 4  ;;  %s676_s9 = int_to_ptr.vmem [resolvable:$true] %s675_s9  ;;  %s698_s11 = int_to_ptr.vmem [resolvable:$true] %s697_s11 }
 0x1df   : > { %s4981_s29 = sld [smem:[#allocation65_spill]] }
 0x1e5   : > { %s3698_s5 = scalar_lea.hbm %s4981_s29, 16 }
 0x1e6   : > { %p3699_p12 = scmp.ne.s32.totalorder %s4981_s29, %s3698_s5  ;;  %p3705_p10 = scmp.lt.u32.totalorder %s3698_s5, %s4981_s29 }
 0x1e8   : > { %p3701_p7 = pnand %p3699_p12, %p4974_p8 }
 0x1ea   : > { %p3702_p9 = pneg %p3701_p7 }
 0x1ec   : > { %p3707_p11 = pnand %p3705_p10, %p3702_p9 }
 0x1ee   : > { %3710 = shalt.err (!%p3707_p11)
}
 0x1ef   : > { %s3711_s15 = scalar_lea.vmem %s676_s9, 16  ;;  %s3718_s7 = scalar_lea.vmem %s676_s9, 32 }
 0x1f0   : > { %p3712_p0 = scmp.ne.s32.totalorder %s676_s9, %s3711_s15  ;;  %p3719_p3 = scmp.lt.s32.totalorder %s676_s9, %s676_s9 }
 0x1f1   : > { %p3720_p13 = scmp.lt.s32.totalorder %s3718_s7, %s3711_s15 }
 0x1f2   : > { %p3714_p5 = pnand %p3712_p0, %p4974_p8 }
 0x1f3   : > { %p3721_p2 = por %p3720_p13, %p3719_p3 }
 0x1f4   : > { %p3715_p1 = pneg %p3714_p5 }
 0x1f6   : > { %p3722_p4 = pnand %p3721_p2, %p3715_p1 }
 0x1f8   : > { %3725 = shalt.err (!%p3722_p4)
}
 0x1f9   : > { %3103 = dma.hbm_to_vmem [thread:$0]  (!%p4975_p6), %s4981_s29, 16, %s676_s9, [#allocation29]  }
 0x1fa   : > { %s4982_s18 = sld [smem:[#allocation67_spill]] }
 0x200   : > { %s3726_s17 = scalar_lea.hbm %s4982_s18, 16 }
 0x201   : > { %p3727_p12 = scmp.ne.s32.totalorder %s4982_s18, %s3726_s17  ;;  %p3733_p10 = scmp.lt.u32.totalorder %s3726_s17, %s4982_s18 }
 0x203   : > { %p3729_p7 = pnand %p3727_p12, %p4974_p8 }
 0x205   : > { %p3730_p9 = pneg %p3729_p7 }
 0x207   : > { %p3735_p11 = pnand %p3733_p10, %p3730_p9 }
 0x209   : > { %3738 = shalt.err (!%p3735_p11)
}
 0x20a   : > { %s3739_s7 = scalar_lea.vmem %s698_s11, 16  ;;  %s3746_s9 = scalar_lea.vmem %s698_s11, 32 }
 0x20b   : > { %p3740_p0 = scmp.ne.s32.totalorder %s698_s11, %s3739_s7  ;;  %p3747_p3 = scmp.lt.s32.totalorder %s698_s11, %s698_s11 }
 0x20c   : > { %p3748_p13 = scmp.lt.s32.totalorder %s3746_s9, %s3739_s7 }
 0x20d   : > { %p3742_p5 = pnand %p3740_p0, %p4974_p8 }
 0x20e   : > { %p3749_p2 = por %p3748_p13, %p3747_p3 }
 0x20f   : > { %p3743_p1 = pneg %p3742_p5 }
 0x211   : > { %p3750_p4 = pnand %p3749_p2, %p3743_p1 }
 0x213   : > { %3753 = shalt.err (!%p3750_p4)
}
 0x214   : > { %3109 = dma.hbm_to_vmem [thread:$0]  (!%p4975_p6), %s4982_s18, 16, %s698_s11, [#allocation32]  }
 0x215   : > { %s2777_s12 = sshll.u32 %s3928_s1, 4  ;;  %s4983_s17 = sld [smem:[#allocation49_spill]] }
 0x216   : > { %s711_s3 = scalar_lea.vmem [#allocation4], %s4336_s27  ;;  %s2780_s4 = sshll.u32 %s4336_s27, 2 }
 0x217   : > { %s718_s23 = sshll.u32 %s711_s3, 4  ;;  %s709_s15 = scalar_lea.sflag [#allocation5], %s4336_s27  ;;  %s4535_s23 = int_to_ptr.vmem [resolvable:$true] %s718_s23 }
 0x218   : > { %p4984_p12 = scmp.ne.s32.totalorder %s4972_s13, 0 }
 0x21b   : > { %s4532_s24 = scalar_lea.hbm %s4983_s17, %s2777_s12  ;;  %s3759_s8 = scalar_lea.hbm %s4983_s17, 32 }
 0x21c   : > { %s3754_s7 = scalar_lea.hbm %s4532_s24, 16  ;;  %p3760_p9 = scmp.lt.u32.totalorder %s4532_s24, %s4983_s17 }
 0x21d   : > { %p3755_p8 = scmp.ne.s32.totalorder %s4532_s24, %s3754_s7  ;;  %p3761_p10 = scmp.lt.u32.totalorder %s3759_s8, %s3754_s7 }
 0x21e   : > { %p3763_p0 = scmp.lt.u32.totalorder %s3754_s7, %s4532_s24 }
 0x21f   : > { %p3757_p6 = pnand %p3755_p8, %p4984_p12  ;;  %p3762_p11 = por %p3761_p10, %p3760_p9 }
 0x221   : > { %p3758_p7 = pneg %p3757_p6  ;;  %p3764_p5 = por %p3763_p0, %p3762_p11 }
 0x223   : > { %p3765_p1 = pnand %p3764_p5, %p3758_p7 }
 0x225   : > { %3768 = shalt.err (!%p3765_p1)
}
 0x226   : > { %s3769_s10 = scalar_lea.vmem %s4535_s23, 16  ;;  %s3953_s5 = smov [#allocation4]  }
 0x227   : > { %p3770_p3 = scmp.ne.s32.totalorder %s4535_s23, %s3769_s10  ;;  %s3774_s3 = sshll.u32 %s3953_s5, 4  ;;  %s3775_s3 = int_to_ptr.vmem [resolvable:$false] %s3774_s3 }
 0x228   : > { %s3776_s11 = scalar_lea.vmem %s3775_s3, 32  ;;  %p3777_p4 = scmp.lt.s32.totalorder %s4535_s23, %s3775_s3 }
 0x229   : > { %p3772_p13 = pnand %p3770_p3, %p4984_p12  ;;  %p3778_p8 = scmp.lt.s32.totalorder %s3776_s11, %s3769_s10 }
 0x22b   : > { %p3773_p2 = pneg %p3772_p13  ;;  %p3779_p6 = por %p3778_p8, %p3777_p4 }
 0x22d   : > { %p3780_p9 = pnand %p3779_p6, %p3773_p2 }
 0x22f   : > { %3783 = shalt.err (!%p3780_p9)
}
 0x230   : > { %p4985_p7 = scmp.ne.s32.totalorder %s4970_s19, 0  ;;  %s2781_s7 = sshll.u32 %s3928_s1, 6 }
 0x231   : > { %s4986_s6 = sld [smem:[#allocation51_spill]]  ;;  %s748_s10 = scalar_lea.vmem [#allocation9], %s2780_s4 }
 0x232   : > { %3113 = dma.hbm_to_vmem [thread:$0]  (!%p4985_p7), %s4532_s24, 16, %s4535_s23, %s709_s15  }
 0x233   : > { %s755_s5 = sshll.u32 %s748_s10, 4  ;;  %s756_s5 = int_to_ptr.vmem [resolvable:$true] %s755_s5 }
 0x237   : > { %s4564_s12 = scalar_lea.hbm %s4986_s6, %s2781_s7  ;;  %s3789_s15 = scalar_lea.hbm %s4986_s6, 128 }
 0x238   : > { %s3784_s3 = scalar_lea.hbm %s4564_s12, 64  ;;  %p3790_p5 = scmp.lt.u32.totalorder %s4564_s12, %s4986_s6 }
 0x239   : > { %p3785_p10 = scmp.ne.s32.totalorder %s4564_s12, %s3784_s3  ;;  %p3791_p1 = scmp.lt.u32.totalorder %s3789_s15, %s3784_s3 }
 0x23a   : > { %p3793_p13 = scmp.lt.u32.totalorder %s3784_s3, %s4564_s12 }
 0x23b   : > { %p3787_p11 = pnand %p3785_p10, %p4984_p12  ;;  %p3792_p3 = por %p3791_p1, %p3790_p5 }
 0x23d   : > { %p3788_p0 = pneg %p3787_p11  ;;  %p3794_p2 = por %p3793_p13, %p3792_p3 }
 0x23f   : > { %p3795_p4 = pnand %p3794_p2, %p3788_p0 }
 0x241   : > { %3798 = shalt.err (!%p3795_p4)
}
 0x242   : > { %s3799_s27 = scalar_lea.vmem %s756_s5, 64  ;;  %s3954_s4 = smov [#allocation9]  }
 0x243   : > { %p3800_p8 = scmp.ne.s32.totalorder %s756_s5, %s3799_s27  ;;  %s3804_s9 = sshll.u32 %s3954_s4, 4  ;;  %s3805_s9 = int_to_ptr.vmem [resolvable:$false] %s3804_s9 }
 0x244   : > { %s3806_s8 = scalar_lea.vmem %s3805_s9, 128  ;;  %p3807_p10 = scmp.lt.s32.totalorder %s756_s5, %s3805_s9 }
 0x245   : > { %p3802_p6 = pnand %p3800_p8, %p4984_p12  ;;  %p3808_p11 = scmp.lt.s32.totalorder %s3806_s8, %s3799_s27 }
 0x247   : > { %p3803_p9 = pneg %p3802_p6  ;;  %p3809_p7 = por %p3808_p11, %p3807_p10 }
 0x249   : > { %p3810_p1 = pnand %p3809_p7, %p3803_p9 }
 0x24b   : > { %3813 = shalt.err (!%p3810_p1)
}
 0x24c   : > { %p4987_p5 = scmp.ne.s32.totalorder %s4970_s19, 0  ;;  %s4988_s10 = sld [smem:[#allocation47_spill]] }
 0x24e   : > { %3119 = dma.hbm_to_vmem [thread:$0]  (!%p4987_p5), %s4564_s12, 64, %s756_s5, %s4354_s21  }
 0x252   : > { %p4989_p0 = scmp.ne.s32.totalorder %s4988_s10, 0 }
 0x253   : > { %s4589_s13 = sand.u32 (!%p4989_p0), 1, %s3916_s30   ;;  %p4990_p12 = scmp.ne.s32.totalorder (!%p4989_p0), %s4967_s26, 0 }
 0x254   : > { %764 = sbr.rel (%p4989_p0) target bundleno = 3042 (0xbe2), region = 96  ;;  %s767_s3 = scalar_lea.sflag (!%p4989_p0), [#allocation5], %s4589_s13 }
 0x255   : > { %s769_s24 = scalar_lea.vmem (!%p4989_p0), [#allocation4], %s4589_s13 }
 0x25b   : > { %3867 = dma.done.wait (%p4990_p12), %s767_s3, 16  }
 0x25c   : > { %3869 = vsyncadd (%p4990_p12), %s767_s3, 4294967280  ;;  %s774_s19 = sand.u32 1, %s4097_s2   ;;  %s2783_s21 = sshll.u32 %s4589_s13, 3 }
 0x25d   : > { %s775_s12 = scalar_lea.sflag [#allocation8], %s774_s19  ;;  %s4601_s5 = scalar_lea.vmem [#allocation7], %s2783_s21 }
 0x25e   : > { %3871 = dma.done.wait (%p4990_p12), %s775_s12, 192  }
 0x25f   : > { %3873 = vsyncadd (%p4990_p12), %s775_s12, 4294967104  ;;  %s2784_s23 = sshll.u32 %s4589_s13, 2  ;;  %p4991_p7 = scmp.eq.s32.totalorder %s4097_s2, 0 }
 0x260   : > { %s787_s15 = scalar_lea.vmem [#allocation9], %s2784_s23 }
 0x261   : > { %3875 = dma.done.wait (%p4991_p7), [#allocation11], 272   ;;  %p4992_p3 = pmov %p4991_p7 }
 0x263   : > { %3877 = vsyncadd (%p4992_p3), [#allocation11], 4294967024  ;;  %p4993_p13 = pmov %p4992_p3 }
 0x264   : > { %p4994_p2 = pmov %p4992_p3 }
 0x265   : > { %3879 = dma.done.wait (%p4993_p13), [#allocation14], 272  }
 0x266   : > { %3881 = vsyncadd (%p4994_p2), [#allocation14], 4294967024  ;;  %p4995_p4 = pmov %p4994_p2 }
 0x267   : > { %p4996_p8 = pmov %p4994_p2 }
 0x268   : > { %3883 = dma.done.wait (%p4995_p4), [#allocation17], 272  }
 0x269   : > { %3885 = vsyncadd (%p4996_p8), [#allocation17], 4294967024  ;;  %p4997_p6 = pmov %p4994_p2 }
 0x26a   : > { %p4998_p9 = pmov %p4994_p2 }
 0x26b   : > { %3887 = dma.done.wait (%p4997_p6), [#allocation20], 272  }
 0x26c   : > { %3889 = vsyncadd (%p4998_p9), [#allocation20], 4294967024  ;;  %p4999_p10 = pmov %p4994_p2 }
 0x26d   : > { %p5000_p11 = pmov %p4994_p2 }
 0x26e   : > { %3891 = dma.done.wait (%p4999_p10), [#allocation23], 32  }
 0x26f   : > { %3893 = vsyncadd (%p5000_p11), [#allocation23], 4294967264  ;;  %p5001_p1 = pmov %p4994_p2 }
 0x271   : > { %3895 = dma.done.wait (%p5001_p1), [#allocation26], 272   ;;  %p5002_p5 = pmov %p5001_p1 }
 0x272   : > { %p5003_p0 = pmov %p5001_p1 }
 0x273   : > { %3897 = vsyncadd (%p5002_p5), [#allocation26], 4294967024 }
 0x274   : > { %3899 = dma.done.wait (%p5003_p0), [#allocation29], 528   ;;  %p5004_p12 = pmov %p5003_p0 }
 0x275   : > { %p5005_p7 = pmov %p5003_p0 }
 0x276   : > { %3901 = vsyncadd (%p5004_p12), [#allocation29], 4294966768 }
 0x277   : > { %3903 = dma.done.wait (%p5005_p7), [#allocation32], 32   ;;  %p5006_p3 = pmov %p5003_p0 }
 0x278   : > { %v3955_v0 = vmov 0.0   ;;  %vm3956_vm0 = vmmov 0   ;;  %v3234_v1 = vld [vmem:[#allocation13] sm:$0xff]   ;;  %v3235_v2 = vld [vmem:[#allocation13 + $0x8] sm:$0xff]   ;;  %vm944_vm1 = vcmask 261120   ;;  %v3238_v5 = vld [vmem:[#allocation16] sm:$0xff]   ;;  %v1066_v30 = vlaneseq }
 0x279   : > { %3905 = vsyncadd (%p5006_p3), [#allocation32], 4294967264  ;;  %2889 = vmatprep.subr.bf16.mxu0 %v3955_v0  ;;  %2893 = vmatprep.mubr.msk.bf16.mxu0 %vm3956_vm0, %v3955_v0  ;;  %v920_v3 = vld [vmem:[%s787_s15] sm:$0xf]  ;;  %v3236_v4 = vld [vmem:[#allocation10] sm:$0xff]   ;;  %s3957_s2 = smov 104  }
 0x27a   : > { %2897 = vmatprep.subr.bf16.mxu1 %v3955_v0  ;;  %2901 = vmatprep.mubr.msk.bf16.mxu1 %vm3956_vm0, %v3955_v0  ;;  %v3237_v6 = vld [vmem:[#allocation10 + $0x8] sm:$0xff]   ;;  %v2802_v10 = vld [vmem:[#allocation15] ss:$0 sm:$0xff]  ;;  %s3958_s26 = smov 120   ;;  %v2814_v16 = vld [vmem:[#allocation12] ss:$0 sm:$0xff] }
 0x27b   : > { %2890 = vmatpush3.bf16.msra.mxu0 %v3234_v1  ;;  %2898 = vmatpush3.bf16.msra.mxu1 %v3238_v5  ;;  %v4649_v7 = vld [vmem:[%s4601_s5] sm:$0xff]  ;;  %s3959_s11 = smov 112   ;;  %v3960_v28 = vmov 1983009808   ;;  %v3961_v31 = vmov 1934713408  }
 0x27c   : > { %2891 = vmatprep.subr.bf16.mxu0 %v3955_v0  ;;  %2899 = vmatprep.subr.bf16.mxu1 %v3955_v0  ;;  %v1361_v8 = vpack.c.bf16 %v4649_v7, %v4649_v7  ;;  %v3239_v9 = vld [vmem:[#allocation16 + $0x8] sm:$0xff]   ;;  %v2806_v22 = vld [vmem:[#allocation18] ss:$0 sm:$0xff]  ;;  %v1064_v29 = vunpack.c.l.s4 %v3960_v28  ;;  %v1096_v32 = vunpack.c.l.s4 %v3961_v31  ;;  %v1067_v34 = vshrl.u32 %v1066_v30, 7  ;;  %s3962_s7 = smov 16   ;;  %s3963_s27 = smov 8  }
 0x27d   : > { %vm1201_vm2 = vcmask 60416   ;;  %vm1594_vm3 = vcmask 64512   ;;  %vm1842_vm4 = vcmask 1043456   ;;  %s3964_s4 = smov 24   ;;  %vm2185_vm5 = vcmask 130048   ;;  %s5007_s9 = sld [smem:[#allocation46_spill]] }
 0x27e   : > { %v1065_v33 = vunpack.c.0.s8 %v1064_v29  ;;  %v1097_v37 = vunpack.c.0.s8 %v1096_v32  ;;  %vm2187_vm6 = vcmask 195584   ;;  %vm2395_vm7 = vcmask 523264   ;;  %s914_s10 = scalar_lea.vmem [#allocation34], %s2783_s21  ;;  %s5008_s12 = sld [smem:[#allocation68_spill]] }
 0x27f   : > { %2892 = vmatpush3.bf16.msra.mxu0 %v3235_v2  ;;  %2900 = vmatpush3.bf16.msra.mxu1 %v3239_v9  ;;  %s2485_s3 = sshll.u32 %s914_s10, 4  ;;  %s2471_s23 = scalar_lea.sflag [#allocation6], %s4589_s13  ;;  %s4830_s3 = int_to_ptr.vmem [resolvable:$true] %s2485_s3 }
 0x280   : > { %2905 = vmatprep.subr.bf16.mxu0 %v3955_v0  ;;  %2913 = vmatprep.subr.bf16.mxu1 %v3955_v0  ;;  %v4676_v38 = vsub.s32 %v1065_v33, %v1067_v34  ;;  %v4678_v44 = vsub.s32 %v1097_v37, %v1067_v34  ;;  %s3814_s15 = scalar_lea.vmem %s4830_s3, 128  ;;  %p5009_p2 = scmp.ne.s32.totalorder %s4968_s28, 0 }
 0x281   : > { %p3815_p13 = scmp.ne.s32.totalorder %s4830_s3, %s3814_s15  ;;  %s3965_s21 = smov [#allocation34]  }
 0x282   : > { %2894 = vmatmul.mubr.msk.bf16.vlgmr.msra.gmra.mrb[0].mxu0 %vm944_vm1, %v920_v3  ;;  %2902 = vmatmul.mubr.msk.bf16.vlgmr.msra.gmra.mrb[0].mxu1 %vm944_vm1, %v920_v3 }
 0x283   : > { %2906 = vmatpush3.bf16.msra.mxu0 %v3236_v4  ;;  %2909 = vmatprep.mubr.msk.bf16.mxu0 %vm3956_vm0, %v3955_v0  ;;  %s2850_s8 = sshll.u32 %s5007_s9, 7  ;;  %p3816_p4 = pnand %p3815_p13, %p5009_p2 }
 0x284   : > { %2907 = vmatprep.subr.bf16.mxu0 %v3955_v0  ;;  %2915 = vmatprep.mubr.msk.bf16.mxu1 %vm3956_vm0, %v3955_v0  ;;  %s4828_s5 = scalar_lea.hbm %s5008_s12, %s2850_s8 }
 0x285   : > { %p3817_p8 = pneg %p3816_p4 }
 0x287   : > { %2908 = vmatpush3.bf16.msra.mxu0 %v3237_v6 }
 0x288   : > { %2919 = vmatprep.subr.bf16.mxu0 %v3955_v0 }
 0x28a   : > { %2910 = vmatmul.mubr.msk.bf16.vlgmr.msra.gmra.mrb[4].mxu0 %vm944_vm1, %v1361_v8 }
 0x28b   : > { %2921 = vmatprep.mubr.msk.bf16.mxu0 %vm3956_vm0, %v3955_v0 }
 0x355   : > { %v982_v11 = vpop.f32.mrb[0].mxu0  ;;  %v1045_v23 = vpop.f32.mrb[0].mxu1 }
 0x356   : > { %v983_v12 = vadd.f32 %v2802_v10, %v982_v11  ;;  %v2895_v13 = vpop.f32.mrb[1].mxu0  ;;  %v4671_v24 = vadd.f32 %v2806_v22, %v1045_v23  ;;  %v2903_v25 = vpop.f32.mrb[1].mxu1 }
 0x357   : > { %v985_v14 = vpop.f32.mrb[2].mxu0  ;;  %v1048_v26 = vpop.f32.mrb[2].mxu1 }
 0x358   : > { %1058 = vrot.lane.b32.xlu1 %v983_v12, %s3957_s2  ;;  %1052 = vrot.lane.b32.xlu0 %v983_v12, %s3958_s26  ;;  %v2896_v15 = vpop.f32.mrb[3].mxu0  ;;  %v2904_v27 = vpop.f32.mrb[3].mxu1 }
 0x35c   : > { %1055 = vrot.lane.b32.xlu0 %v983_v12, %s3959_s11 }
 0x35d   : > { %v1423_v17 = vpop.f32.mrb[4].mxu0 }
 0x35e   : > { %v4666_v18 = vadd.f32 %v2814_v16, %v1423_v17  ;;  %v2911_v19 = vpop.f32.mrb[5].mxu0 }
 0x35f   : > { %v1426_v20 = vpop.f32.mrb[6].mxu0 }
 0x360   : > { %1433 = vrot.lane.b32.xlu0 %v4666_v18, %s3959_s11  ;;  %1430 = vrot.lane.b32.xlu1 %v4666_v18, %s3958_s26  ;;  %v2912_v21 = vpop.f32.mrb[7].mxu0 }
 0x364   : > { %1436 = vrot.lane.b32.xlu1 %v4666_v18, %s3957_s2  ;;  %1207 = vrot.lane.b32.xlu0 %v4671_v24, %s3958_s26 }
 0x368   : > { %1210 = vrot.lane.b32.xlu1 %v4671_v24, %s3959_s11  ;;  %1213 = vrot.lane.b32.xlu0 %v4671_v24, %s3957_s2  ;;  %s3818_s2 = sshll.u32 %s3965_s21, 4  ;;  %s3819_s2 = int_to_ptr.vmem [resolvable:$false] %s3818_s2 }
 0x369   : > { %s3820_s26 = scalar_lea.vmem %s3819_s2, 256  ;;  %p3821_p6 = scmp.lt.s32.totalorder %s4830_s3, %s3819_s2 }
 0x36a   : > { %p3822_p9 = scmp.lt.s32.totalorder %s3820_s26, %s3814_s15 }
 0x36c   : > { %p3823_p10 = por %p3822_p9, %p3821_p6 }
 0x36e   : > { %p3824_p11 = pnand %p3823_p10, %p3817_p8 }
 0x3ca   : > { %v1059_v35 = vpop.permute.xlu1 %1058  ;;  %v1053_v36 = vpop.permute.xlu0 %1052 }
 0x3cb   : > { %v1077_v39 = vcombine.low %v1053_v36, %v1059_v35  ;;  %v1078_v40 = vcombine.high %v1053_v36, %v1059_v35 }
 0x3cd   : > { %v1085_v45 = vrot.slane %v1077_v39, %v4676_v38  ;;  %v1092_v46 = vrot.slane %v1078_v40, %v4676_v38 }
 0x3ce   : > { %v1056_v41 = vpop.permute.xlu0 %1055 }
 0x3cf   : > { %v1061_v42 = vcombine.low %v983_v12, %v1056_v41  ;;  %v1062_v43 = vcombine.high %v983_v12, %v1056_v41 }
 0x3d1   : > { %v1069_v47 = vrot.slane %v1061_v42, %v4676_v38  ;;  %v1076_v48 = vrot.slane %v1062_v43, %v4676_v38 }
 0x3d2   : > { %v1431_v49 = vpop.permute.xlu1 %1430  ;;  %v1434_v54 = vpop.permute.xlu0 %1433 }
 0x3d3   : > { %v1093_v50 = vcombine.low %v1069_v47, %v1085_v45  ;;  %v1094_v51 = vcombine.high %v1069_v47, %v1085_v45  ;;  %v1109_v52 = vcombine.low %v1076_v48, %v1092_v46  ;;  %v1110_v53 = vcombine.high %v1076_v48, %v1092_v46 }
 0x3d4   : > { %v1439_v59 = vcombine.low %v4666_v18, %v1434_v54  ;;  %v1440_v60 = vcombine.high %v4666_v18, %v1434_v54 }
 0x3d5   : > { %v1101_v55 = vrot.slane %v1093_v50, %v4678_v44  ;;  %v1108_v56 = vrot.slane %v1094_v51, %v4678_v44  ;;  %v1117_v57 = vrot.slane %v1109_v52, %v4678_v44  ;;  %v1124_v58 = vrot.slane %v1110_v53, %v4678_v44 }
 0x3d6   : > { %v1437_v61 = vpop.permute.xlu1 %1436  ;;  %v1447_v10 = vrot.slane %v1439_v59, %v4676_v38  ;;  %v1454_v11 = vrot.slane %v1440_v60, %v4676_v38 }
 0x3d7   : > { %v1129_v62 = vcombine.low %v1101_v55, %v1108_v56  ;;  %v2810_v63 = vcombine.high %v1101_v55, %v1108_v56  ;;  %v1145_v1 = vcombine.low %v1117_v57, %v1124_v58  ;;  %v2811_v2 = vcombine.high %v1117_v57, %v1124_v58 }
 0x3d8   : > { %v1455_v3 = vcombine.low %v1431_v49, %v1437_v61  ;;  %v1456_v4 = vcombine.high %v1431_v49, %v1437_v61 }
 0x3d9   : > { %v1136_v5 = vrot.slane %v1129_v62, %v4676_v38  ;;  %v1144_v6 = vrot.slane %v2810_v63, %v4676_v38  ;;  %v1152_v8 = vrot.slane %v1145_v1, %v4676_v38  ;;  %v1160_v9 = vrot.slane %v2811_v2, %v4676_v38 }
 0x3da   : > { %v1463_v12 = vrot.slane %v1455_v3, %v4676_v38  ;;  %v1470_v13 = vrot.slane %v1456_v4, %v4676_v38 }
 0x3db   : > { %v1161_v14 = vcombine.low %v1136_v5, %v1144_v6  ;;  %v1162_v15 = vcombine.high %v1136_v5, %v1144_v6  ;;  %v1177_v16 = vcombine.low %v1152_v8, %v1160_v9  ;;  %v1178_v17 = vcombine.high %v1152_v8, %v1160_v9 }
 0x3dc   : > { %v1471_v18 = vcombine.low %v1447_v10, %v1463_v12  ;;  %v1472_v19 = vcombine.high %v1447_v10, %v1463_v12  ;;  %v1487_v20 = vcombine.low %v1454_v11, %v1470_v13  ;;  %v1488_v21 = vcombine.high %v1454_v11, %v1470_v13  ;;  %v1208_v11 = vpop.permute.xlu0 %1207  ;;  %v1211_v12 = vpop.permute.xlu1 %1210 }
 0x3dd   : > { %v1169_v22 = vrot.slane %v1161_v14, %v4678_v44  ;;  %v1176_v23 = vrot.slane %v1162_v15, %v4678_v44  ;;  %v1185_v25 = vrot.slane %v1177_v16, %v4678_v44  ;;  %v1192_v26 = vrot.slane %v1178_v17, %v4678_v44 }
 0x3de   : > { %v1479_v27 = vrot.slane %v1471_v18, %v4678_v44  ;;  %v1486_v28 = vrot.slane %v1472_v19, %v4678_v44  ;;  %v1495_v29 = vrot.slane %v1487_v20, %v4678_v44  ;;  %v1502_v30 = vrot.slane %v1488_v21, %v4678_v44 }
 0x3df   : > { %v1193_v31 = vcombine.low %v1169_v22, %v1185_v25  ;;  %v1194_v32 = vcombine.high %v1169_v22, %v1185_v25  ;;  %v1195_v33 = vcombine.low %v1176_v23, %v1192_v26  ;;  %v1196_v34 = vcombine.high %v1176_v23, %v1192_v26 }
 0x3e0   : > { %v1507_v35 = vcombine.low %v1479_v27, %v1486_v28  ;;  %v2818_v36 = vcombine.high %v1479_v27, %v1486_v28  ;;  %v1523_v37 = vcombine.low %v1495_v29, %v1502_v30  ;;  %v2819_v39 = vcombine.high %v1495_v29, %v1502_v30  ;;  %v1214_v15 = vpop.permute.xlu0 %1213 }
 0x3e1   : > { %v1197_v40 = vpack.c.bf16 %v1193_v31, %v1193_v31  ;;  %v1198_v41 = vpack.c.bf16 %v1194_v32, %v1194_v32  ;;  %v1199_v42 = vpack.c.bf16 %v1195_v33, %v1195_v33  ;;  %v1200_v43 = vpack.c.bf16 %v1196_v34, %v1196_v34 }
 0x3e2   : > { %v1514_v45 = vrot.slane %v1507_v35, %v4676_v38  ;;  %v1522_v46 = vrot.slane %v2818_v36, %v4676_v38  ;;  %v1530_v47 = vrot.slane %v1523_v37, %v4676_v38  ;;  %v1538_v48 = vrot.slane %v2819_v39, %v4676_v38 }
 0x3e3   : > { %1202 = vst.msk [vmem:[#allocation2] sm:$0xf] %vm1201_vm2, %v1197_v40  ;;  %1203 = vst.msk [vmem:[#allocation2 + $0x4] sm:$0xf] %vm1201_vm2, %v1198_v41  ;;  %v1216_v13 = vcombine.low %v4671_v24, %v1211_v12  ;;  %v1217_v14 = vcombine.high %v4671_v24, %v1211_v12  ;;  %v1232_v16 = vcombine.low %v1208_v11, %v1214_v15 }
 0x3e4   : > { %1204 = vst.msk [vmem:[#allocation2 + $0x8] sm:$0xf] %vm1201_vm2, %v1199_v42  ;;  %1205 = vst.msk [vmem:[#allocation2 + $0xc] sm:$0xf] %vm1201_vm2, %v1200_v43  ;;  %v1539_v49 = vcombine.low %v1514_v45, %v1522_v46  ;;  %v1555_v50 = vcombine.low %v1530_v47, %v1538_v48  ;;  %v1540_v57 = vcombine.high %v1514_v45, %v1522_v46 }
 0x3e5   : > { %v1556_v58 = vcombine.high %v1530_v47, %v1538_v48  ;;  %v1233_v17 = vcombine.high %v1208_v11, %v1214_v15  ;;  %v1224_v18 = vrot.slane %v1216_v13, %v4676_v38  ;;  %v1231_v19 = vrot.slane %v1217_v14, %v4676_v38 }
 0x3e6   : > { %v1547_v51 = vrot.slane %v1539_v49, %v4678_v44  ;;  %v1563_v52 = vrot.slane %v1555_v50, %v4678_v44  ;;  %v1554_v2 = vrot.slane %v1540_v57, %v4678_v44  ;;  %v1240_v20 = vrot.slane %v1232_v16, %v4676_v38 }
 0x3e7   : > { %v1570_v3 = vrot.slane %v1556_v58, %v4678_v44  ;;  %v1247_v21 = vrot.slane %v1233_v17, %v4676_v38 }
 0x3e8   : > { %v1571_v59 = vcombine.low %v1547_v51, %v1563_v52  ;;  %v1572_v60 = vcombine.high %v1547_v51, %v1563_v52  ;;  %v1248_v22 = vcombine.low %v1224_v18, %v1240_v20  ;;  %v1249_v23 = vcombine.high %v1224_v18, %v1240_v20 }
 0x3e9   : > { %v1573_v6 = vcombine.low %v1554_v2, %v1570_v3  ;;  %v1574_v8 = vcombine.high %v1554_v2, %v1570_v3  ;;  %v1264_v25 = vcombine.low %v1231_v19, %v1247_v21  ;;  %v1265_v26 = vcombine.high %v1231_v19, %v1247_v21 }
 0x3ea   : > { %v1579_v53 = vld [vmem:[#allocation2] sm:$0xf]  ;;  %v1580_v54 = vld [vmem:[#allocation2 + $0x4] sm:$0xf]  ;;  %v1575_v63 = vpack.c.bf16 %v1571_v59, %v1571_v59  ;;  %v1576_v1 = vpack.c.bf16 %v1572_v60, %v1572_v60  ;;  %v1256_v27 = vrot.slane %v1248_v22, %v4678_v44  ;;  %v1263_v28 = vrot.slane %v1249_v23, %v4678_v44 }
 0x3eb   : > { %v1599_v55 = vsel %vm1594_vm3, %v1579_v53, 0  ;;  %v1645_v56 = vsel %vm1594_vm3, %v1580_v54, 0  ;;  %v1581_v61 = vld [vmem:[#allocation2 + $0x8] sm:$0xf]  ;;  %v1582_v62 = vld [vmem:[#allocation2 + $0xc] sm:$0xf]  ;;  %v1577_v9 = vpack.c.bf16 %v1573_v6, %v1573_v6  ;;  %v1578_v10 = vpack.c.bf16 %v1574_v8, %v1574_v8 }
 0x3ec   : > { %2914 = vmatpush3.bf16.xpose.msra.mxu1 %v1599_v55  ;;  %2920 = vmatpush3.bf16.xpose.msra.mxu0 %v1645_v56  ;;  %v1691_v4 = vsel %vm1594_vm3, %v1581_v61, 0  ;;  %v1737_v5 = vsel %vm1594_vm3, %v1582_v62, 0  ;;  %v1272_v24 = vrot.slane %v1264_v25, %v4678_v44  ;;  %v1279_v29 = vrot.slane %v1265_v26, %v4678_v44  ;;  %v2820_v60 = vld [vmem:[%s769_s24] ss:$0 sm:$0xff] }
 0x3ed   : > { %2925 = vmatprep.subr.bf16.mxu1 %v3955_v0  ;;  %2931 = vmatprep.subr.bf16.mxu0 %v3955_v0  ;;  %v1284_v30 = vcombine.low %v1256_v27, %v1263_v28  ;;  %v2812_v31 = vcombine.high %v1256_v27, %v1263_v28 }
 0x3ee   : > { %v1300_v32 = vcombine.low %v1272_v24, %v1279_v29  ;;  %v2813_v33 = vcombine.high %v1272_v24, %v1279_v29 }
 0x3ef   : > { %v1291_v34 = vrot.slane %v1284_v30, %v4676_v38  ;;  %v1299_v35 = vrot.slane %v2812_v31, %v4676_v38 }
 0x3f0   : > { %v1307_v36 = vrot.slane %v1300_v32, %v4676_v38  ;;  %v1315_v37 = vrot.slane %v2813_v33, %v4676_v38 }
 0x3f1   : > { %v1316_v39 = vcombine.low %v1291_v34, %v1299_v35  ;;  %v1317_v40 = vcombine.high %v1291_v34, %v1299_v35 }
 0x3f2   : > { %v1332_v41 = vcombine.low %v1307_v36, %v1315_v37  ;;  %v1333_v42 = vcombine.high %v1307_v36, %v1315_v37 }
 0x3f3   : > { %2916 = vmatmul.mubr.msk.bf16.vlgmr.msra.gmra.mrb[4].mxu1 %vm1594_vm3, %v1575_v63  ;;  %2922 = vmatmul.mubr.msk.bf16.vlgmr.msra.gmra.mrb[8].mxu0 %vm1594_vm3, %v1576_v1  ;;  %v1324_v43 = vrot.slane %v1316_v39, %v4678_v44  ;;  %v1331_v45 = vrot.slane %v1317_v40, %v4678_v44 }
 0x3f4   : > { %2926 = vmatpush3.bf16.xpose.msra.mxu1 %v1691_v4  ;;  %2932 = vmatpush3.bf16.xpose.msra.mxu0 %v1737_v5  ;;  %v1340_v46 = vrot.slane %v1332_v41, %v4678_v44  ;;  %v1347_v47 = vrot.slane %v1333_v42, %v4678_v44 }
 0x3f5   : > { %2927 = vmatprep.mubr.msk.bf16.mxu1 %vm3956_vm0, %v3955_v0  ;;  %2933 = vmatprep.mubr.msk.bf16.mxu0 %vm3956_vm0, %v3955_v0 }
 0x3f6   : > { %2937 = vmatprep.subr.bf16.mxu1 %v3955_v0  ;;  %2943 = vmatprep.subr.bf16.mxu0 %v3955_v0  ;;  %v1348_v48 = vcombine.low %v1324_v43, %v1340_v46  ;;  %v1349_v49 = vcombine.high %v1324_v43, %v1340_v46  ;;  %v1350_v50 = vcombine.low %v1331_v45, %v1347_v47 }
 0x3f7   : > { %v1351_v51 = vcombine.high %v1331_v45, %v1347_v47 }
 0x3f8   : > { %v1352_v52 = vpack.c.bf16 %v1348_v48, %v1348_v48  ;;  %v1353_v53 = vpack.c.bf16 %v1349_v49, %v1349_v49  ;;  %v1354_v54 = vpack.c.bf16 %v1350_v50, %v1350_v50 }
 0x3f9   : > { %v1355_v55 = vpack.c.bf16 %v1351_v51, %v1351_v51 }
 0x3fa   : > { %1356 = vst.msk [vmem:[#allocation3] sm:$0xf] %vm1201_vm2, %v1352_v52  ;;  %1357 = vst.msk [vmem:[#allocation3 + $0x4] sm:$0xf] %vm1201_vm2, %v1353_v53 }
 0x3fb   : > { %2928 = vmatmul.mubr.msk.bf16.vlgmr.msra.gmra.mrb[8].mxu1 %vm1594_vm3, %v1577_v9  ;;  %2934 = vmatmul.mubr.msk.bf16.vlgmr.msra.gmra.mrb[12].mxu0 %vm1594_vm3, %v1578_v10  ;;  %1358 = vst.msk [vmem:[#allocation3 + $0x8] sm:$0xf] %vm1201_vm2, %v1354_v54  ;;  %1359 = vst.msk [vmem:[#allocation3 + $0xc] sm:$0xf] %vm1201_vm2, %v1355_v55 }
 0x3fc   : > { %2939 = vmatprep.mubr.msk.bf16.mxu1 %vm3956_vm0, %v3955_v0  ;;  %2945 = vmatprep.mubr.msk.bf16.mxu0 %vm3956_vm0, %v3955_v0 }
 0x401   : > { %v1583_v56 = vld [vmem:[#allocation3] sm:$0xf]  ;;  %v1584_v57 = vld [vmem:[#allocation3 + $0x4] sm:$0xf] }
 0x402   : > { %v1844_v58 = vsel %vm1842_vm4, %v1583_v56, 0  ;;  %v1890_v59 = vsel %vm1842_vm4, %v1584_v57, 0  ;;  %v1585_v36 = vld [vmem:[#allocation3 + $0x8] sm:$0xf]  ;;  %v1586_v41 = vld [vmem:[#allocation3 + $0xc] sm:$0xf] }
 0x403   : > { %2938 = vmatpush3.bf16.msra.mxu1 %v1844_v58  ;;  %2944 = vmatpush3.bf16.msra.mxu0 %v1890_v59  ;;  %v1936_v45 = vsel %vm1842_vm4, %v1585_v36, 0  ;;  %v1982_v46 = vsel %vm1842_vm4, %v1586_v41, 0 }
 0x404   : > { %2949 = vmatprep.subr.bf16.mxu1 %v3955_v0  ;;  %2955 = vmatprep.subr.bf16.mxu0 %v3955_v0 }
 0x4c6   : > { %v1635_v61 = vpop.f32.mrb[4].mxu1  ;;  %v1681_v62 = vpop.f32.mrb[8].mxu0 }
 0x4c7   : > { %v1636_v63 = vadd.f32 %v2820_v60, %v1635_v61  ;;  %v1682_v1 = vadd.f32 %v2820_v60, %v1681_v62  ;;  %v2917_v2 = vpop.f32.mrb[5].mxu1  ;;  %v2923_v3 = vpop.f32.mrb[9].mxu0 }
 0x4c8   : > { %v1638_v4 = vpop.f32.mrb[6].mxu1  ;;  %v1684_v5 = vpop.f32.mrb[10].mxu0 }
 0x4c9   : > { %v2918_v6 = vpop.f32.mrb[7].mxu1  ;;  %v2924_v8 = vpop.f32.mrb[11].mxu0  ;;  %v1779_v9 = vsel %vm1594_vm3, %v1636_v63, -inf  ;;  %v1782_v10 = vsel %vm1594_vm3, %v1682_v1, -inf }
 0x4ca   : > { %1780 = vmax.xlane.f32.xlu1 %v1779_v9  ;;  %1783 = vmax.xlane.f32.xlu0 %v1782_v10 }
 0x4ce   : > { %v1727_v11 = vpop.f32.mrb[8].mxu1  ;;  %v1773_v12 = vpop.f32.mrb[12].mxu0 }
 0x4cf   : > { %v1728_v13 = vadd.f32 %v2820_v60, %v1727_v11  ;;  %v1774_v14 = vadd.f32 %v2820_v60, %v1773_v12  ;;  %v2929_v15 = vpop.f32.mrb[9].mxu1  ;;  %v2935_v16 = vpop.f32.mrb[13].mxu0 }
 0x4d0   : > { %v1730_v17 = vpop.f32.mrb[10].mxu1  ;;  %v1776_v18 = vpop.f32.mrb[14].mxu0 }
 0x4d1   : > { %v2930_v19 = vpop.f32.mrb[11].mxu1  ;;  %v2936_v20 = vpop.f32.mrb[15].mxu0  ;;  %v1785_v21 = vsel %vm1594_vm3, %v1728_v13, -inf  ;;  %v1788_v22 = vsel %vm1594_vm3, %v1774_v14, -inf }
 0x4d2   : > { %1786 = vmax.xlane.f32.xlu0 %v1785_v21  ;;  %1789 = vmax.xlane.f32.xlu1 %v1788_v22 }
 0x557   : > { %v1781_v23 = vpop.xlane.xlu1 %1780  ;;  %v1784_v25 = vpop.xlane.xlu0 %1783 }
 0x558   : > { %v1803_v26 = vsub.f32 %v1636_v63, %v1781_v23  ;;  %v1804_v27 = vsub.f32 %v1682_v1, %v1784_v25  ;;  %v1791_v53 = vsub.f32 -inf, %v1781_v23  ;;  %v1792_v54 = vsub.f32 -inf, %v1784_v25 }
 0x55a   : > { %v1807_v28 = vmul.f32 1.442695, %v1803_v26  ;;  %v1809_v24 = vmul.f32 1.442695, %v1804_v27  ;;  %v1795_v55 = vmul.f32 1.442695, %v1791_v53 }
 0x55b   : > { %v1797_v56 = vmul.f32 1.442695, %v1792_v54 }
 0x55c   : > { %3248 = vpow2.f32 %v1807_v28 }
 0x55d   : > { %3250 = vpow2.f32 %v1809_v24 }
 0x55f   : > { %v1787_v29 = vpop.xlane.xlu0 %1786  ;;  %v1790_v30 = vpop.xlane.xlu1 %1789 }
 0x560   : > { %v1805_v31 = vsub.f32 %v1728_v13, %v1787_v29  ;;  %v1806_v32 = vsub.f32 %v1774_v14, %v1790_v30  ;;  %v1793_v57 = vsub.f32 -inf, %v1787_v29  ;;  %v1794_v58 = vsub.f32 -inf, %v1790_v30 }
 0x562   : > { %v1811_v33 = vmul.f32 1.442695, %v1805_v31  ;;  %v1813_v34 = vmul.f32 1.442695, %v1806_v32  ;;  %v1799_v59 = vmul.f32 1.442695, %v1793_v57 }
 0x563   : > { %v1801_v60 = vmul.f32 1.442695, %v1794_v58  ;;  %v3240_v57 = vld [vmem:[#allocation19] sm:$0xff]  }
 0x564   : > { %3252 = vpow2.f32 %v1811_v33 }
 0x565   : > { %3254 = vpow2.f32 %v1813_v34 }
 0x566   : > { %v3249_v35 = vpop.eup %3248  ;;  %3256 = vpow2.f32 %v1795_v55 }
 0x567   : > { %v1819_v37 = vsel %vm1594_vm3, %v3249_v35, 0.0  ;;  %v1835_v39 = vpack.c.bf16 %v3249_v35, %v3249_v35  ;;  %v3251_v40 = vpop.eup %3250  ;;  %3258 = vpow2.f32 %v1797_v56 }
 0x568   : > { %1820 = vadd.xlane.f32.xlu0 %v1819_v37  ;;  %v1822_v42 = vsel %vm1594_vm3, %v3251_v40, 0.0  ;;  %v1836_v43 = vpack.c.bf16 %v3251_v40, %v3251_v40  ;;  %3260 = vpow2.f32 %v1799_v59 }
 0x569   : > { %2940 = vmatmul.mubr.msk.bf16.vlgmr.msra.gmra.mrb[12].mxu1 %vm1594_vm3, %v1835_v39  ;;  %1823 = vadd.xlane.f32.xlu1 %v1822_v42  ;;  %3262 = vpow2.f32 %v1801_v60 }
 0x56a   : > { %2950 = vmatpush3.bf16.msra.mxu1 %v1936_v45  ;;  %2946 = vmatmul.mubr.msk.bf16.vlgmr.msra.gmra.mrb[16].mxu0 %vm1594_vm3, %v1836_v43 }
 0x56b   : > { %2951 = vmatprep.mubr.msk.bf16.mxu1 %vm3956_vm0, %v3955_v0  ;;  %2956 = vmatpush3.bf16.msra.mxu0 %v1982_v46 }
 0x56c   : > { %2957 = vmatprep.mubr.msk.bf16.mxu0 %vm3956_vm0, %v3955_v0  ;;  %2961 = vmatprep.subr.bf16.mxu1 %v3955_v0 }
 0x56d   : > { %2969 = vmatprep.subr.bf16.mxu0 %v3955_v0 }
 0x56e   : > { %v3253_v47 = vpop.eup %3252 }
 0x56f   : > { %v1825_v48 = vsel %vm1594_vm3, %v3253_v47, 0.0  ;;  %v1837_v49 = vpack.c.bf16 %v3253_v47, %v3253_v47  ;;  %v3255_v50 = vpop.eup %3254 }
 0x570   : > { %1826 = vadd.xlane.f32.xlu0 %v1825_v48  ;;  %v1828_v51 = vsel %vm1594_vm3, %v3255_v50, 0.0  ;;  %v1838_v52 = vpack.c.bf16 %v3255_v50, %v3255_v50  ;;  %v3257_v61 = vpop.eup %3256 }
 0x571   : > { %2952 = vmatmul.mubr.msk.bf16.vlgmr.msra.gmra.mrb[16].mxu1 %vm1594_vm3, %v1837_v49  ;;  %1829 = vadd.xlane.f32.xlu1 %v1828_v51  ;;  %v3259_v62 = vpop.eup %3258  ;;  %v1815_v1 = vmul.f32 0.0, %v3257_v61 }
 0x572   : > { %2965 = vmatprep.mubr.msk.bf16.mxu1 %vm3956_vm0, %v3955_v0  ;;  %2958 = vmatmul.mubr.msk.bf16.vlgmr.msra.gmra.mrb[20].mxu0 %vm1594_vm3, %v1838_v52  ;;  %v1816_v4 = vmul.f32 0.0, %v3259_v62  ;;  %v3261_v6 = vpop.eup %3260 }
 0x573   : > { %2973 = vmatprep.mubr.msk.bf16.mxu0 %vm3956_vm0, %v3955_v0  ;;  %v3263_v8 = vpop.eup %3262  ;;  %v1817_v10 = vmul.f32 0.0, %v3261_v6  ;;  %2962 = vmatpush3.bf16.msra.mxu1 %v3240_v57 }
 0x574   : > { %v1818_v13 = vmul.f32 0.0, %v3263_v8  ;;  %2963 = vmatprep.subr.bf16.mxu1 %v3955_v0 }
 0x5f5   : > { %v1821_v63 = vpop.xlane.xlu0 %1820 }
 0x5f6   : > { %v1824_v2 = vpop.xlane.xlu1 %1823  ;;  %v1831_v3 = vadd.f32 %v1821_v63, %v1815_v1 }
 0x5f7   : > { %v1832_v5 = vadd.f32 %v1824_v2, %v1816_v4 }
 0x5f8   : > { %3264 = vrcp.f32 %v1831_v3  ;;  %v3241_v3 = vld [vmem:[#allocation19 + $0x8] sm:$0xff]  }
 0x5f9   : > { %3266 = vrcp.f32 %v1832_v5  ;;  %2964 = vmatpush3.bf16.msra.mxu1 %v3241_v3 }
 0x5fa   : > { %2977 = vmatprep.subr.bf16.mxu1 %v3955_v0 }
 0x5fd   : > { %v1827_v9 = vpop.xlane.xlu0 %1826 }
 0x5fe   : > { %v1830_v11 = vpop.xlane.xlu1 %1829  ;;  %v1833_v12 = vadd.f32 %v1827_v9, %v1817_v10 }
 0x5ff   : > { %v1834_v14 = vadd.f32 %v1830_v11, %v1818_v13 }
 0x600   : > { %3268 = vrcp.f32 %v1833_v12 }
 0x601   : > { %3270 = vrcp.f32 %v1834_v14 }
 0x602   : > { %v3265_v18 = vpop.eup %3264 }
 0x603   : > { %v3267_v26 = vpop.eup %3266 }
 0x60a   : > { %v3269_v32 = vpop.eup %3268 }
 0x60b   : > { %v3271_v40 = vpop.eup %3270 }
 0x63c   : > { %v1880_v15 = vpop.f32.mrb[12].mxu1 }
 0x63d   : > { %v2024_v16 = vadd.f32 %v1880_v15, %v1815_v1  ;;  %v2941_v17 = vpop.f32.mrb[13].mxu1  ;;  %v1926_v19 = vpop.f32.mrb[16].mxu0 }
 0x63e   : > { %v1883_v20 = vpop.f32.mrb[14].mxu1  ;;  %v2025_v22 = vadd.f32 %v1926_v19, %v1816_v4  ;;  %v2947_v23 = vpop.f32.mrb[17].mxu0 }
 0x63f   : > { %v2032_v21 = vmul.f32 %v3265_v18, %v2024_v16  ;;  %v2942_v25 = vpop.f32.mrb[15].mxu1  ;;  %v1929_v27 = vpop.f32.mrb[18].mxu0 }
 0x640   : > { %v2033_v28 = vmul.f32 %v3267_v26, %v2025_v22  ;;  %v2948_v24 = vpop.f32.mrb[19].mxu0  ;;  %v2831_v27 = vld [vmem:[#allocation21] ss:$0 sm:$0xff] }
 0x644   : > { %v1972_v29 = vpop.f32.mrb[16].mxu1 }
 0x645   : > { %v2026_v30 = vadd.f32 %v1972_v29, %v1817_v10  ;;  %v2953_v31 = vpop.f32.mrb[17].mxu1  ;;  %v2018_v33 = vpop.f32.mrb[20].mxu0 }
 0x646   : > { %v1975_v34 = vpop.f32.mrb[18].mxu1  ;;  %v2027_v36 = vadd.f32 %v2018_v33, %v1818_v13  ;;  %v2959_v37 = vpop.f32.mrb[21].mxu0 }
 0x647   : > { %v2034_v35 = vmul.f32 %v3269_v32, %v2026_v30  ;;  %v2954_v39 = vpop.f32.mrb[19].mxu1  ;;  %v2021_v41 = vpop.f32.mrb[22].mxu0 }
 0x648   : > { %v2035_v45 = vmul.f32 %v3271_v40, %v2027_v36  ;;  %v2960_v46 = vpop.f32.mrb[23].mxu0  ;;  %v3242_v40 = vld [vmem:[#allocation25] sm:$0xff]   ;;  %v3243_v41 = vld [vmem:[#allocation25 + $0x8] sm:$0xff]  }
 0x649   : > { %v2036_v42 = vcombine.low %v2032_v21, %v2034_v35  ;;  %v2037_v43 = vcombine.high %v2032_v21, %v2034_v35  ;;  %2970 = vmatpush3.bf16.msra.mxu0 %v3242_v40 }
 0x64a   : > { %v2052_v49 = vcombine.low %v2033_v28, %v2035_v45  ;;  %v2053_v50 = vcombine.high %v2033_v28, %v2035_v45  ;;  %2971 = vmatprep.subr.bf16.mxu0 %v3955_v0 }
 0x64b   : > { %v2044_v47 = vrot.slane %v2036_v42, %v4676_v38  ;;  %v2051_v48 = vrot.slane %v2037_v43, %v4676_v38  ;;  %v3244_v42 = vld [vmem:[#allocation28] sm:$0xff]   ;;  %v3245_v43 = vld [vmem:[#allocation28 + $0x8] sm:$0xff]  }
 0x64c   : > { %v2060_v51 = vrot.slane %v2052_v49, %v4676_v38  ;;  %v2067_v52 = vrot.slane %v2053_v50, %v4676_v38  ;;  %v2836_v50 = vld [vmem:[#allocation24] ss:$0 sm:$0xff] }
 0x64d   : > { %2972 = vmatpush3.bf16.msra.mxu0 %v3243_v41 }
 0x64e   : > { %v2068_v53 = vcombine.low %v2044_v47, %v2060_v51  ;;  %v2069_v54 = vcombine.high %v2044_v47, %v2060_v51  ;;  %v2084_v55 = vcombine.low %v2051_v48, %v2067_v52  ;;  %v2085_v56 = vcombine.high %v2051_v48, %v2067_v52  ;;  %v2835_v48 = vld [vmem:[#allocation22] ss:$0 sm:$0xff] }
 0x650   : > { %v2076_v58 = vrot.slane %v2068_v53, %v4678_v44  ;;  %v2083_v59 = vrot.slane %v2069_v54, %v4678_v44  ;;  %v2092_v60 = vrot.slane %v2084_v55, %v4678_v44  ;;  %v2099_v61 = vrot.slane %v2085_v56, %v4678_v44  ;;  %v3246_v54 = vld [vmem:[#allocation28 + $0x10] sm:$0xff]   ;;  %v3247_v55 = vld [vmem:[#allocation28 + $0x18] sm:$0xff]  }
 0x651   : > { %v2837_v56 = vld [vmem:[#allocation27] ss:$0 sm:$0xff] }
 0x652   : > { %v2104_v62 = vcombine.low %v2076_v58, %v2083_v59  ;;  %v2829_v63 = vcombine.high %v2076_v58, %v2083_v59  ;;  %v2120_v1 = vcombine.low %v2092_v60, %v2099_v61  ;;  %v2830_v2 = vcombine.high %v2092_v60, %v2099_v61 }
 0x654   : > { %v2111_v4 = vrot.slane %v2104_v62, %v4676_v38  ;;  %v2119_v5 = vrot.slane %v2829_v63, %v4676_v38  ;;  %v2127_v6 = vrot.slane %v2120_v1, %v4676_v38  ;;  %v2135_v8 = vrot.slane %v2830_v2, %v4676_v38  ;;  %v2841_v1 = vld [vmem:[#allocation30] ss:$0 sm:$0xff] }
 0x656   : > { %v2137_v9 = vcombine.high %v2111_v4, %v2119_v5  ;;  %v2153_v10 = vcombine.high %v2127_v6, %v2135_v8  ;;  %v2136_v11 = vcombine.low %v2111_v4, %v2119_v5  ;;  %v2152_v12 = vcombine.low %v2127_v6, %v2135_v8 }
 0x658   : > { %v2151_v13 = vrot.slane %v2137_v9, %v4678_v44  ;;  %v2167_v14 = vrot.slane %v2153_v10, %v4678_v44  ;;  %v2144_v15 = vrot.slane %v2136_v11, %v4678_v44  ;;  %v2160_v16 = vrot.slane %v2152_v12, %v4678_v44 }
 0x65a   : > { %v2170_v17 = vcombine.low %v2151_v13, %v2167_v14  ;;  %v2169_v18 = vcombine.high %v2144_v15, %v2160_v16  ;;  %v2171_v19 = vcombine.high %v2151_v13, %v2167_v14  ;;  %v2168_v20 = vcombine.low %v2144_v15, %v2160_v16 }
 0x65c   : > { %2177 = vrot.lane.b32.xlu1 %v2170_v17, %s3962_s7  ;;  %2173 = vrot.lane.b32.xlu0 %v2169_v18, %s3963_s27  ;;  %v2847_v18 = vld [vmem:[#allocation31] ss:$0 sm:$0xff] }
 0x660   : > { %2181 = vrot.lane.b32.xlu1 %v2171_v19, %s3964_s4 }
 0x6ce   : > { %v2178_v38 = vpop.permute.xlu1 %2177  ;;  %v2174_v21 = vpop.permute.xlu0 %2173 }
 0x6cf   : > { %v2184_v22 = vsel %vm1594_vm3, %v2168_v20, %v2174_v21  ;;  %v2848_v20 = vld [vmem:[#allocation33] ss:$0 sm:$0xff] }
 0x6d0   : > { %v2186_v25 = vsel %vm2185_vm5, %v2184_v22, %v2178_v38 }
 0x6d2   : > { %v2182_v23 = vpop.permute.xlu1 %2181 }
 0x6d3   : > { %v2188_v26 = vsel %vm2187_vm6, %v2186_v25, %v2182_v23 }
 0x6d4   : > { %v2189_v44 = vpack.c.bf16 %v2188_v26, %v2188_v26 }
 0x6d6   : > { %2966 = vmatmul.mubr.msk.bf16.vlgmr.msra.gmra.mrb[20].mxu1 %vm944_vm1, %v2189_v44 }
 0x6d7   : > { %2985 = vmatprep.mubr.msk.bf16.mxu1 %vm3956_vm0, %v3955_v0  ;;  %2978 = vmatpush3.bf16.msra.mxu1 %v3244_v42 }
 0x6d8   : > { %2979 = vmatprep.subr.bf16.mxu1 %v3955_v0 }
 0x6db   : > { %2980 = vmatpush3.bf16.msra.mxu1 %v3245_v43 }
 0x6dc   : > { %2981 = vmatprep.subr.bf16.mxu1 %v3955_v0 }
 0x6df   : > { %2982 = vmatpush3.bf16.msra.mxu1 %v3246_v54 }
 0x6e0   : > { %2983 = vmatprep.subr.bf16.mxu1 %v3955_v0 }
 0x6e3   : > { %2984 = vmatpush3.bf16.msra.mxu1 %v3247_v55 }
 0x7a9   : > { %v2250_v28 = vpop.f32.mrb[20].mxu1 }
 0x7aa   : > { %v2251_v24 = vadd.f32 %v2831_v27, %v2250_v28  ;;  %v2967_v29 = vpop.f32.mrb[21].mxu1 }
 0x7ab   : > { %v2253_v30 = vpop.f32.mrb[22].mxu1 }
 0x7ac   : > { %v2968_v31 = vpop.f32.mrb[23].mxu1  ;;  %v2256_v32 = vadd.f32 %v2251_v24, %v4649_v7 }
 0x7ae   : > { %v2259_v33 = vsel %vm944_vm1, %v2256_v32, 0.0 }
 0x7af   : > { %2260 = vadd.xlane.f32.xlu0 %v2259_v33 }
 0x83c   : > { %v2261_v34 = vpop.xlane.xlu0 %2260 }
 0x83d   : > { %v2263_v35 = vmul.f32 0.03125, %v2261_v34 }
 0x83f   : > { %v2264_v36 = vsub.f32 %v2256_v32, %v2263_v35 }
 0x841   : > { %v2265_v37 = vmul.f32 %v2264_v36, %v2264_v36 }
 0x843   : > { %v2266_v39 = vsel %vm944_vm1, %v2265_v37, 0.0 }
 0x844   : > { %2267 = vadd.xlane.f32.xlu1 %v2266_v39 }
 0x8d1   : > { %v2268_v7 = vpop.xlane.xlu1 %2267 }
 0x8d2   : > { %v2269_v45 = vmul.f32 0.03125, %v2268_v7 }
 0x8d4   : > { %v2270_v46 = vadd.f32 1e-05, %v2269_v45 }
 0x8d6   : > { %3272 = vrsqrt.f32 %v2270_v46 }
 0x8e0   : > { %v3273_v47 = vpop.eup %3272 }
 0x8e1   : > { %v2272_v49 = vmul.f32 %v3273_v47, %v2264_v36 }
 0x8e3   : > { %v2279_v51 = vmul.f32 %v2835_v48, %v2272_v49 }
 0x8e5   : > { %v2286_v52 = vadd.f32 %v2836_v50, %v2279_v51 }
 0x8e7   : > { %v2287_v53 = vpack.c.bf16 %v2286_v52, %v2286_v52 }
 0x8e9   : > { %2974 = vmatmul.mubr.msk.bf16.vlgmr.msra.gmra.mrb[24].mxu0 %vm944_vm1, %v2287_v53 }
 0x9bc   : > { %v2348_v57 = vpop.f32.mrb[24].mxu0 }
 0x9bd   : > { %v2349_v58 = vadd.f32 %v2837_v56, %v2348_v57  ;;  %v2975_v59 = vpop.f32.mrb[25].mxu0 }
 0x9be   : > { %v2351_v60 = vpop.f32.mrb[26].mxu0 }
 0x9bf   : > { %v2354_v61 = vmax.f32 %v2349_v58, 0.0  ;;  %v2976_v62 = vpop.f32.mrb[27].mxu0 }
 0x9c1   : > { %v2355_v63 = vpack.c.bf16 %v2354_v61, %v2354_v61 }
 0x9c3   : > { %2986 = vmatmul.mubr.msk.bf16.vlgmr.msra.gmra.mrb[24].mxu1 %vm2395_vm7, %v2355_v63 }
 0xa96   : > { %v2433_v2 = vpop.f32.mrb[24].mxu1 }
 0xa97   : > { %v2434_v3 = vadd.f32 %v2841_v1, %v2433_v2  ;;  %v2987_v4 = vpop.f32.mrb[25].mxu1 }
 0xa98   : > { %v2436_v5 = vpop.f32.mrb[26].mxu1 }
 0xa99   : > { %v2988_v6 = vpop.f32.mrb[27].mxu1  ;;  %v2439_v8 = vadd.f32 %v2434_v3, %v2286_v52 }
 0xa9b   : > { %v2442_v0 = vsel %vm944_vm1, %v2439_v8, 0.0 }
 0xa9c   : > { %2443 = vadd.xlane.f32.xlu0 %v2442_v0 }
 0xb29   : > { %v2444_v9 = vpop.xlane.xlu0 %2443 }
 0xb2a   : > { %v2445_v10 = vmul.f32 0.03125, %v2444_v9 }
 0xb2c   : > { %v2446_v11 = vsub.f32 %v2439_v8, %v2445_v10 }
 0xb2e   : > { %v2447_v12 = vmul.f32 %v2446_v11, %v2446_v11 }
 0xb30   : > { %v2448_v13 = vsel %vm944_vm1, %v2447_v12, 0.0 }
 0xb31   : > { %2449 = vadd.xlane.f32.xlu0 %v2448_v13 }
 0xbbe   : > { %v2450_v14 = vpop.xlane.xlu0 %2449 }
 0xbbf   : > { %v2451_v15 = vmul.f32 0.03125, %v2450_v14 }
 0xbc1   : > { %v2452_v16 = vadd.f32 1e-05, %v2451_v15 }
 0xbc3   : > { %3274 = vrsqrt.f32 %v2452_v16 }
 0xbcd   : > { %v3275_v17 = vpop.eup %3274 }
 0xbce   : > { %v2454_v19 = vmul.f32 %v3275_v17, %v2446_v11 }
 0xbd0   : > { %v2461_v38 = vmul.f32 %v2847_v18, %v2454_v19 }
 0xbd2   : > { %v2468_v21 = vadd.f32 %v2848_v20, %v2461_v38 }
 0xbd4   : > { %2469 = vst.msk [vmem:[%s914_s10] sm:$0xff] %vm944_vm1, %v2468_v21 }
 0xbd5   : > { %3827 = shalt.err (!%p3824_p11)
}
 0xbd6   : > { %s3828_s13 = scalar_lea.hbm %s4828_s5, 128  ;;  %s3832_s27 = scalar_lea.hbm %s5008_s12, 256 }
 0xbd7   : > { %p3829_p1 = scmp.ne.s32.totalorder %s4828_s5, %s3828_s13  ;;  %p3833_p12 = scmp.lt.u32.totalorder %s4828_s5, %s5008_s12 }
 0xbd8   : > { %p3834_p7 = scmp.lt.u32.totalorder %s3832_s27, %s3828_s13  ;;  %p3836_p13 = scmp.lt.u32.totalorder %s3828_s13, %s4828_s5 }
 0xbd9   : > { %p3830_p5 = pnand %p3829_p1, %p5009_p2 }
 0xbda   : > { %p3835_p3 = por %p3834_p7, %p3833_p12 }
 0xbdb   : > { %p3831_p0 = pneg %p3830_p5 }
 0xbdc   : > { %p3837_p4 = por %p3836_p13, %p3835_p3 }
 0xbde   : > { %p3838_p8 = pnand %p3837_p4, %p3831_p0 }
 0xbe0   : > { %3841 = shalt.err (!%p3838_p8)
}
 0xbe1   : > { %3059 = dma.vmem_to_hbm [thread:$0]  (%p5009_p2), %s4830_s3, 128, %s4828_s5, %s2471_s23  }
 0xbe2 PF: > { %s2497_s8 = sand.u32 1, %s3912_s0   ;;  %p5010_p6 = scmp.ne.s32.totalorder %s4969_s25, 0 }
 0xbe3   : > { %p5011_p9 = scmp.ge.s32.totalorder %s3932_s22, 2  ;;  %s2498_s10 = scalar_lea.sflag [#allocation6], %s2497_s8 }
 0xbe5   : > { %p3121_p10 = pnand %p5011_p9, %p5010_p6 }
 0xbe7   : > { %3907 = dma.done.wait (!%p3121_p10), %s2498_s10, 128  }
 0xbe8   : > { %3909 = vsyncadd (!%p3121_p10), %s2498_s10, 4294967168  ;;  %s46_s22 = sadd.s32 1, %s3932_s22   ;;  %s5012_s28 = sld [smem:[#allocation48_spill]] }
 0xbe9   : > { %p43_p11 = scmp.ge.s32.totalorder %s46_s22, 4   ;;  %s5013_s0 = smov %s3916_s30 }
 0xbea   : > { %s5014_s30 = smov %s3920_s20  ;;  %s5015_s20 = smov %s4328_s14 }
 0xbeb   : > { %s5016_s21 = smov %s3928_s1  ;;  %45 = sbr.rel (!%p43_p11) target bundleno = 37 (0x25), region = 233 }
 0xbee   : > { %s5017_s1 = smov %s5012_s28 }
 0xbf2   :  { %2503 = vsyncpa [#allocation5], 1 }
 0xbf3   :  { %2505 = vsyncpa [#allocation5 + $0x1], 1 }
 0xbf4   :  { %2506 = vsyncpa [#allocation8], 1 }
 0xbf5   :  { %2508 = vsyncpa [#allocation8 + $0x1], 1 }
 0xbf6   :  { %2509 = vsyncpa [#allocation11], 1 }
 0xbf7   :  { %2510 = vsyncpa [#allocation14], 1 }
 0xbf8   :  { %2511 = vsyncpa [#allocation17], 1 }
 0xbf9   :  { %2512 = vsyncpa [#allocation20], 1 }
 0xbfa   :  { %2513 = vsyncpa [#allocation23], 1 }
 0xbfb   :  { %2514 = vsyncpa [#allocation26], 1 }
 0xbfc   :  { %2515 = vsyncpa [#allocation29], 1 }
 0xbfd   :  { %2516 = vsyncpa [#allocation32], 1 }
 0xbfe   :  { %2517 = vsyncpa [#allocation6], 1 }
 0xbff   :  { %2519 = vsyncpa [#allocation6 + $0x1], 1 }

</bundles_post_ra>
